<compile_context>
chip_gen: v7x
topology: tpu7x:2x2x1
jax: 0.10.0
libtpu: 0.0.40
codegen_flags: <defaults>
</compile_context>

<pallas_src>
import functools

import numpy as np
import jax
import jax.numpy as jnp
from jax import lax
from jax.experimental import pallas as pl
from jax.experimental.pallas import tpu as pltpu

EPS = 1e-12              # F.normalize default eps
E_PAD = 128              # lane-aligned embedding width (original emb_size = 100)
_VMEM_LIMIT = 48 * 1024 * 1024   # explicit scoped-VMEM cap (safe on v5e/v6e/v7x)


# ----------------------------------------------------------------------------
# small helpers
# ----------------------------------------------------------------------------

def _pick_tile(dim, pref, align):
    """Largest multiple of `align` <= pref that divides `dim`; else full dim."""
    t = (min(pref, dim) // align) * align
    while t >= align:
        if dim % t == 0:
            return t
        t -= align
    return dim


def _pick_batch_tile(b, pref=128):
    """Batch tile: multiple of 8 (sublane rule on the 2-D output) that divides
    b and leaves >=2 grid steps (keeps a 'parallel' axis for v7x); else b."""
    for c in (pref, 64, 32, 16, 8):
        if c <= b and b % c == 0 and b // c >= 2:
            return c
    return b


def _cparams(sem):
    return pltpu.CompilerParams(dimension_semantics=sem,
                                vmem_limit_bytes=_VMEM_LIMIT)


# ----------------------------------------------------------------------------
# ItemConv layer kernel:  Y = (A @ (X * inv_col)) @ W ; acc_out = acc_in + |Y|
# ----------------------------------------------------------------------------

def _conv_layer_kernel(a_ref, x_ref, inv_ref, w_ref, acc_in_ref,
                       y_ref, acc_out_ref, acc_scr):
    k = pl.program_id(1)

    @pl.when(k == 0)
    def _():
        acc_scr[...] = jnp.zeros_like(acc_scr)

    # fold the column normalization of A into the X tile (A_norm@X == A@(X*inv))
    xs = (x_ref[...] * inv_ref[...]).astype(jnp.bfloat16)           # (tk, E)
    acc_scr[...] += jnp.dot(a_ref[...], xs,                         # bf16 x bf16
                            preferred_element_type=jnp.float32)

    @pl.when(k == pl.num_programs(1) - 1)
    def _():
        # apply the (resident) layer weight once per row tile, in f32
        y = jnp.dot(acc_scr[...], w_ref[...],
                    preferred_element_type=jnp.float32)             # (tm, E)
        y_ref[...] = y.astype(y_ref.dtype)                          # bf16 next-X
        nrm = jnp.sqrt(jnp.sum(y * y, axis=-1, keepdims=True))
        acc_out_ref[...] = acc_in_ref[...] + y / jnp.maximum(nrm, EPS)


def pl_conv_layer(a_bf16, x_bf16, inv_col, w, acc_in, tm=512, tk=1024):
    N = a_bf16.shape[0]
    E = x_bf16.shape[1]
    tm = _pick_tile(N, tm, 8)
    tk = _pick_tile(N, tk, 128)
    return pl.pallas_call(
        _conv_layer_kernel,
        out_shape=(jax.ShapeDtypeStruct((N, E), jnp.bfloat16),   # next-layer X
                   jax.ShapeDtypeStruct((N, E), jnp.float32)),   # running sum
        grid=(N // tm, N // tk),
        in_specs=[pl.BlockSpec((tm, tk), lambda i, k: (i, k)),   # A (bf16)
                  pl.BlockSpec((tk, E), lambda i, k: (k, 0)),    # X (bf16)
                  pl.BlockSpec((tk, 1), lambda i, k: (k, 0)),    # 1/col_sum
                  pl.BlockSpec((E, E), lambda i, k: (0, 0)),     # W (resident)
                  pl.BlockSpec((tm, E), lambda i, k: (i, 0))],   # acc_in
        out_specs=(pl.BlockSpec((tm, E), lambda i, k: (i, 0)),
                   pl.BlockSpec((tm, E), lambda i, k: (i, 0))),
        scratch_shapes=[pltpu.VMEM((tm, E), jnp.float32)],
        compiler_params=_cparams(("parallel", "arbitrary")),
    )(a_bf16, x_bf16, inv_col, w, acc_in)


def item_conv(adjacency_a, embedding, w_item_t_list, layers):
    """ItemConv.forward with a dense (synthetic) adjacency, fully fused."""
    col_sum = jnp.sum(adjacency_a, axis=0)
    inv_col = (1.0 / col_sum).reshape(-1, 1).astype(jnp.float32)     # (N, 1)
    a_bf16 = adjacency_a.astype(jnp.bfloat16)
    x = embedding.astype(jnp.bfloat16)
    acc = embedding
    for l in range(layers):
        x, acc = pl_conv_layer(a_bf16, x, inv_col, w_item_t_list[l], acc)
    return acc / float(layers + 1)


# ----------------------------------------------------------------------------
# Fused session kernel: diff-MLP scores + o1/o2 attention + gated session emb
# (epilogue emits w_k * normalize(select) so the score kernel reads it as-is)
# ----------------------------------------------------------------------------

def _session_kernel(seq_ref, seqa_ref, mask_ref, len_ref, posw_ref,
                    mlpw_ref, mlpb_ref, w1bcs_ref, g2wcs_ref, w2_ref,
                    w3_ref, w4_ref, g1w_ref, g1b_ref, out_ref, *, w_k):
    Bt, L, E = seq_ref.shape
    seq = seq_ref[...]                          # [Bt, L, E]  raw item emb (f32)
    sh_f = seq_ref[:, pl.ds(1, L - 1), :]       # seq[:, 1:, :]
    sh_b = seq_ref[:, pl.ds(0, L - 1), :]       # seq[:, :-1, :]
    seqa = seqa_ref[...]                        # [Bt, L, E]  graph-conv emb
    msk = mask_ref[...]                         # [Bt, L, 1]
    slen = len_ref[...]                         # [Bt, 1, 1]

    # ---- sigmoid(mlp(seq[1:]-seq[:-1])) and the reverse direction ----------
    w_mlp = mlpw_ref[...]                       # [1, E]
    b_mlp = mlpb_ref[...]                       # [1, 1]
    d = jnp.sum((sh_f - sh_b) * w_mlp[None, :, :], axis=-1)       # [Bt, L-1]
    sc_f = jax.nn.sigmoid(d + b_mlp)
    sc_b = jax.nn.sigmoid(-d + b_mlp)

    # ---- o1 + o2: softmax(seq @ shifted^T / 10) @ score (bf16 MXU, f32 acc) -
    seq_b = seq.astype(jnp.bfloat16)
    log_f = jnp.einsum('bqe,bke->bqk', seq_b, sh_f.astype(jnp.bfloat16),
                       preferred_element_type=jnp.float32) / 10.0
    log_b = jnp.einsum('bqe,bke->bqk', seq_b, sh_b.astype(jnp.bfloat16),
                       preferred_element_type=jnp.float32) / 10.0
    e_f = jnp.exp(log_f - jnp.max(log_f, axis=-1, keepdims=True))
    att_f = e_f / jnp.sum(e_f, axis=-1, keepdims=True)
    e_b = jnp.exp(log_b - jnp.max(log_b, axis=-1, keepdims=True))
    att_b = e_b / jnp.sum(e_b, axis=-1, keepdims=True)
    o_col = (jnp.sum(att_f * sc_f[:, None, :], axis=-1, keepdims=True)
             + jnp.sum(att_b * sc_b[:, None, :], axis=-1, keepdims=True))  # [Bt,L,1]

    # ---- session embedding (column sums / pos_w are precomputed in wrapper) -
    hs_col = jnp.sum(o_col, axis=1, keepdims=True) / slen           # [Bt, 1, 1]
    nh = jnp.tanh(posw_ref[...][None, :, :]
                  + o_col * w1bcs_ref[...][None, :, :])             # [Bt, L, E]
    hs_g = hs_col * g2wcs_ref[...][None, :, :]                      # [Bt, 1, E]
    nh = jnp.dot(nh.reshape(Bt * L, E).astype(jnp.bfloat16), g1w_ref[...],
                 preferred_element_type=jnp.float32).reshape(Bt, L, E)
    nh = jax.nn.sigmoid(nh + g1b_ref[...][None, :, :] + hs_g)
    beta = jnp.sum(nh * w2_ref[...][None, :, :], axis=-1, keepdims=True)
    beta = beta * msk                                               # [Bt, L, 1]
    glo = jnp.sum(beta * seqa, axis=1)                              # [Bt, E]
    x0 = seqa[:, 0, :]                                              # [Bt, E]
    gate = jax.nn.sigmoid(
        jnp.dot(glo.astype(jnp.bfloat16), w3_ref[...],
                preferred_element_type=jnp.float32)
        + jnp.dot(x0.astype(jnp.bfloat16), w4_ref[...],
                  preferred_element_type=jnp.float32))
    select = (1.0 - gate) * x0 + gate * glo

    # fused epilogue: sess = w_k * normalize(select)   (done once per row)
    nrm = jnp.sqrt(jnp.sum(select * select, axis=-1, keepdims=True))
    out_ref[...] = w_k * select / jnp.maximum(nrm, EPS)


def pl_session_emb(seq_h, seq_h_a, mask_f, slen, pos_w, mlp_w_row, mlp_b,
                   w1b_cs, g2w_cs, w2_row, w3_bf, w4_bf, glu1_w_bf, glu1_b,
                   w_k):
    B, L, E = seq_h.shape
    Bt = _pick_batch_tile(B)
    kern = functools.partial(_session_kernel, w_k=float(w_k))
    return pl.pallas_call(
        kern,
        out_shape=jax.ShapeDtypeStruct((B, E), jnp.float32),
        grid=(B // Bt,),
        in_specs=[
            pl.BlockSpec((Bt, L, E), lambda i: (i, 0, 0)),   # raw item emb
            pl.BlockSpec((Bt, L, E), lambda i: (i, 0, 0)),   # graph-conv emb
            pl.BlockSpec((Bt, L, 1), lambda i: (i, 0, 0)),   # mask
            pl.BlockSpec((Bt, 1, 1), lambda i: (i, 0, 0)),   # session_len
            pl.BlockSpec((L, E), lambda i: (0, 0)),          # pos_emb @ w_1[:E]
            pl.BlockSpec((1, E), lambda i: (0, 0)),          # mlp weight row
            pl.BlockSpec((1, 1), lambda i: (0, 0)),          # mlp bias
            pl.BlockSpec((1, E), lambda i: (0, 0)),          # colsum(w_1[E:])
            pl.BlockSpec((1, E), lambda i: (0, 0)),          # colsum(glu2.W^T)
            pl.BlockSpec((1, E), lambda i: (0, 0)),          # w_2 row
            pl.BlockSpec((E, E), lambda i: (0, 0)),          # w_3 (bf16)
            pl.BlockSpec((E, E), lambda i: (0, 0)),          # w_4 (bf16)
            pl.BlockSpec((E, E), lambda i: (0, 0)),          # glu1.weight^T (bf16)
            pl.BlockSpec((1, E), lambda i: (0, 0)),          # glu1.bias
        ],
        out_specs=pl.BlockSpec((Bt, E), lambda i: (i, 0)),
        compiler_params=_cparams(("parallel",)),
    )(seq_h, seq_h_a, mask_f, slen, pos_w, mlp_w_row, mlp_b,
      w1b_cs, g2w_cs, w2_row, w3_bf, w4_bf, glu1_w_bf, glu1_b)


# ----------------------------------------------------------------------------
# Score kernel: scores = sess_scaled @ normalize(items)^T, plus the per-node
# edge-MLP scalar t = items @ mlp.w (fused, reuses the item-tile read).
# ----------------------------------------------------------------------------

def _score_kernel(sess_ref, item_ref, mlpw_ref, o_ref, t_ref):
    it = item_ref[...]                                              # (tn, E) f32
    t_ref[...] = jnp.sum(it * mlpw_ref[...], axis=-1, keepdims=True)
    nrm = jnp.sqrt(jnp.sum(it * it, axis=-1, keepdims=True))
    itn = (it / jnp.maximum(nrm, EPS)).astype(jnp.bfloat16)
    s = sess_ref[...].astype(jnp.bfloat16)                          # already w_k*normed
    o_ref[...] = lax.dot_general(s, itn, (((1,), (1,)), ((), ())),
                                 preferred_element_type=jnp.float32)


def pl_scores(sess_scaled, item_emb, mlp_w_row, tn=512):
    B, E = sess_scaled.shape
    N = item_emb.shape[0]
    tn = _pick_tile(N, tn, 128)
    return pl.pallas_call(
        _score_kernel,
        out_shape=(jax.ShapeDtypeStruct((B, N), jnp.float32),
                   jax.ShapeDtypeStruct((N, 1), jnp.float32)),
        grid=(N // tn,),
        in_specs=[pl.BlockSpec((B, E), lambda j: (0, 0)),
                  pl.BlockSpec((tn, E), lambda j: (j, 0)),
                  pl.BlockSpec((1, E), lambda j: (0, 0))],
        out_specs=(pl.BlockSpec((B, tn), lambda j: (0, j)),
                   pl.BlockSpec((tn, 1), lambda j: (j, 0))),
        compiler_params=_cparams(("parallel",)),
    )(sess_scaled, item_emb, mlp_w_row)


# ----------------------------------------------------------------------------
# Forward pass (pure JAX / jit-able glue around the kernels)
# ----------------------------------------------------------------------------

def roc_auc(labels, preds):
    labels = np.asarray(labels)
    preds = np.asarray(preds)
    pos = preds[labels == 1]
    neg = preds[labels == 0]
    diff = pos[:, None] - neg[None, :]
    return float((np.sum(diff > 0) + 0.5 * np.sum(diff == 0))
                 / (pos.size * neg.size))


def rain_forward(params, adjacency_a, a1_row, a1_col, ad1r, ad1c,
                 session_item, session_len, reversed_sess_item, mask, tar,
                 rng_key, layers, lambda1, lambda2, w_k=10.0):
    """Returns (loss_item, scores_item, lambda1*KD1 + lambda2*KD2, auc_pred)."""
    del session_item  # only its shape is used in the torch reference
    n_node, E = params['embedding'].shape
    B, L = reversed_sess_item.shape

    # ---------------- item graph convolution (fused per layer) ---------------
    emb_a = item_conv(adjacency_a, params['embedding'],
                      params['w_item_t'], layers)

    # ---------------- fused session path -------------------------------------
    zeros = jnp.zeros((1, E), jnp.float32)
    item_raw_pad = jnp.concatenate([zeros, params['embedding']], axis=0)
    seq_h = jnp.take(item_raw_pad, reversed_sess_item, axis=0)       # [B,L,E]
    item_a_pad = jnp.concatenate([zeros, emb_a], axis=0)
    seq_h_a = jnp.take(item_a_pad, reversed_sess_item, axis=0)       # [B,L,E]
    mask_f = mask.astype(jnp.float32)[..., None]                     # [B,L,1]
    slen = session_len.reshape(B, 1, 1)

    # hoisted batch-invariant precomputes (tiny, done once per forward)
    pos_w = jnp.dot(params['pos_embedding'][:L], params['w_1a'])     # [L,E]
    w1b_cs = jnp.sum(params['w_1b'], axis=0, keepdims=True)          # [1,E]
    g2w_cs = jnp.sum(params['glu2_w_t'], axis=0, keepdims=True)      # [1,E]

    sess_scaled = pl_session_emb(
        seq_h, seq_h_a, mask_f, slen, pos_w,
        params['mlp_w_row'], params['mlp_b'], w1b_cs, g2w_cs,
        params['w_2_row'],
        params['w_3'].astype(jnp.bfloat16),
        params['w_4'].astype(jnp.bfloat16),
        params['glu1_w_t'].astype(jnp.bfloat16),
        params['glu1_b'], w_k)

    # scores + per-node mlp scalar t = emb_a @ mlp.w (fused in one kernel)
    scores_item, t_col = pl_scores(sess_scaled, emb_a, params['mlp_w_row'])
    t = t_col[:, 0]                                                  # [n_node]

    # ---------------- KD losses on graph edges --------------------------------
    # mlp(emb_a[r] - emb_a[c]) == t[r] - t[c] + b  (linearity of nn.Linear)
    b_mlp = params['mlp_b'][0, 0]
    pos_score = jax.nn.sigmoid(t[ad1r] - t[ad1c] + b_mlp)            # [Ne]
    pos_score_1 = jnp.exp(pos_score / 0.2)

    k_neg, k_bern = jax.random.split(rng_key)
    j = jax.random.randint(k_neg, (ad1c.shape[0],), 0, n_node)
    neg_score = jax.nn.sigmoid(t[ad1r] - t[j] + b_mlp)
    neg_score_1 = jnp.exp(neg_score / 0.2)
    KD_loss1 = -jnp.sum(jnp.log(pos_score_1 / (pos_score_1 + neg_score_1)))

    auc_pred = jnp.concatenate([pos_score, neg_score], axis=0)

    # score over (ad1r, ad1c) is identical to pos_score -> reuse (same math).
    score = pos_score
    KD_loss2 = jnp.mean((1.0 - score) ** 2)                          # MSE(1, s)

    score_a1 = jax.nn.sigmoid(t[a1_row] - t[a1_col] + b_mlp)
    p = 1.0 / (1.0 + jnp.exp(-jnp.log(score_a1) + 0.01) / 1.0)
    I = jax.random.bernoulli(k_bern, p).astype(jnp.float32)
    cnt = jnp.sum(I)
    KD_loss3 = jnp.where(
        cnt > 0,
        jnp.sum(I * (1.0 - score_a1) ** 2) / jnp.maximum(cnt, 1.0),
        0.0)
    KD_loss2 = KD_loss2 + KD_loss3

    # CrossEntropyLoss (mean reduction)
    lse = jax.scipy.special.logsumexp(scores_item, axis=-1)
    picked = jnp.take_along_axis(scores_item, tar[:, None], axis=1)[:, 0]
    loss_item = jnp.mean(lse - picked)

    # TODO(synk): `item_embedding[te]` with te=[14596] is skipped: the index is
    # out of range for the synthetic n_node and the value is unused in the
    # returned tuple.
    return (loss_item, scores_item,
            lambda1 * KD_loss1 + lambda2 * KD_loss2, auc_pred)


# ----------------------------------------------------------------------------
# Parameter init (uniform(-stdv, stdv), stdv = 1/sqrt(emb)) + zero padding
# ----------------------------------------------------------------------------

def init_params(key, n_node, emb, layers, pos_len=300):
    stdv = 1.0 / np.sqrt(emb)
    keys = jax.random.split(key, 12 + layers)
    u = lambda k, shape: jax.random.uniform(k, shape, jnp.float32, -stdv, stdv)
    ki = iter(keys)
    params = {
        'embedding':     u(next(ki), (n_node, emb)),
        'pos_embedding': u(next(ki), (pos_len, emb)),
        'w_1':           u(next(ki), (2 * emb, emb)),
        'w_2':           u(next(ki), (emb, 1)),
        'w_3':           u(next(ki), (emb, emb)),
        'w_4':           u(next(ki), (emb, emb)),
        'glu1_w_t':      u(next(ki), (emb, emb)),   # glu1.weight^T
        'glu1_b':        u(next(ki), (emb,)),
        'glu2_w_t':      u(next(ki), (emb, emb)),   # glu2.weight^T (no bias)
        'mlp_w_t':       u(next(ki), (emb, 1)),     # nn.Linear(100,1).weight^T
        'mlp_b':         u(next(ki), (1, 1)),
    }
    params['w_item_t'] = [u(next(ki), (emb, emb)) for _ in range(layers)]
    return params


def pad_params(p, emb, e_pad):
    """Zero-pad every embedding-sized axis to e_pad (math-neutral)."""
    pad2 = lambda x: jnp.pad(x, ((0, e_pad - x.shape[0]),
                                 (0, e_pad - x.shape[1])))
    padc = lambda x: jnp.pad(x, ((0, 0), (0, e_pad - x.shape[1])))
    return {
        'embedding':     padc(p['embedding']),
        'pos_embedding': padc(p['pos_embedding']),
        'w_1a':          pad2(p['w_1'][:emb]),
        'w_1b':          pad2(p['w_1'][emb:]),
        'w_2_row':       padc(p['w_2'].T),                    # [1, e_pad]
        'w_3':           pad2(p['w_3']),
        'w_4':           pad2(p['w_4']),
        'glu1_w_t':      pad2(p['glu1_w_t']),
        'glu1_b':        padc(p['glu1_b'].reshape(1, emb)),   # [1, e_pad]
        'glu2_w_t':      pad2(p['glu2_w_t']),
        'mlp_w_row':     padc(p['mlp_w_t'].T),                # [1, e_pad]
        'mlp_b':         p['mlp_b'],
        'w_item_t':      [pad2(w) for w in p['w_item_t']],
    }


# ----------------------------------------------------------------------------
if __name__ == "__main__":
    key = jax.random.PRNGKey(0)
    n_node, emb, layers = 64, 100, 2       # emb=100 (mlp = Linear(100,1)); padded to 128
    B, L, Ne = 4, 8, 16
    lambda1, lambda2 = 0.01, 0.01

    k_par, k_adj, k_edges, k_sess, k_rng, k_tar = jax.random.split(key, 6)
    raw_params = init_params(k_par, n_node, emb, layers)
    params = pad_params(raw_params, emb, E_PAD)

    # dense synthetic adjacency with self-loops (positive column sums)
    a = (jax.random.uniform(k_adj, (n_node, n_node)) < 0.1).astype(jnp.float32)
    adjacency_a = a + jnp.eye(n_node, dtype=jnp.float32)

    k1, k2, k3, k4 = jax.random.split(k_edges, 4)
    ad1r = jax.random.randint(k1, (Ne,), 0, n_node)
    ad1c = jax.random.randint(k2, (Ne,), 0, n_node)
    a1_row = jax.random.randint(k3, (Ne,), 0, n_node)
    a1_col = jax.random.randint(k4, (Ne,), 0, n_node)

    ks1, ks2 = jax.random.split(k_sess)
    lens = jax.random.randint(ks1, (B,), 2, L + 1)                  # session lens
    pos_idx = jnp.arange(L)[None, :]
    mask = (pos_idx < lens[:, None]).astype(jnp.int32)              # [B, L]
    items = jax.random.randint(ks2, (B, L), 1, n_node + 1)          # 1..n_node
    reversed_sess_item = items * mask                               # 0 = pad
    session_item = reversed_sess_item
    session_len = lens.astype(jnp.float32)[:, None]                 # [B, 1]
    tar = jax.random.randint(k_tar, (B,), 0, n_node)

    fwd = jax.jit(functools.partial(rain_forward, layers=layers,
                                    lambda1=lambda1, lambda2=lambda2,
                                    w_k=10.0))
    loss_item, scores_item, kd_loss, auc_pred = fwd(
        params, adjacency_a, a1_row, a1_col, ad1r, ad1c,
        session_item, session_len, reversed_sess_item, mask, tar, k_rng)
    jax.block_until_ready((loss_item, scores_item, kd_loss, auc_pred))

    # ROC-AUC on host AFTER the device work finished (kept out of the jitted
    # forward so device dispatch is never stalled mid-graph).
    lab = np.array([1] * int(ad1r.shape[0]) + [0] * int(ad1c.shape[0]))
    cur_acc = roc_auc(lab, np.asarray(auc_pred))

    assert scores_item.shape == (B, n_node)
    assert np.isfinite(np.asarray(loss_item))
    assert np.isfinite(np.asarray(kd_loss))
    assert 0.0 <= cur_acc <= 1.0
    print("KERNEL_OK")
</pallas_src>

<mosaic_0001>
module attributes {stable_mosaic.version = 11 : i64} {
  func.func @_conv_layer_kernel(%arg0: i32, %arg1: i32, %arg2: memref<64x64xbf16, #tpu.memory_space<vmem>>, %arg3: memref<64x128xbf16, #tpu.memory_space<vmem>>, %arg4: memref<64x1xf32, #tpu.memory_space<vmem>>, %arg5: memref<128x128xf32, #tpu.memory_space<vmem>>, %arg6: memref<64x128xf32, #tpu.memory_space<vmem>>, %arg7: memref<64x128xbf16, #tpu.memory_space<vmem>>, %arg8: memref<64x128xf32, #tpu.memory_space<vmem>>, %arg9: memref<64x128xf32, #tpu.memory_space<vmem>>) attributes {dimension_semantics = [#tpu.dimension_semantics<parallel>, #tpu.dimension_semantics<arbitrary>], iteration_bounds = array<i64: 1, 1>, scalar_prefetch = 0 : i64, scratch_operands = 1 : i64, tpu.core_type = #tpu.core_type<tc>, window_params = [{transform_indices = @transform_0, window_bounds = array<i64: 64, 64>}, {transform_indices = @transform_1, window_bounds = array<i64: 64, 128>}, {transform_indices = @transform_2, window_bounds = array<i64: 64, 1>}, {pipeline_mode = #tpu.pipeline_mode<synchronous>, transform_indices = @transform_3, window_bounds = array<i64: 128, 128>}, {transform_indices = @transform_4, window_bounds = array<i64: 64, 128>}, {transform_indices = @transform_5, window_bounds = array<i64: 64, 128>}, {transform_indices = @transform_6, window_bounds = array<i64: 64, 128>}]} {
    %c0_i32 = arith.constant 0 : i32
    %0 = arith.cmpi eq, %arg1, %c0_i32 : i32
    %1 = arith.extui %0 : i1 to i32
    %c0_i32_0 = arith.constant 0 : i32
    %2 = arith.cmpi ne, %1, %c0_i32_0 : i32
    scf.if %2 {
      %cst_12 = arith.constant 0.000000e+00 : f32
      %17 = vector.broadcast %cst_12 : f32 to vector<64x128xf32>
      %c0_13 = arith.constant 0 : index
      %c0_14 = arith.constant 0 : index
      %18 = vector.load %arg9[%c0_13, %c0_14] : memref<64x128xf32, #tpu.memory_space<vmem>>, vector<64x128xf32>
      tpu.vector_store %arg9[%c0_13, %c0_14], %17 {strides = array<i32>} : memref<64x128xf32, #tpu.memory_space<vmem>>, vector<64x128xf32>,
    } else {
    }
    %c0 = arith.constant 0 : index
    %c0_1 = arith.constant 0 : index
    %3 = vector.load %arg3[%c0, %c0_1] : memref<64x128xbf16, #tpu.memory_space<vmem>>, vector<64x128xbf16>
    %c0_2 = arith.constant 0 : index
    %c0_3 = arith.constant 0 : index
    %4 = vector.load %arg4[%c0_2, %c0_3] : memref<64x1xf32, #tpu.memory_space<vmem>>, vector<64x1xf32>
    %5 = arith.extf %3 : vector<64x128xbf16> to vector<64x128xf32>
    %6 = vector.broadcast %4 : vector<64x1xf32> to vector<64x128xf32>
    %7 = arith.mulf %5, %6 : vector<64x128xf32>
    %8 = arith.truncf %7 : vector<64x128xf32> to vector<64x128xbf16>
    %c0_4 = arith.constant 0 : index
    %c0_5 = arith.constant 0 : index
    %9 = vector.load %arg9[%c0_4, %c0_5] : memref<64x128xf32, #tpu.memory_space<vmem>>, vector<64x128xf32>
    %c0_6 = arith.constant 0 : index
    %c0_7 = arith.constant 0 : index
    %10 = vector.load %arg2[%c0_6, %c0_7] : memref<64x64xbf16, #tpu.memory_space<vmem>>, vector<64x64xbf16>
    %cst = arith.constant dense<0.000000e+00> : vector<64x128xf32>
    %11 = tpu.matmul %10, %8, %cst {dimension_numbers = #tpu.dot_dimension_numbers<[1], [0], [0], [1], [0, 0, 1, 1], [], []>} : vector<64x64xbf16>, vector<64x128xbf16>, vector<64x128xf32> -> vector<64x128xf32>
    %12 = arith.addf %9, %11 : vector<64x128xf32>
    %c0_8 = arith.constant 0 : index
    %c0_9 = arith.constant 0 : index
    %13 = vector.load %arg9[%c0_8, %c0_9] : memref<64x128xf32, #tpu.memory_space<vmem>>, vector<64x128xf32>
    tpu.vector_store %arg9[%c0_8, %c0_9], %12 {strides = array<i32>} : memref<64x128xf32, #tpu.memory_space<vmem>>, vector<64x128xf32>,
    %c0_i32_10 = arith.constant 0 : i32
    %14 = arith.cmpi eq, %arg1, %c0_i32_10 : i32
    %15 = arith.extui %14 : i1 to i32
    %c0_i32_11 = arith.constant 0 : i32
    %16 = arith.cmpi ne, %15, %c0_i32_11 : i32
    scf.if %16 {
      %c0_12 = arith.constant 0 : index
      %c0_13 = arith.constant 0 : index
      %17 = vector.load %arg9[%c0_12, %c0_13] : memref<64x128xf32, #tpu.memory_space<vmem>>, vector<64x128xf32>
      %c0_14 = arith.constant 0 : index
      %c0_15 = arith.constant 0 : index
      %18 = vector.load %arg5[%c0_14, %c0_15] : memref<128x128xf32, #tpu.memory_space<vmem>>, vector<128x128xf32>
      %cst_16 = arith.constant dense<0.000000e+00> : vector<64x128xf32>
      %19 = tpu.matmul %17, %18, %cst_16 {dimension_numbers = #tpu.dot_dimension_numbers<[1], [0], [0], [1], [0, 0, 1, 1], [], []>} : vector<64x128xf32>, vector<128x128xf32>, vector<64x128xf32> -> vector<64x128xf32>
      %20 = arith.truncf %19 : vector<64x128xf32> to vector<64x128xbf16>
      %c0_17 = arith.constant 0 : index
      %c0_18 = arith.constant 0 : index
      %21 = vector.load %arg7[%c0_17, %c0_18] : memref<64x128xbf16, #tpu.memory_space<vmem>>, vector<64x128xbf16>
      tpu.vector_store %arg7[%c0_17, %c0_18], %20 {strides = array<i32>} : memref<64x128xbf16, #tpu.memory_space<vmem>>, vector<64x128xbf16>,
      %22 = arith.mulf %19, %19 : vector<64x128xf32>
      %cst_19 = arith.constant dense<0.000000e+00> : vector<64xf32>
      %23 = vector.multi_reduction <add>, %22, %cst_19 [1] : vector<64x128xf32> to vector<64xf32>
      %24 = vector.shape_cast %23 : vector<64xf32> to vector<64x1xf32>
      %25 = math.sqrt %24 : vector<64x1xf32>
      %c0_20 = arith.constant 0 : index
      %c0_21 = arith.constant 0 : index
      %26 = vector.load %arg6[%c0_20, %c0_21] : memref<64x128xf32, #tpu.memory_space<vmem>>, vector<64x128xf32>
      %cst_22 = arith.constant 9.99999996E-13 : f32
      %27 = vector.broadcast %cst_22 : f32 to vector<64x1xf32>
      %28 = arith.maximumf %25, %27 : vector<64x1xf32>
      %29 = vector.broadcast %28 : vector<64x1xf32> to vector<64x128xf32>
      %30 = arith.divf %19, %29 : vector<64x128xf32>
      %31 = arith.addf %26, %30 : vector<64x128xf32>
      %c0_23 = arith.constant 0 : index
      %c0_24 = arith.constant 0 : index
      %32 = vector.load %arg8[%c0_23, %c0_24] : memref<64x128xf32, #tpu.memory_space<vmem>>, vector<64x128xf32>
      tpu.vector_store %arg8[%c0_23, %c0_24], %31 {strides = array<i32>} : memref<64x128xf32, #tpu.memory_space<vmem>>, vector<64x128xf32>,
    } else {
    }
    return
  }
  func.func @transform_0(%arg0: i32, %arg1: i32) -> (i32, i32) {
    %c0_i32 = arith.constant 0 : i32
    return %arg0, %arg1 : i32, i32
  }
  func.func @transform_1(%arg0: i32, %arg1: i32) -> (i32, i32) {
    %c0_i32 = arith.constant 0 : i32
    %c0_i32_0 = arith.constant 0 : i32
    return %arg1, %c0_i32 : i32, i32
  }
  func.func @transform_2(%arg0: i32, %arg1: i32) -> (i32, i32) {
    %c0_i32 = arith.constant 0 : i32
    %c0_i32_0 = arith.constant 0 : i32
    return %arg1, %c0_i32 : i32, i32
  }
  func.func @transform_3(%arg0: i32, %arg1: i32) -> (i32, i32) {
    %c0_i32 = arith.constant 0 : i32
    %c0_i32_0 = arith.constant 0 : i32
    %c0_i32_1 = arith.constant 0 : i32
    return %c0_i32, %c0_i32_0 : i32, i32
  }
  func.func @transform_4(%arg0: i32, %arg1: i32) -> (i32, i32) {
    %c0_i32 = arith.constant 0 : i32
    %c0_i32_0 = arith.constant 0 : i32
    return %arg0, %c0_i32 : i32, i32
  }
  func.func @transform_5(%arg0: i32, %arg1: i32) -> (i32, i32) {
    %c0_i32 = arith.constant 0 : i32
    %c0_i32_0 = arith.constant 0 : i32
    return %arg0, %c0_i32 : i32, i32
  }
  func.func @transform_6(%arg0: i32, %arg1: i32) -> (i32, i32) {
    %c0_i32 = arith.constant 0 : i32
    %c0_i32_0 = arith.constant 0 : i32
    return %arg0, %c0_i32 : i32, i32
  }
}

module attributes {stable_mosaic.version = 11 : i64} {
  func.func @_conv_layer_kernel(%arg0: i32, %arg1: i32, %arg2: memref<64x64xbf16, #tpu.memory_space<vmem>>, %arg3: memref<64x128xbf16, #tpu.memory_space<vmem>>, %arg4: memref<64x1xf32, #tpu.memory_space<vmem>>, %arg5: memref<128x128xf32, #tpu.memory_space<vmem>>, %arg6: memref<64x128xf32, #tpu.memory_space<vmem>>, %arg7: memref<64x128xbf16, #tpu.memory_space<vmem>>, %arg8: memref<64x128xf32, #tpu.memory_space<vmem>>, %arg9: memref<64x128xf32, #tpu.memory_space<vmem>>) attributes {dimension_semantics = [#tpu.dimension_semantics<parallel>, #tpu.dimension_semantics<arbitrary>], iteration_bounds = array<i64: 1, 1>, scalar_prefetch = 0 : i64, scratch_operands = 1 : i64, tpu.core_type = #tpu.core_type<tc>, window_params = [{transform_indices = @transform_0, window_bounds = array<i64: 64, 64>}, {transform_indices = @transform_1, window_bounds = array<i64: 64, 128>}, {transform_indices = @transform_2, window_bounds = array<i64: 64, 1>}, {pipeline_mode = #tpu.pipeline_mode<synchronous>, transform_indices = @transform_3, window_bounds = array<i64: 128, 128>}, {transform_indices = @transform_4, window_bounds = array<i64: 64, 128>}, {transform_indices = @transform_5, window_bounds = array<i64: 64, 128>}, {transform_indices = @transform_6, window_bounds = array<i64: 64, 128>}]} {
    %c0_i32 = arith.constant 0 : i32
    %0 = arith.cmpi eq, %arg1, %c0_i32 : i32
    %1 = arith.extui %0 : i1 to i32
    %c0_i32_0 = arith.constant 0 : i32
    %2 = arith.cmpi ne, %1, %c0_i32_0 : i32
    scf.if %2 {
      %cst_12 = arith.constant 0.000000e+00 : f32
      %17 = vector.broadcast %cst_12 : f32 to vector<64x128xf32>
      %c0_13 = arith.constant 0 : index
      %c0_14 = arith.constant 0 : index
      %18 = vector.load %arg9[%c0_13, %c0_14] : memref<64x128xf32, #tpu.memory_space<vmem>>, vector<64x128xf32>
      tpu.vector_store %arg9[%c0_13, %c0_14], %17 {strides = array<i32>} : memref<64x128xf32, #tpu.memory_space<vmem>>, vector<64x128xf32>,
    } else {
    }
    %c0 = arith.constant 0 : index
    %c0_1 = arith.constant 0 : index
    %3 = vector.load %arg3[%c0, %c0_1] : memref<64x128xbf16, #tpu.memory_space<vmem>>, vector<64x128xbf16>
    %c0_2 = arith.constant 0 : index
    %c0_3 = arith.constant 0 : index
    %4 = vector.load %arg4[%c0_2, %c0_3] : memref<64x1xf32, #tpu.memory_space<vmem>>, vector<64x1xf32>
    %5 = arith.extf %3 : vector<64x128xbf16> to vector<64x128xf32>
    %6 = vector.broadcast %4 : vector<64x1xf32> to vector<64x128xf32>
    %7 = arith.mulf %5, %6 : vector<64x128xf32>
    %8 = arith.truncf %7 : vector<64x128xf32> to vector<64x128xbf16>
    %c0_4 = arith.constant 0 : index
    %c0_5 = arith.constant 0 : index
    %9 = vector.load %arg9[%c0_4, %c0_5] : memref<64x128xf32, #tpu.memory_space<vmem>>, vector<64x128xf32>
    %c0_6 = arith.constant 0 : index
    %c0_7 = arith.constant 0 : index
    %10 = vector.load %arg2[%c0_6, %c0_7] : memref<64x64xbf16, #tpu.memory_space<vmem>>, vector<64x64xbf16>
    %cst = arith.constant dense<0.000000e+00> : vector<64x128xf32>
    %11 = tpu.matmul %10, %8, %cst {dimension_numbers = #tpu.dot_dimension_numbers<[1], [0], [0], [1], [0, 0, 1, 1], [], []>} : vector<64x64xbf16>, vector<64x128xbf16>, vector<64x128xf32> -> vector<64x128xf32>
    %12 = arith.addf %9, %11 : vector<64x128xf32>
    %c0_8 = arith.constant 0 : index
    %c0_9 = arith.constant 0 : index
    %13 = vector.load %arg9[%c0_8, %c0_9] : memref<64x128xf32, #tpu.memory_space<vmem>>, vector<64x128xf32>
    tpu.vector_store %arg9[%c0_8, %c0_9], %12 {strides = array<i32>} : memref<64x128xf32, #tpu.memory_space<vmem>>, vector<64x128xf32>,
    %c0_i32_10 = arith.constant 0 : i32
    %14 = arith.cmpi eq, %arg1, %c0_i32_10 : i32
    %15 = arith.extui %14 : i1 to i32
    %c0_i32_11 = arith.constant 0 : i32
    %16 = arith.cmpi ne, %15, %c0_i32_11 : i32
    scf.if %16 {
      %c0_12 = arith.constant 0 : index
      %c0_13 = arith.constant 0 : index
      %17 = vector.load %arg9[%c0_12, %c0_13] : memref<64x128xf32, #tpu.memory_space<vmem>>, vector<64x128xf32>
      %c0_14 = arith.constant 0 : index
      %c0_15 = arith.constant 0 : index
      %18 = vector.load %arg5[%c0_14, %c0_15] : memref<128x128xf32, #tpu.memory_space<vmem>>, vector<128x128xf32>
      %cst_16 = arith.constant dense<0.000000e+00> : vector<64x128xf32>
      %19 = tpu.matmul %17, %18, %cst_16 {dimension_numbers = #tpu.dot_dimension_numbers<[1], [0], [0], [1], [0, 0, 1, 1], [], []>} : vector<64x128xf32>, vector<128x128xf32>, vector<64x128xf32> -> vector<64x128xf32>
      %20 = arith.truncf %19 : vector<64x128xf32> to vector<64x128xbf16>
      %c0_17 = arith.constant 0 : index
      %c0_18 = arith.constant 0 : index
      %21 = vector.load %arg7[%c0_17, %c0_18] : memref<64x128xbf16, #tpu.memory_space<vmem>>, vector<64x128xbf16>
      tpu.vector_store %arg7[%c0_17, %c0_18], %20 {strides = array<i32>} : memref<64x128xbf16, #tpu.memory_space<vmem>>, vector<64x128xbf16>,
      %22 = arith.mulf %19, %19 : vector<64x128xf32>
      %cst_19 = arith.constant dense<0.000000e+00> : vector<64xf32>
      %23 = vector.multi_reduction <add>, %22, %cst_19 [1] : vector<64x128xf32> to vector<64xf32>
      %24 = vector.shape_cast %23 : vector<64xf32> to vector<64x1xf32>
      %25 = math.sqrt %24 : vector<64x1xf32>
      %c0_20 = arith.constant 0 : index
      %c0_21 = arith.constant 0 : index
      %26 = vector.load %arg6[%c0_20, %c0_21] : memref<64x128xf32, #tpu.memory_space<vmem>>, vector<64x128xf32>
      %cst_22 = arith.constant 9.99999996E-13 : f32
      %27 = vector.broadcast %cst_22 : f32 to vector<64x1xf32>
      %28 = arith.maximumf %25, %27 : vector<64x1xf32>
      %29 = vector.broadcast %28 : vector<64x1xf32> to vector<64x128xf32>
      %30 = arith.divf %19, %29 : vector<64x128xf32>
      %31 = arith.addf %26, %30 : vector<64x128xf32>
      %c0_23 = arith.constant 0 : index
      %c0_24 = arith.constant 0 : index
      %32 = vector.load %arg8[%c0_23, %c0_24] : memref<64x128xf32, #tpu.memory_space<vmem>>, vector<64x128xf32>
      tpu.vector_store %arg8[%c0_23, %c0_24], %31 {strides = array<i32>} : memref<64x128xf32, #tpu.memory_space<vmem>>, vector<64x128xf32>,
    } else {
    }
    return
  }
  func.func @transform_0(%arg0: i32, %arg1: i32) -> (i32, i32) {
    %c0_i32 = arith.constant 0 : i32
    return %arg0, %arg1 : i32, i32
  }
  func.func @transform_1(%arg0: i32, %arg1: i32) -> (i32, i32) {
    %c0_i32 = arith.constant 0 : i32
    %c0_i32_0 = arith.constant 0 : i32
    return %arg1, %c0_i32 : i32, i32
  }
  func.func @transform_2(%arg0: i32, %arg1: i32) -> (i32, i32) {
    %c0_i32 = arith.constant 0 : i32
    %c0_i32_0 = arith.constant 0 : i32
    return %arg1, %c0_i32 : i32, i32
  }
  func.func @transform_3(%arg0: i32, %arg1: i32) -> (i32, i32) {
    %c0_i32 = arith.constant 0 : i32
    %c0_i32_0 = arith.constant 0 : i32
    %c0_i32_1 = arith.constant 0 : i32
    return %c0_i32, %c0_i32_0 : i32, i32
  }
  func.func @transform_4(%arg0: i32, %arg1: i32) -> (i32, i32) {
    %c0_i32 = arith.constant 0 : i32
    %c0_i32_0 = arith.constant 0 : i32
    return %arg0, %c0_i32 : i32, i32
  }
  func.func @transform_5(%arg0: i32, %arg1: i32) -> (i32, i32) {
    %c0_i32 = arith.constant 0 : i32
    %c0_i32_0 = arith.constant 0 : i32
    return %arg0, %c0_i32 : i32, i32
  }
  func.func @transform_6(%arg0: i32, %arg1: i32) -> (i32, i32) {
    %c0_i32 = arith.constant 0 : i32
    %c0_i32_0 = arith.constant 0 : i32
    return %arg0, %c0_i32 : i32, i32
  }
}

module attributes {stable_mosaic.version = 11 : i64} {
  func.func @_session_kernel(%arg0: i32, %arg1: memref<4x8x128xf32, #tpu.memory_space<vmem>>, %arg2: memref<4x8x128xf32, #tpu.memory_space<vmem>>, %arg3: memref<4x8x1xf32, #tpu.memory_space<vmem>>, %arg4: memref<4x1x1xf32, #tpu.memory_space<vmem>>, %arg5: memref<8x128xf32, #tpu.memory_space<vmem>>, %arg6: memref<1x128xf32, #tpu.memory_space<vmem>>, %arg7: memref<1x1xf32, #tpu.memory_space<vmem>>, %arg8: memref<1x128xf32, #tpu.memory_space<vmem>>, %arg9: memref<1x128xf32, #tpu.memory_space<vmem>>, %arg10: memref<1x128xf32, #tpu.memory_space<vmem>>, %arg11: memref<128x128xbf16, #tpu.memory_space<vmem>>, %arg12: memref<128x128xbf16, #tpu.memory_space<vmem>>, %arg13: memref<128x128xbf16, #tpu.memory_space<vmem>>, %arg14: memref<1x128xf32, #tpu.memory_space<vmem>>, %arg15: memref<4x128xf32, #tpu.memory_space<vmem>>) attributes {dimension_semantics = [#tpu.dimension_semantics<parallel>], iteration_bounds = array<i64: 1>, scalar_prefetch = 0 : i64, scratch_operands = 0 : i64, tpu.core_type = #tpu.core_type<tc>, window_params = [{transform_indices = @transform_0, window_bounds = array<i64: 4, 8, 128>}, {transform_indices = @transform_1, window_bounds = array<i64: 4, 8, 128>}, {transform_indices = @transform_2, window_bounds = array<i64: 4, 8, 1>}, {transform_indices = @transform_3, window_bounds = array<i64: 4, 1, 1>}, {pipeline_mode = #tpu.pipeline_mode<synchronous>, transform_indices = @transform_4, window_bounds = array<i64: 8, 128>}, {pipeline_mode = #tpu.pipeline_mode<synchronous>, transform_indices = @transform_5, window_bounds = array<i64: 1, 128>}, {pipeline_mode = #tpu.pipeline_mode<synchronous>, transform_indices = @transform_6, window_bounds = array<i64: 1, 1>}, {pipeline_mode = #tpu.pipeline_mode<synchronous>, transform_indices = @transform_7, window_bounds = array<i64: 1, 128>}, {pipeline_mode = #tpu.pipeline_mode<synchronous>, transform_indices = @transform_8, window_bounds = array<i64: 1, 128>}, {pipeline_mode = #tpu.pipeline_mode<synchronous>, transform_indices = @transform_9, window_bounds = array<i64: 1, 128>}, {pipeline_mode = #tpu.pipeline_mode<synchronous>, transform_indices = @transform_10, window_bounds = array<i64: 128, 128>}, {pipeline_mode = #tpu.pipeline_mode<synchronous>, transform_indices = @transform_11, window_bounds = array<i64: 128, 128>}, {pipeline_mode = #tpu.pipeline_mode<synchronous>, transform_indices = @transform_12, window_bounds = array<i64: 128, 128>}, {pipeline_mode = #tpu.pipeline_mode<synchronous>, transform_indices = @transform_13, window_bounds = array<i64: 1, 128>}, {transform_indices = @transform_14, window_bounds = array<i64: 4, 128>}]} {
    %c0 = arith.constant 0 : index
    %c0_0 = arith.constant 0 : index
    %c0_1 = arith.constant 0 : index
    %0 = vector.load %arg1[%c0, %c0_0, %c0_1] : memref<4x8x128xf32, #tpu.memory_space<vmem>>, vector<4x8x128xf32>
    %c0_2 = arith.constant 0 : index
    %c1 = arith.constant 1 : index
    %c0_3 = arith.constant 0 : index
    %1 = vector.load %arg1[%c0_2, %c1, %c0_3] : memref<4x8x128xf32, #tpu.memory_space<vmem>>, vector<4x7x128xf32>
    %c0_4 = arith.constant 0 : index
    %c0_5 = arith.constant 0 : index
    %c0_6 = arith.constant 0 : index
    %2 = vector.load %arg1[%c0_4, %c0_5, %c0_6] : memref<4x8x128xf32, #tpu.memory_space<vmem>>, vector<4x7x128xf32>
    %c0_7 = arith.constant 0 : index
    %c0_8 = arith.constant 0 : index
    %c0_9 = arith.constant 0 : index
    %3 = vector.load %arg2[%c0_7, %c0_8, %c0_9] : memref<4x8x128xf32, #tpu.memory_space<vmem>>, vector<4x8x128xf32>
    %c0_10 = arith.constant 0 : index
    %c0_11 = arith.constant 0 : index
    %c0_12 = arith.constant 0 : index
    %4 = vector.load %arg3[%c0_10, %c0_11, %c0_12] : memref<4x8x1xf32, #tpu.memory_space<vmem>>, vector<4x8x1xf32>
    %c0_13 = arith.constant 0 : index
    %c0_14 = arith.constant 0 : index
    %c0_15 = arith.constant 0 : index
    %5 = vector.load %arg4[%c0_13, %c0_14, %c0_15] : memref<4x1x1xf32, #tpu.memory_space<vmem>>, vector<4x1x1xf32>
    %c0_16 = arith.constant 0 : index
    %c0_17 = arith.constant 0 : index
    %6 = vector.load %arg6[%c0_16, %c0_17] : memref<1x128xf32, #tpu.memory_space<vmem>>, vector<1x128xf32>
    %c0_18 = arith.constant 0 : index
    %c0_19 = arith.constant 0 : index
    %7 = vector.load %arg7[%c0_18, %c0_19] : memref<1x1xf32, #tpu.memory_space<vmem>>, vector<1x1xf32>
    %8 = arith.subf %1, %2 : vector<4x7x128xf32>
    %9 = vector.shape_cast %6 : vector<1x128xf32> to vector<1x1x128xf32>
    %10 = vector.broadcast %9 : vector<1x1x128xf32> to vector<4x7x128xf32>
    %11 = arith.mulf %8, %10 : vector<4x7x128xf32>
    %cst = arith.constant dense<0.000000e+00> : vector<4x7xf32>
    %12 = vector.multi_reduction <add>, %11, %cst [2] : vector<4x7x128xf32> to vector<4x7xf32>
    %13 = vector.broadcast %7 : vector<1x1xf32> to vector<4x7xf32>
    %14 = arith.addf %12, %13 : vector<4x7xf32>
    %15 = arith.negf %14 : vector<4x7xf32>
    %16 = math.exp %15 : vector<4x7xf32>
    %cst_20 = arith.constant 1.000000e+00 : f32
    %17 = vector.broadcast %cst_20 : f32 to vector<4x7xf32>
    %18 = arith.addf %17, %16 : vector<4x7xf32>
    %19 = arith.divf %17, %18 : vector<4x7xf32>
    %cst_21 = arith.constant 0.000000e+00 : f32
    %20 = vector.broadcast %cst_21 : f32 to vector<4x7xf32>
    %21 = arith.subf %20, %12 : vector<4x7xf32>
    %22 = vector.broadcast %7 : vector<1x1xf32> to vector<4x7xf32>
    %23 = arith.addf %21, %22 : vector<4x7xf32>
    %24 = arith.negf %23 : vector<4x7xf32>
    %25 = math.exp %24 : vector<4x7xf32>
    %cst_22 = arith.constant 1.000000e+00 : f32
    %26 = vector.broadcast %cst_22 : f32 to vector<4x7xf32>
    %27 = arith.addf %26, %25 : vector<4x7xf32>
    %28 = arith.divf %26, %27 : vector<4x7xf32>
    %29 = arith.truncf %0 : vector<4x8x128xf32> to vector<4x8x128xbf16>
    %30 = arith.truncf %1 : vector<4x7x128xf32> to vector<4x7x128xbf16>
    "tpu.trace_start"() <{level = 10 : i32, message = "bqe,bke->bqk"}> : () -> ()
    %cst_23 = arith.constant dense<0.000000e+00> : vector<4x8x7xf32>
    %31 = tpu.matmul %29, %30, %cst_23 {dimension_numbers = #tpu.dot_dimension_numbers<[2], [2], [1], [1], [0, 0, 0, 1, 1, 1], [0], [0]>} : vector<4x8x128xbf16>, vector<4x7x128xbf16>, vector<4x8x7xf32> -> vector<4x8x7xf32>
    "tpu.trace_stop"() : () -> ()
    %cst_24 = arith.constant 1.000000e+01 : f32
    %32 = vector.broadcast %cst_24 : f32 to vector<4x8x7xf32>
    %33 = arith.divf %31, %32 : vector<4x8x7xf32>
    %34 = arith.truncf %2 : vector<4x7x128xf32> to vector<4x7x128xbf16>
    "tpu.trace_start"() <{level = 10 : i32, message = "bqe,bke->bqk"}> : () -> ()
    %cst_25 = arith.constant dense<0.000000e+00> : vector<4x8x7xf32>
    %35 = tpu.matmul %29, %34, %cst_25 {dimension_numbers = #tpu.dot_dimension_numbers<[2], [2], [1], [1], [0, 0, 0, 1, 1, 1], [0], [0]>} : vector<4x8x128xbf16>, vector<4x7x128xbf16>, vector<4x8x7xf32> -> vector<4x8x7xf32>
    "tpu.trace_stop"() : () -> ()
    %cst_26 = arith.constant 1.000000e+01 : f32
    %36 = vector.broadcast %cst_26 : f32 to vector<4x8x7xf32>
    %37 = arith.divf %35, %36 : vector<4x8x7xf32>
    %cst_27 = arith.constant dense<0xFF800000> : vector<4x8xf32>
    %38 = vector.multi_reduction <maximumf>, %33, %cst_27 [2] : vector<4x8x7xf32> to vector<4x8xf32>
    %39 = vector.shape_cast %38 : vector<4x8xf32> to vector<4x8x1xf32>
    %40 = vector.broadcast %39 : vector<4x8x1xf32> to vector<4x8x7xf32>
    %41 = arith.subf %33, %40 : vector<4x8x7xf32>
    %42 = math.exp %41 : vector<4x8x7xf32>
    %cst_28 = arith.constant dense<0.000000e+00> : vector<4x8xf32>
    %43 = vector.multi_reduction <add>, %42, %cst_28 [2] : vector<4x8x7xf32> to vector<4x8xf32>
    %44 = vector.shape_cast %43 : vector<4x8xf32> to vector<4x8x1xf32>
    %45 = vector.broadcast %44 : vector<4x8x1xf32> to vector<4x8x7xf32>
    %46 = arith.divf %42, %45 : vector<4x8x7xf32>
    %cst_29 = arith.constant dense<0xFF800000> : vector<4x8xf32>
    %47 = vector.multi_reduction <maximumf>, %37, %cst_29 [2] : vector<4x8x7xf32> to vector<4x8xf32>
    %48 = vector.shape_cast %47 : vector<4x8xf32> to vector<4x8x1xf32>
    %49 = vector.broadcast %48 : vector<4x8x1xf32> to vector<4x8x7xf32>
    %50 = arith.subf %37, %49 : vector<4x8x7xf32>
    %51 = math.exp %50 : vector<4x8x7xf32>
    %cst_30 = arith.constant dense<0.000000e+00> : vector<4x8xf32>
    %52 = vector.multi_reduction <add>, %51, %cst_30 [2] : vector<4x8x7xf32> to vector<4x8xf32>
    %53 = vector.shape_cast %52 : vector<4x8xf32> to vector<4x8x1xf32>
    %54 = vector.broadcast %53 : vector<4x8x1xf32> to vector<4x8x7xf32>
    %55 = arith.divf %51, %54 : vector<4x8x7xf32>
    %56 = vector.shape_cast %19 : vector<4x7xf32> to vector<4x1x7xf32>
    %57 = vector.broadcast %56 : vector<4x1x7xf32> to vector<4x8x7xf32>
    %58 = arith.mulf %46, %57 : vector<4x8x7xf32>
    %cst_31 = arith.constant dense<0.000000e+00> : vector<4x8xf32>
    %59 = vector.multi_reduction <add>, %58, %cst_31 [2] : vector<4x8x7xf32> to vector<4x8xf32>
    %60 = vector.shape_cast %59 : vector<4x8xf32> to vector<4x8x1xf32>
    %61 = vector.shape_cast %28 : vector<4x7xf32> to vector<4x1x7xf32>
    %62 = vector.broadcast %61 : vector<4x1x7xf32> to vector<4x8x7xf32>
    %63 = arith.mulf %55, %62 : vector<4x8x7xf32>
    %cst_32 = arith.constant dense<0.000000e+00> : vector<4x8xf32>
    %64 = vector.multi_reduction <add>, %63, %cst_32 [2] : vector<4x8x7xf32> to vector<4x8xf32>
    %65 = vector.shape_cast %64 : vector<4x8xf32> to vector<4x8x1xf32>
    %66 = arith.addf %60, %65 : vector<4x8x1xf32>
    %cst_33 = arith.constant dense<0.000000e+00> : vector<4x1xf32>
    %67 = vector.multi_reduction <add>, %66, %cst_33 [1] : vector<4x8x1xf32> to vector<4x1xf32>
    %68 = vector.shape_cast %67 : vector<4x1xf32> to vector<4x1x1xf32>
    %69 = arith.divf %68, %5 : vector<4x1x1xf32>
    %c0_34 = arith.constant 0 : index
    %c0_35 = arith.constant 0 : index
    %70 = vector.load %arg5[%c0_34, %c0_35] : memref<8x128xf32, #tpu.memory_space<vmem>>, vector<8x128xf32>
    %71 = vector.shape_cast %70 : vector<8x128xf32> to vector<1x8x128xf32>
    %c0_36 = arith.constant 0 : index
    %c0_37 = arith.constant 0 : index
    %72 = vector.load %arg8[%c0_36, %c0_37] : memref<1x128xf32, #tpu.memory_space<vmem>>, vector<1x128xf32>
    %73 = vector.shape_cast %72 : vector<1x128xf32> to vector<1x1x128xf32>
    %74 = vector.broadcast %66 : vector<4x8x1xf32> to vector<4x8x128xf32>
    %75 = vector.broadcast %73 : vector<1x1x128xf32> to vector<4x8x128xf32>
    %76 = arith.mulf %74, %75 : vector<4x8x128xf32>
    %77 = vector.broadcast %71 : vector<1x8x128xf32> to vector<4x8x128xf32>
    %78 = arith.addf %77, %76 : vector<4x8x128xf32>
    %79 = math.tanh %78 : vector<4x8x128xf32>
    %c0_38 = arith.constant 0 : index
    %c0_39 = arith.constant 0 : index
    %80 = vector.load %arg9[%c0_38, %c0_39] : memref<1x128xf32, #tpu.memory_space<vmem>>, vector<1x128xf32>
    %81 = vector.shape_cast %80 : vector<1x128xf32> to vector<1x1x128xf32>
    %82 = vector.broadcast %69 : vector<4x1x1xf32> to vector<4x1x128xf32>
    %83 = vector.broadcast %81 : vector<1x1x128xf32> to vector<4x1x128xf32>
    %84 = arith.mulf %82, %83 : vector<4x1x128xf32>
    %85 = vector.shape_cast %79 : vector<4x8x128xf32> to vector<32x128xf32>
    %86 = arith.truncf %85 : vector<32x128xf32> to vector<32x128xbf16>
    %c0_40 = arith.constant 0 : index
    %c0_41 = arith.constant 0 : index
    %87 = vector.load %arg13[%c0_40, %c0_41] : memref<128x128xbf16, #tpu.memory_space<vmem>>, vector<128x128xbf16>
    %cst_42 = arith.constant dense<0.000000e+00> : vector<32x128xf32>
    %88 = tpu.matmul %86, %87, %cst_42 {dimension_numbers = #tpu.dot_dimension_numbers<[1], [0], [0], [1], [0, 0, 1, 1], [], []>} : vector<32x128xbf16>, vector<128x128xbf16>, vector<32x128xf32> -> vector<32x128xf32>
    %89 = vector.shape_cast %88 : vector<32x128xf32> to vector<4x8x128xf32>
    %c0_43 = arith.constant 0 : index
    %c0_44 = arith.constant 0 : index
    %90 = vector.load %arg14[%c0_43, %c0_44] : memref<1x128xf32, #tpu.memory_space<vmem>>, vector<1x128xf32>
    %91 = vector.shape_cast %90 : vector<1x128xf32> to vector<1x1x128xf32>
    %92 = vector.broadcast %91 : vector<1x1x128xf32> to vector<4x8x128xf32>
    %93 = arith.addf %89, %92 : vector<4x8x128xf32>
    %94 = vector.broadcast %84 : vector<4x1x128xf32> to vector<4x8x128xf32>
    %95 = arith.addf %93, %94 : vector<4x8x128xf32>
    %96 = arith.negf %95 : vector<4x8x128xf32>
    %97 = math.exp %96 : vector<4x8x128xf32>
    %cst_45 = arith.constant 1.000000e+00 : f32
    %98 = vector.broadcast %cst_45 : f32 to vector<4x8x128xf32>
    %99 = arith.addf %98, %97 : vector<4x8x128xf32>
    %100 = arith.divf %98, %99 : vector<4x8x128xf32>
    %c0_46 = arith.constant 0 : index
    %c0_47 = arith.constant 0 : index
    %101 = vector.load %arg10[%c0_46, %c0_47] : memref<1x128xf32, #tpu.memory_space<vmem>>, vector<1x128xf32>
    %102 = vector.shape_cast %101 : vector<1x128xf32> to vector<1x1x128xf32>
    %103 = vector.broadcast %102 : vector<1x1x128xf32> to vector<4x8x128xf32>
    %104 = arith.mulf %100, %103 : vector<4x8x128xf32>
    %cst_48 = arith.constant dense<0.000000e+00> : vector<4x8xf32>
    %105 = vector.multi_reduction <add>, %104, %cst_48 [2] : vector<4x8x128xf32> to vector<4x8xf32>
    %106 = vector.shape_cast %105 : vector<4x8xf32> to vector<4x8x1xf32>
    %107 = arith.mulf %106, %4 : vector<4x8x1xf32>
    %108 = vector.broadcast %107 : vector<4x8x1xf32> to vector<4x8x128xf32>
    %109 = arith.mulf %108, %3 : vector<4x8x128xf32>
    %cst_49 = arith.constant dense<0.000000e+00> : vector<4x128xf32>
    %110 = vector.multi_reduction <add>, %109, %cst_49 [1] : vector<4x8x128xf32> to vector<4x128xf32>
    %111 = vector.extract_strided_slice %3 {offsets = [0, 0, 0], sizes = [4, 1, 128], strides = [1, 1, 1]} : vector<4x8x128xf32> to vector<4x1x128xf32>
    %112 = vector.shape_cast %111 : vector<4x1x128xf32> to vector<4x128xf32>
    %113 = arith.truncf %110 : vector<4x128xf32> to vector<4x128xbf16>
    %c0_50 = arith.constant 0 : index
    %c0_51 = arith.constant 0 : index
    %114 = vector.load %arg11[%c0_50, %c0_51] : memref<128x128xbf16, #tpu.memory_space<vmem>>, vector<128x128xbf16>
    %cst_52 = arith.constant dense<0.000000e+00> : vector<4x128xf32>
    %115 = tpu.matmul %113, %114, %cst_52 {dimension_numbers = #tpu.dot_dimension_numbers<[1], [0], [0], [1], [0, 0, 1, 1], [], []>} : vector<4x128xbf16>, vector<128x128xbf16>, vector<4x128xf32> -> vector<4x128xf32>
    %116 = arith.truncf %112 : vector<4x128xf32> to vector<4x128xbf16>
    %c0_53 = arith.constant 0 : index
    %c0_54 = arith.constant 0 : index
    %117 = vector.load %arg12[%c0_53, %c0_54] : memref<128x128xbf16, #tpu.memory_space<vmem>>, vector<128x128xbf16>
    %cst_55 = arith.constant dense<0.000000e+00> : vector<4x128xf32>
    %118 = tpu.matmul %116, %117, %cst_55 {dimension_numbers = #tpu.dot_dimension_numbers<[1], [0], [0], [1], [0, 0, 1, 1], [], []>} : vector<4x128xbf16>, vector<128x128xbf16>, vector<4x128xf32> -> vector<4x128xf32>
    %119 = arith.addf %115, %118 : vector<4x128xf32>
    %120 = arith.negf %119 : vector<4x128xf32>
    %121 = math.exp %120 : vector<4x128xf32>
    %cst_56 = arith.constant 1.000000e+00 : f32
    %122 = vector.broadcast %cst_56 : f32 to vector<4x128xf32>
    %123 = arith.addf %122, %121 : vector<4x128xf32>
    %124 = arith.divf %122, %123 : vector<4x128xf32>
    %cst_57 = arith.constant 1.000000e+00 : f32
    %125 = vector.broadcast %cst_57 : f32 to vector<4x128xf32>
    %126 = arith.subf %125, %124 : vector<4x128xf32>
    %127 = arith.mulf %126, %112 : vector<4x128xf32>
    %128 = arith.mulf %124, %110 : vector<4x128xf32>
    %129 = arith.addf %127, %128 : vector<4x128xf32>
    %130 = arith.mulf %129, %129 : vector<4x128xf32>
    %cst_58 = arith.constant dense<0.000000e+00> : vector<4xf32>
    %131 = vector.multi_reduction <add>, %130, %cst_58 [1] : vector<4x128xf32> to vector<4xf32>
    %132 = vector.shape_cast %131 : vector<4xf32> to vector<4x1xf32>
    %133 = math.sqrt %132 : vector<4x1xf32>
    %cst_59 = arith.constant 1.000000e+01 : f32
    %134 = vector.broadcast %cst_59 : f32 to vector<4x128xf32>
    %135 = arith.mulf %134, %129 : vector<4x128xf32>
    %cst_60 = arith.constant 9.99999996E-13 : f32
    %136 = vector.broadcast %cst_60 : f32 to vector<4x1xf32>
    %137 = arith.maximumf %133, %136 : vector<4x1xf32>
    %138 = vector.broadcast %137 : vector<4x1xf32> to vector<4x128xf32>
    %139 = arith.divf %135, %138 : vector<4x128xf32>
    %c0_61 = arith.constant 0 : index
    %c0_62 = arith.constant 0 : index
    %140 = vector.load %arg15[%c0_61, %c0_62] : memref<4x128xf32, #tpu.memory_space<vmem>>, vector<4x128xf32>
    tpu.vector_store %arg15[%c0_61, %c0_62], %139 {strides = array<i32>} : memref<4x128xf32, #tpu.memory_space<vmem>>, vector<4x128xf32>,
    return
  }
  func.func @transform_0(%arg0: i32) -> (i32, i32, i32) {
    %c0_i32 = arith.constant 0 : i32
    %c0_i32_0 = arith.constant 0 : i32
    %c0_i32_1 = arith.constant 0 : i32
    return %arg0, %c0_i32, %c0_i32_0 : i32, i32, i32
  }
  func.func @transform_1(%arg0: i32) -> (i32, i32, i32) {
    %c0_i32 = arith.constant 0 : i32
    %c0_i32_0 = arith.constant 0 : i32
    %c0_i32_1 = arith.constant 0 : i32
    return %arg0, %c0_i32, %c0_i32_0 : i32, i32, i32
  }
  func.func @transform_2(%arg0: i32) -> (i32, i32, i32) {
    %c0_i32 = arith.constant 0 : i32
    %c0_i32_0 = arith.constant 0 : i32
    %c0_i32_1 = arith.constant 0 : i32
    return %arg0, %c0_i32, %c0_i32_0 : i32, i32, i32
  }
  func.func @transform_3(%arg0: i32) -> (i32, i32, i32) {
    %c0_i32 = arith.constant 0 : i32
    %c0_i32_0 = arith.constant 0 : i32
    %c0_i32_1 = arith.constant 0 : i32
    return %arg0, %c0_i32, %c0_i32_0 : i32, i32, i32
  }
  func.func @transform_4(%arg0: i32) -> (i32, i32) {
    %c0_i32 = arith.constant 0 : i32
    %c0_i32_0 = arith.constant 0 : i32
    %c0_i32_1 = arith.constant 0 : i32
    return %c0_i32, %c0_i32_0 : i32, i32
  }
  func.func @transform_5(%arg0: i32) -> (i32, i32) {
    %c0_i32 = arith.constant 0 : i32
    %c0_i32_0 = arith.constant 0 : i32
    %c0_i32_1 = arith.constant 0 : i32
    return %c0_i32, %c0_i32_0 : i32, i32
  }
  func.func @transform_6(%arg0: i32) -> (i32, i32) {
    %c0_i32 = arith.constant 0 : i32
    %c0_i32_0 = arith.constant 0 : i32
    %c0_i32_1 = arith.constant 0 : i32
    return %c0_i32, %c0_i32_0 : i32, i32
  }
  func.func @transform_7(%arg0: i32) -> (i32, i32) {
    %c0_i32 = arith.constant 0 : i32
    %c0_i32_0 = arith.constant 0 : i32
    %c0_i32_1 = arith.constant 0 : i32
    return %c0_i32, %c0_i32_0 : i32, i32
  }
  func.func @transform_8(%arg0: i32) -> (i32, i32) {
    %c0_i32 = arith.constant 0 : i32
    %c0_i32_0 = arith.constant 0 : i32
    %c0_i32_1 = arith.constant 0 : i32
    return %c0_i32, %c0_i32_0 : i32, i32
  }
  func.func @transform_9(%arg0: i32) -> (i32, i32) {
    %c0_i32 = arith.constant 0 : i32
    %c0_i32_0 = arith.constant 0 : i32
    %c0_i32_1 = arith.constant 0 : i32
    return %c0_i32, %c0_i32_0 : i32, i32
  }
  func.func @transform_10(%arg0: i32) -> (i32, i32) {
    %c0_i32 = arith.constant 0 : i32
    %c0_i32_0 = arith.constant 0 : i32
    %c0_i32_1 = arith.constant 0 : i32
    return %c0_i32, %c0_i32_0 : i32, i32
  }
  func.func @transform_11(%arg0: i32) -> (i32, i32) {
    %c0_i32 = arith.constant 0 : i32
    %c0_i32_0 = arith.constant 0 : i32
    %c0_i32_1 = arith.constant 0 : i32
    return %c0_i32, %c0_i32_0 : i32, i32
  }
  func.func @transform_12(%arg0: i32) -> (i32, i32) {
    %c0_i32 = arith.constant 0 : i32
    %c0_i32_0 = arith.constant 0 : i32
    %c0_i32_1 = arith.constant 0 : i32
    return %c0_i32, %c0_i32_0 : i32, i32
  }
  func.func @transform_13(%arg0: i32) -> (i32, i32) {
    %c0_i32 = arith.constant 0 : i32
    %c0_i32_0 = arith.constant 0 : i32
    %c0_i32_1 = arith.constant 0 : i32
    return %c0_i32, %c0_i32_0 : i32, i32
  }
  func.func @transform_14(%arg0: i32) -> (i32, i32) {
    %c0_i32 = arith.constant 0 : i32
    %c0_i32_0 = arith.constant 0 : i32
    return %arg0, %c0_i32 : i32, i32
  }
}

module attributes {stable_mosaic.version = 11 : i64} {
  func.func @_score_kernel(%arg0: i32, %arg1: memref<4x128xf32, #tpu.memory_space<vmem>>, %arg2: memref<64x128xf32, #tpu.memory_space<vmem>>, %arg3: memref<1x128xf32, #tpu.memory_space<vmem>>, %arg4: memref<4x64xf32, #tpu.memory_space<vmem>>, %arg5: memref<64x1xf32, #tpu.memory_space<vmem>>) attributes {dimension_semantics = [#tpu.dimension_semantics<parallel>], iteration_bounds = array<i64: 1>, scalar_prefetch = 0 : i64, scratch_operands = 0 : i64, tpu.core_type = #tpu.core_type<tc>, window_params = [{pipeline_mode = #tpu.pipeline_mode<synchronous>, transform_indices = @transform_0, window_bounds = array<i64: 4, 128>}, {transform_indices = @transform_1, window_bounds = array<i64: 64, 128>}, {pipeline_mode = #tpu.pipeline_mode<synchronous>, transform_indices = @transform_2, window_bounds = array<i64: 1, 128>}, {transform_indices = @transform_3, window_bounds = array<i64: 4, 64>}, {transform_indices = @transform_4, window_bounds = array<i64: 64, 1>}]} {
    %c0 = arith.constant 0 : index
    %c0_0 = arith.constant 0 : index
    %0 = vector.load %arg2[%c0, %c0_0] : memref<64x128xf32, #tpu.memory_space<vmem>>, vector<64x128xf32>
    %c0_1 = arith.constant 0 : index
    %c0_2 = arith.constant 0 : index
    %1 = vector.load %arg3[%c0_1, %c0_2] : memref<1x128xf32, #tpu.memory_space<vmem>>, vector<1x128xf32>
    %2 = vector.broadcast %1 : vector<1x128xf32> to vector<64x128xf32>
    %3 = arith.mulf %0, %2 : vector<64x128xf32>
    %cst = arith.constant dense<0.000000e+00> : vector<64xf32>
    %4 = vector.multi_reduction <add>, %3, %cst [1] : vector<64x128xf32> to vector<64xf32>
    %5 = vector.shape_cast %4 : vector<64xf32> to vector<64x1xf32>
    %c0_3 = arith.constant 0 : index
    %c0_4 = arith.constant 0 : index
    %6 = vector.load %arg5[%c0_3, %c0_4] : memref<64x1xf32, #tpu.memory_space<vmem>>, vector<64x1xf32>
    tpu.vector_store %arg5[%c0_3, %c0_4], %5 {strides = array<i32>} : memref<64x1xf32, #tpu.memory_space<vmem>>, vector<64x1xf32>,
    %7 = arith.mulf %0, %0 : vector<64x128xf32>
    %cst_5 = arith.constant dense<0.000000e+00> : vector<64xf32>
    %8 = vector.multi_reduction <add>, %7, %cst_5 [1] : vector<64x128xf32> to vector<64xf32>
    %9 = vector.shape_cast %8 : vector<64xf32> to vector<64x1xf32>
    %10 = math.sqrt %9 : vector<64x1xf32>
    %cst_6 = arith.constant 9.99999996E-13 : f32
    %11 = vector.broadcast %cst_6 : f32 to vector<64x1xf32>
    %12 = arith.maximumf %10, %11 : vector<64x1xf32>
    %13 = vector.broadcast %12 : vector<64x1xf32> to vector<64x128xf32>
    %14 = arith.divf %0, %13 : vector<64x128xf32>
    %15 = arith.truncf %14 : vector<64x128xf32> to vector<64x128xbf16>
    %c0_7 = arith.constant 0 : index
    %c0_8 = arith.constant 0 : index
    %16 = vector.load %arg1[%c0_7, %c0_8] : memref<4x128xf32, #tpu.memory_space<vmem>>, vector<4x128xf32>
    %17 = arith.truncf %16 : vector<4x128xf32> to vector<4x128xbf16>
    %cst_9 = arith.constant dense<0.000000e+00> : vector<4x64xf32>
    %18 = tpu.matmul %17, %15, %cst_9 {dimension_numbers = #tpu.dot_dimension_numbers<[1], [1], [0], [0], [0, 0, 1, 0], [], []>} : vector<4x128xbf16>, vector<64x128xbf16>, vector<4x64xf32> -> vector<4x64xf32>
    %c0_10 = arith.constant 0 : index
    %c0_11 = arith.constant 0 : index
    %19 = vector.load %arg4[%c0_10, %c0_11] : memref<4x64xf32, #tpu.memory_space<vmem>>, vector<4x64xf32>
    tpu.vector_store %arg4[%c0_10, %c0_11], %18 {strides = array<i32>} : memref<4x64xf32, #tpu.memory_space<vmem>>, vector<4x64xf32>,
    return
  }
  func.func @transform_0(%arg0: i32) -> (i32, i32) {
    %c0_i32 = arith.constant 0 : i32
    %c0_i32_0 = arith.constant 0 : i32
    %c0_i32_1 = arith.constant 0 : i32
    return %c0_i32, %c0_i32_0 : i32, i32
  }
  func.func @transform_1(%arg0: i32) -> (i32, i32) {
    %c0_i32 = arith.constant 0 : i32
    %c0_i32_0 = arith.constant 0 : i32
    return %arg0, %c0_i32 : i32, i32
  }
  func.func @transform_2(%arg0: i32) -> (i32, i32) {
    %c0_i32 = arith.constant 0 : i32
    %c0_i32_0 = arith.constant 0 : i32
    %c0_i32_1 = arith.constant 0 : i32
    return %c0_i32, %c0_i32_0 : i32, i32
  }
  func.func @transform_3(%arg0: i32) -> (i32, i32) {
    %c0_i32 = arith.constant 0 : i32
    %c0_i32_0 = arith.constant 0 : i32
    return %c0_i32, %arg0 : i32, i32
  }
  func.func @transform_4(%arg0: i32) -> (i32, i32) {
    %c0_i32 = arith.constant 0 : i32
    %c0_i32_0 = arith.constant 0 : i32
    return %arg0, %c0_i32 : i32, i32
  }
}

</mosaic_0001>

<bundles_post_ra>
// kernel: rain_forward.4
= control target key start
LH: loop header
LB: loop body
LE: loop exit
PB: predicated region body
PF: predicated region fallthrough
CT: control target
= control target key end

     0   :  { %v778_v0 = vmov 0   ;;  %vm147_vm0 = vcmask 523264   ;;  %s1038_s2 = inlined_call_operand.vmem [shape: f32[64,1], index: 2, kind: input, shape index: {}]   ;;  %s1039_s0 = inlined_call_operand.vmem [shape: bf16[64,64], index: 0, kind: input, shape index: {}]   ;;  %s1040_s3 = inlined_call_operand.vmem [shape: f32[128,128], index: 3, kind: input, shape index: {}]   ;;  %s1041_s1 = inlined_call_operand.vmem [shape: bf16[64,128], index: 1, kind: input, shape index: {}]   ;;  %s1042_s5 = inlined_call_operand.vmem [shape: bf16[64,128], index: 5, kind: output, shape index: {0}]   ;;  %s1043_s4 = inlined_call_operand.vmem [shape: f32[64,128], index: 4, kind: input, shape index: {}]   ;;  %s1044_s6 = inlined_call_operand.vmem [shape: f32[64,128], index: 6, kind: output, shape index: {1}]  }
   0x1   :  { %741 = vset.pattern.permute.xlu1 %v778_v0  ;;  %740 = vset.pattern.permute.xlu0 %v778_v0  ;;  %v45_v1 = vld [vmem:[%s1038_s2 + $0x10] sm:$0xff]  ;;  %v43_v2 = vld [vmem:[%s1038_s2] sm:$0xff]  ;;  %v46_v3 = vld [vmem:[%s1038_s2 + $0x18] sm:$0xff] }
   0x2   :  { %71 = vperm.xlu1 %741, %v45_v1   ;;  %61 = vperm.xlu0 %740, %v43_v2   ;;  %v44_v4 = vld [vmem:[%s1038_s2 + $0x8] sm:$0xff]  ;;  %v47_v6 = vld [vmem:[%s1038_s2 + $0x20] sm:$0xff]  ;;  %v50_v7 = vld [vmem:[%s1038_s2 + $0x38] sm:$0xff] }
   0x3   :  { %v48_v5 = vld [vmem:[%s1038_s2 + $0x28] sm:$0xff]  ;;  %v49_v8 = vld [vmem:[%s1038_s2 + $0x30] sm:$0xff]  ;;  %v742_v9 = vld [vmem:[%s1039_s0] sm:$0xff]  }
   0x4   :  { %655 = vmatprep.mubr.msk.bf16.mxu0 %vm147_vm0, %v742_v9  ;;  %v252_v10 = vld [vmem:[%s1040_s3] sm:$0xff]  ;;  %v253_v11 = vld [vmem:[%s1040_s3 + $0x8] sm:$0xff]  ;;  %v254_v12 = vld [vmem:[%s1040_s3 + $0x10] sm:$0xff] }
   0x5   :  { %v707_v13 = vpack.c.bf16 %v253_v11, %v252_v10  ;;  %v255_v14 = vld [vmem:[%s1040_s3 + $0x18] sm:$0xff]  ;;  %v256_v16 = vld [vmem:[%s1040_s3 + $0x20] sm:$0xff]  ;;  %v257_v17 = vld [vmem:[%s1040_s3 + $0x28] sm:$0xff] }
   0x6   :  { %76 = vperm.xlu1 %741, %v46_v3   ;;  %66 = vperm.xlu0 %740, %v44_v4   ;;  %v711_v15 = vpack.c.bf16 %v255_v14, %v254_v12  ;;  %v715_v18 = vpack.c.bf16 %v257_v17, %v256_v16  ;;  %v258_v19 = vld [vmem:[%s1040_s3 + $0x30] sm:$0xff]  ;;  %v259_v20 = vld [vmem:[%s1040_s3 + $0x38] sm:$0xff]  ;;  %v260_v22 = vld [vmem:[%s1040_s3 + $0x40] sm:$0xff] }
   0x7   :  { %708 = vmatprep.subr.bf16.mxu1 %v707_v13  ;;  %v719_v21 = vpack.c.bf16 %v259_v20, %v258_v19  ;;  %v261_v23 = vld [vmem:[%s1040_s3 + $0x48] sm:$0xff]  ;;  %v262_v25 = vld [vmem:[%s1040_s3 + $0x50] sm:$0xff]  ;;  %v263_v26 = vld [vmem:[%s1040_s3 + $0x58] sm:$0xff] }
   0x8   :  { %710 = vmatpush3.bf16.msra.mxu1 %v707_v13  ;;  %v723_v24 = vpack.c.bf16 %v261_v23, %v260_v22  ;;  %v727_v27 = vpack.c.bf16 %v263_v26, %v262_v25  ;;  %v264_v28 = vld [vmem:[%s1040_s3 + $0x60] sm:$0xff]  ;;  %v265_v29 = vld [vmem:[%s1040_s3 + $0x68] sm:$0xff]  ;;  %v610_v39 = vld [vmem:[%s1041_s1 + $0x10] sm:$0xff]  }
   0x9   :  { %712 = vmatprep.subr.bf16.mxu1 %v711_v15  ;;  %v731_v30 = vpack.c.bf16 %v265_v29, %v264_v28  ;;  %v609_v31 = vld [vmem:[%s1041_s1 + $0x8] sm:$0xff]   ;;  %v574_v32 = vld [vmem:[%s1041_s1] sm:$0xff]   ;;  %v584_v42 = vunpack.c.h.bf16 %v610_v39  ;;  %v583_v43 = vunpack.c.l.bf16 %v610_v39  ;;  %v611_v48 = vld [vmem:[%s1041_s1 + $0x18] sm:$0xff]  }
   0xa   :  { %86 = vperm.xlu1 %741, %v48_v5   ;;  %81 = vperm.xlu0 %740, %v47_v6   ;;  %v579_v35 = vunpack.c.l.bf16 %v609_v31  ;;  %v575_v36 = vunpack.c.l.bf16 %v574_v32  ;;  %v580_v37 = vunpack.c.h.bf16 %v609_v31  ;;  %v576_v38 = vunpack.c.h.bf16 %v574_v32  ;;  %v743_v63 = vld [vmem:[%s1039_s0 + $0x8] sm:$0xff]   ;;  %v744_v0 = vld [vmem:[%s1039_s0 + $0x10] sm:$0xff]   ;;  %v745_v1 = vld [vmem:[%s1039_s0 + $0x18] sm:$0xff]  }
   0xb   :  { %v588_v52 = vunpack.c.h.bf16 %v611_v48  ;;  %v587_v56 = vunpack.c.l.bf16 %v611_v48  ;;  %v266_v2 = vld [vmem:[%s1040_s3 + $0x70] sm:$0xff]  ;;  %v267_v3 = vld [vmem:[%s1040_s3 + $0x78] sm:$0xff] }
   0xc   :  { %714 = vmatpush3.bf16.msra.mxu1 %v711_v15  ;;  %v735_v4 = vpack.c.bf16 %v267_v3, %v266_v2 }
   0xd   :  { %716 = vmatprep.subr.bf16.mxu1 %v715_v18 }
   0xe   :  { %96 = vperm.xlu1 %741, %v50_v7   ;;  %91 = vperm.xlu0 %740, %v49_v8  }
  0x10   :  { %718 = vmatpush3.bf16.msra.mxu1 %v715_v18 }
  0x11   :  { %720 = vmatprep.subr.bf16.mxu1 %v719_v21 }
  0x14   :  { %722 = vmatpush3.bf16.msra.mxu1 %v719_v21 }
  0x15   :  { %724 = vmatprep.subr.bf16.mxu1 %v723_v24 }
  0x18   :  { %726 = vmatpush3.bf16.msra.mxu1 %v723_v24 }
  0x19   :  { %728 = vmatprep.subr.bf16.mxu1 %v727_v27 }
  0x1c   :  { %730 = vmatpush3.bf16.msra.mxu1 %v727_v27 }
  0x1d   :  { %732 = vmatprep.subr.bf16.mxu1 %v731_v30 }
  0x20   :  { %734 = vmatpush3.bf16.msra.mxu1 %v731_v30 }
  0x21   :  { %736 = vmatprep.subr.bf16.mxu1 %v735_v4 }
  0x24   :  { %738 = vmatpush3.bf16.msra.mxu1 %v735_v4 }
  0x81   :  { %v72_v33 = vpop.permute.xlu1 %71  ;;  %v62_v34 = vpop.permute.xlu0 %61 }
  0x82   :  { %v101_v44 = vmul.f32 %v579_v35, %v72_v33  ;;  %v99_v45 = vmul.f32 %v575_v36, %v62_v34 }
  0x85   :  { %v77_v40 = vpop.permute.xlu1 %76  ;;  %v67_v41 = vpop.permute.xlu0 %66 }
  0x86   :  { %v102_v46 = vmul.f32 %v580_v37, %v77_v40  ;;  %v100_v47 = vmul.f32 %v576_v38, %v67_v41 }
  0x88   :  { %v107_v49 = vpack.c.bf16 %v100_v47, %v99_v45  ;;  %v108_v53 = vpack.c.bf16 %v102_v46, %v101_v44 }
  0x89   :  { %v87_v50 = vpop.permute.xlu1 %86  ;;  %v82_v51 = vpop.permute.xlu0 %81 }
  0x8a   :  { %v104_v54 = vmul.f32 %v584_v42, %v87_v50  ;;  %v103_v55 = vmul.f32 %v583_v43, %v82_v51  ;;  %647 = vmatprep.subr.bf16.mxu0 %v107_v49 }
  0x8b   :  { %648 = vmatpush3.bf16.msra.mxu0 %v107_v49 }
  0x8c   :  { %649 = vmatprep.subr.bf16.mxu0 %v108_v53  ;;  %v109_v59 = vpack.c.bf16 %v104_v54, %v103_v55 }
  0x8d   :  { %v97_v57 = vpop.permute.xlu1 %96  ;;  %v92_v58 = vpop.permute.xlu0 %91 }
  0x8e   :  { %v106_v60 = vmul.f32 %v588_v52, %v97_v57  ;;  %v105_v61 = vmul.f32 %v587_v56, %v92_v58 }
  0x8f   :  { %650 = vmatpush3.bf16.msra.mxu0 %v108_v53 }
  0x90   :  { %651 = vmatprep.subr.bf16.mxu0 %v109_v59  ;;  %v110_v62 = vpack.c.bf16 %v106_v60, %v105_v61 }
  0x93   :  { %652 = vmatpush3.bf16.msra.mxu0 %v109_v59 }
  0x94   :  { %653 = vmatprep.subr.bf16.mxu0 %v110_v62 }
  0x97   :  { %654 = vmatpush3.bf16.msra.mxu0 %v110_v62 }
  0x9a   :  { %656 = vmatmul.mubr.msk.bf16.vlgmr.msra.gmra.mrb[0].mxu0 %vm147_vm0, %v743_v63 }
  0x9b   :  { %659 = vmatprep.mubr.msk.bf16.mxu0 %vm147_vm0, %v744_v0 }
  0xa2   :  { %660 = vmatmul.mubr.msk.bf16.gmra.mrb[4].mxu0 %vm147_vm0, %v745_v1 }
 0x16d   :  { %v657_v5 = vpop.f32.mrb[0].mxu0 }
 0x16e   :  { %v194_v6 = vpop.f32.mrb[1].mxu0 }
 0x16f   :  { %v658_v7 = vpop.f32.mrb[2].mxu0  ;;  %695 = vmatprep.mubr.f32.mxu1 %v194_v6 }
 0x170   :  { %v197_v8 = vpop.f32.mrb[3].mxu0 }
 0x171   :  { %696 = vmatmul.mubr.f32.vlgmr.msra.gmra.mrb[0].mxu1 %v197_v8 }
 0x172   :  { %698 = vmatprep.mubr.f32.mxu1 %v657_v5 }
 0x175   :  { %v661_v9 = vpop.f32.mrb[4].mxu0  ;;  %699 = vmatmul.mubr.f32.gmra.mrb[2].mxu1 %v658_v7 }
 0x176   :  { %v210_v10 = vpop.f32.mrb[5].mxu0 }
 0x177   :  { %v662_v11 = vpop.f32.mrb[6].mxu0  ;;  %701 = vmatprep.mubr.f32.mxu1 %v210_v10 }
 0x178   :  { %v213_v12 = vpop.f32.mrb[7].mxu0 }
 0x179   :  { %702 = vmatmul.mubr.f32.gmra.mrb[4].mxu1 %v213_v12 }
 0x17a   :  { %704 = vmatprep.mubr.f32.mxu1 %v661_v9 }
 0x17d   :  { %705 = vmatmul.mubr.f32.gmra.mrb[6].mxu1 %v662_v11 }
 0x244   :  { %v914_v13 = vpop.f32.mrb[0].mxu1 }
 0x245   :  { %v916_v14 = vpop.f32.mrb[1].mxu1  ;;  %v414_v15 = vmul.f32 %v914_v13, %v914_v13 }
 0x246   :  { %v592_v16 = vpack.c.bf16 %v914_v13, %v916_v14  ;;  %v413_v17 = vmul.f32 %v916_v14, %v916_v14 }
 0x247   :  { %423 = vadd.xlane.f32.xlu1 %v414_v15 }
 0x248   :  { %593 = vst [vmem:[%s1042_s5] sm:$0xff] %v592_v16   ;;  %421 = vadd.xlane.f32.xlu0 %v413_v17  ;;  %v927_v18 = vpop.f32.mrb[2].mxu1  ;;  %v494_v17 = vld [vmem:[%s1043_s4 + $0x8] sm:$0xff] }
 0x249   :  { %v929_v19 = vpop.f32.mrb[3].mxu1  ;;  %v416_v20 = vmul.f32 %v927_v18, %v927_v18 }
 0x24a   :  { %v597_v21 = vpack.c.bf16 %v927_v18, %v929_v19  ;;  %v415_v25 = vmul.f32 %v929_v19, %v929_v19 }
 0x24c   :  { %612 = vst [vmem:[%s1042_s5 + $0x8] sm:$0xff] %v597_v21   ;;  %427 = vadd.xlane.f32.xlu0 %v416_v20  ;;  %v938_v22 = vpop.f32.mrb[4].mxu1 }
 0x24d   :  { %v940_v23 = vpop.f32.mrb[5].mxu1  ;;  %v418_v30 = vmul.f32 %v938_v22, %v938_v22 }
 0x24e   :  { %v602_v24 = vpack.c.bf16 %v938_v22, %v940_v23  ;;  %v417_v26 = vmul.f32 %v940_v23, %v940_v23 }
 0x250   :  { %613 = vst [vmem:[%s1042_s5 + $0x10] sm:$0xff] %v602_v24   ;;  %425 = vadd.xlane.f32.xlu0 %v415_v25  ;;  %429 = vadd.xlane.f32.xlu1 %v417_v26  ;;  %v951_v27 = vpop.f32.mrb[6].mxu1  ;;  %v493_v26 = vld [vmem:[%s1043_s4] sm:$0xff] }
 0x251   :  { %v953_v28 = vpop.f32.mrb[7].mxu1  ;;  %v420_v32 = vmul.f32 %v951_v27, %v951_v27 }
 0x252   :  { %v607_v29 = vpack.c.bf16 %v951_v27, %v953_v28  ;;  %v419_v31 = vmul.f32 %v953_v28, %v953_v28 }
 0x254   :  { %614 = vst [vmem:[%s1042_s5 + $0x18] sm:$0xff] %v607_v29   ;;  %431 = vadd.xlane.f32.xlu0 %v418_v30  ;;  %433 = vadd.xlane.f32.xlu1 %v419_v31 }
 0x258   :  { %435 = vadd.xlane.f32.xlu0 %v420_v32 }
 0x2d4   :  { %v424_v33 = vpop.xlane.xlu1 %423 }
 0x2d5   :  { %746 = vrsqrt.f32 %v424_v33  ;;  %v422_v34 = vpop.xlane.xlu0 %421  ;;  %vm446_vm1 = vcmp.eq.f32.partialorder %v424_v33, inf  ;;  %vm448_vm2 = vcmp.eq.f32.partialorder %v424_v33, 0.0  ;;  %v449_v41 = vand.u32 2147483648, %v424_v33 }
 0x2d6   :  { %748 = vrsqrt.f32 %v422_v34  ;;  %vm439_vm3 = vcmp.eq.f32.partialorder %v422_v34, inf  ;;  %v442_v46 = vand.u32 2147483648, %v422_v34  ;;  %vm441_vm4 = vcmp.eq.f32.partialorder %v422_v34, 0.0 }
 0x2d9   :  { %v428_v35 = vpop.xlane.xlu0 %427 }
 0x2da   :  { %750 = vrsqrt.f32 %v428_v35  ;;  %vm460_vm5 = vcmp.eq.f32.partialorder %v428_v35, inf  ;;  %v463_v55 = vand.u32 2147483648, %v428_v35  ;;  %vm462_vm6 = vcmp.eq.f32.partialorder %v428_v35, 0.0 }
 0x2dd   :  { %v426_v36 = vpop.xlane.xlu0 %425  ;;  %v430_v37 = vpop.xlane.xlu1 %429 }
 0x2de   :  { %752 = vrsqrt.f32 %v426_v36  ;;  %vm453_vm7 = vcmp.eq.f32.partialorder %v426_v36, inf  ;;  %vm455_vm8 = vcmp.eq.f32.partialorder %v426_v36, 0.0  ;;  %v456_v62 = vand.u32 2147483648, %v426_v36 }
 0x2df   :  { %v747_v38 = vpop.eup %746  ;;  %754 = vrsqrt.f32 %v430_v37  ;;  %vm467_vm9 = vcmp.eq.f32.partialorder %v430_v37, inf  ;;  %v470_v1 = vand.u32 2147483648, %v430_v37  ;;  %vm469_vm10 = vcmp.eq.f32.partialorder %v430_v37, 0.0 }
 0x2e0   :  { %v749_v39 = vpop.eup %748  ;;  %v445_v40 = vmul.f32 %v747_v38, %v424_v33 }
 0x2e1   :  { %v438_v42 = vmul.f32 %v749_v39, %v422_v34  ;;  %v432_v43 = vpop.xlane.xlu0 %431  ;;  %v966_v44 = vpop.xlane.xlu1 %433 }
 0x2e2   :  { %v447_v45 = vsel %vm446_vm1, %v424_v33, %v445_v40  ;;  %756 = vrsqrt.f32 %v432_v43  ;;  %vm474_vm11 = vcmp.eq.f32.partialorder %v432_v43, inf  ;;  %vm476_vm12 = vcmp.eq.f32.partialorder %v432_v43, 0.0 }
 0x2e3   :  { %v450_v47 = vsel %vm448_vm2, %v449_v41, %v447_v45  ;;  %v440_v48 = vsel %vm439_vm3, %v422_v34, %v438_v42  ;;  %758 = vrsqrt.f32 %v966_v44  ;;  %v477_v10 = vand.u32 2147483648, %v432_v43 }
 0x2e4   :  { %v751_v49 = vpop.eup %750  ;;  %v502_v50 = vmax.f32 %v450_v47, 1e-12  ;;  %v443_v51 = vsel %vm441_vm4, %v442_v46, %v440_v48  ;;  %vm481_vm13 = vcmp.eq.f32.partialorder %v966_v44, inf  ;;  %v484_v15 = vand.u32 2147483648, %v966_v44 }
 0x2e5   :  { %v501_v52 = vmax.f32 %v443_v51, 1e-12  ;;  %v459_v53 = vmul.f32 %v751_v49, %v428_v35  ;;  %v969_v54 = vpop.xlane.xlu0 %435  ;;  %vm483_vm14 = vcmp.eq.f32.partialorder %v966_v44, 0.0  ;;  %v498_v51 = vld [vmem:[%s1043_s4 + $0x28] sm:$0xff] }
 0x2e6   :  { %760 = vrcp.f32 %v502_v50  ;;  %vm488_vm15 = vcmp.eq.f32.partialorder %v969_v54, inf  ;;  %vm490_vm0 = vcmp.eq.f32.partialorder %v969_v54, 0.0 }
 0x2e7   :  { %762 = vrcp.f32 %v501_v52  ;;  %v461_v56 = vsel %vm460_vm5, %v428_v35, %v459_v53  ;;  %v499_v53 = vld [vmem:[%s1043_s4 + $0x30] sm:$0xff] }
 0x2e8   :  { %v753_v57 = vpop.eup %752  ;;  %v464_v58 = vsel %vm462_vm6, %v463_v55, %v461_v56  ;;  %764 = vrsqrt.f32 %v969_v54 }
 0x2e9   :  { %v755_v59 = vpop.eup %754  ;;  %v504_v60 = vmax.f32 %v464_v58, 1e-12  ;;  %v452_v61 = vmul.f32 %v753_v57, %v426_v36 }
 0x2ea   :  { %v466_v63 = vmul.f32 %v755_v59, %v430_v37 }
 0x2eb   :  { %766 = vrcp.f32 %v504_v60  ;;  %v454_v0 = vsel %vm453_vm7, %v426_v36, %v452_v61 }
 0x2ec   :  { %v757_v2 = vpop.eup %756  ;;  %v457_v3 = vsel %vm455_vm8, %v456_v62, %v454_v0  ;;  %v468_v4 = vsel %vm467_vm9, %v430_v37, %v466_v63 }
 0x2ed   :  { %v759_v5 = vpop.eup %758  ;;  %v503_v6 = vmax.f32 %v457_v3, 1e-12  ;;  %v471_v7 = vsel %vm469_vm10, %v470_v1, %v468_v4  ;;  %v473_v8 = vmul.f32 %v757_v2, %v432_v43 }
 0x2ee   :  { %v505_v9 = vmax.f32 %v471_v7, 1e-12  ;;  %v480_v11 = vmul.f32 %v759_v5, %v966_v44 }
 0x2ef   :  { %768 = vrcp.f32 %v503_v6  ;;  %v475_v12 = vsel %vm474_vm11, %v432_v43, %v473_v8 }
 0x2f0   :  { %v761_v16 = vpop.eup %760  ;;  %770 = vrcp.f32 %v505_v9  ;;  %v478_v20 = vsel %vm476_vm12, %v477_v10, %v475_v12  ;;  %v482_v21 = vsel %vm481_vm13, %v966_v44, %v480_v11  ;;  %v495_v44 = vld [vmem:[%s1043_s4 + $0x10] sm:$0xff] }
 0x2f1   :  { %v763_v24 = vpop.eup %762  ;;  %v512_v25 = vmul.f32 %v761_v16, %v914_v13  ;;  %v506_v29 = vmax.f32 %v478_v20, 1e-12  ;;  %v485_v30 = vsel %vm483_vm14, %v484_v15, %v482_v21  ;;  %v491_v13 = vand.u32 2147483648, %v969_v54 }
 0x2f2   :  { %v765_v31 = vpop.eup %764  ;;  %v510_v32 = vmul.f32 %v763_v24, %v916_v14  ;;  %v507_v33 = vmax.f32 %v485_v30, 1e-12  ;;  %v496_v14 = vld [vmem:[%s1043_s4 + $0x18] sm:$0xff] }
 0x2f3   :  { %v526_v34 = vadd.f32 %v512_v25, %v494_v17  ;;  %772 = vrcp.f32 %v506_v29  ;;  %v487_v35 = vmul.f32 %v765_v31, %v969_v54 }
 0x2f4   :  { %v525_v36 = vadd.f32 %v510_v32, %v493_v26  ;;  %774 = vrcp.f32 %v507_v33 }
 0x2f5   :  { %v767_v37 = vpop.eup %766  ;;  %534 = vst [vmem:[%s1044_s6 + $0x8] sm:$0xff] %v526_v34  ;;  %v489_v38 = vsel %vm488_vm15, %v969_v54, %v487_v35 }
 0x2f6   :  { %533 = vst [vmem:[%s1044_s6] sm:$0xff] %v525_v36  ;;  %v516_v39 = vmul.f32 %v767_v37, %v927_v18  ;;  %v492_v40 = vsel %vm490_vm0, %v491_v13, %v489_v38  ;;  %v497_v18 = vld [vmem:[%s1043_s4 + $0x20] sm:$0xff] }
 0x2f7   :  { %v508_v41 = vmax.f32 %v492_v40, 1e-12 }
 0x2f8   :  { %v528_v42 = vadd.f32 %v516_v39, %v496_v14 }
 0x2f9   :  { %v769_v43 = vpop.eup %768  ;;  %776 = vrcp.f32 %v508_v41 }
 0x2fa   :  { %v771_v45 = vpop.eup %770  ;;  %536 = vst [vmem:[%s1044_s6 + $0x18] sm:$0xff] %v528_v42  ;;  %v514_v46 = vmul.f32 %v769_v43, %v929_v19 }
 0x2fb   :  { %v518_v47 = vmul.f32 %v771_v45, %v940_v23 }
 0x2fc   :  { %v527_v48 = vadd.f32 %v514_v46, %v495_v44 }
 0x2fd   :  { %v773_v49 = vpop.eup %772  ;;  %v529_v50 = vadd.f32 %v518_v47, %v497_v18 }
 0x2fe   :  { %v775_v52 = vpop.eup %774  ;;  %535 = vst [vmem:[%s1044_s6 + $0x10] sm:$0xff] %v527_v48  ;;  %v520_v19 = vmul.f32 %v773_v49, %v938_v22  ;;  %v500_v22 = vld [vmem:[%s1043_s4 + $0x38] sm:$0xff] }
 0x2ff   :  { %537 = vst [vmem:[%s1044_s6 + $0x20] sm:$0xff] %v529_v50  ;;  %v522_v23 = vmul.f32 %v775_v52, %v953_v28 }
 0x300   :  { %v530_v54 = vadd.f32 %v520_v19, %v498_v51 }
 0x301   :  { %v531_v55 = vadd.f32 %v522_v23, %v499_v53 }
 0x302   :  { %538 = vst [vmem:[%s1044_s6 + $0x28] sm:$0xff] %v530_v54 }
 0x303   :  { %v777_v56 = vpop.eup %776  ;;  %539 = vst [vmem:[%s1044_s6 + $0x30] sm:$0xff] %v531_v55 }
 0x304   :  { %v524_v57 = vmul.f32 %v777_v56, %v951_v27 }
 0x306   :  { %v532_v58 = vadd.f32 %v524_v57, %v500_v22 }
 0x308   :  { %540 = vst [vmem:[%s1044_s6 + $0x38] sm:$0xff] %v532_v58 }

// kernel: rain_forward.5
= control target key start
LH: loop header
LB: loop body
LE: loop exit
PB: predicated region body
PF: predicated region fallthrough
CT: control target
= control target key end

     0   :  { %v818_v2 = vmov 0   ;;  %s1081_s0 = inlined_call_operand.vmem [shape: bf16[64,64], index: 0, kind: input, shape index: {}]   ;;  %s1082_s1 = inlined_call_operand.vmem [shape: bf16[64,128], index: 1, kind: input, shape index: {}]   ;;  %s1083_s2 = inlined_call_operand.vmem [shape: f32[64,1], index: 2, kind: input, shape index: {}]   ;;  %s1084_s3 = inlined_call_operand.vmem [shape: f32[128,128], index: 3, kind: input, shape index: {}]   ;;  %s1085_s4 = inlined_call_operand.vmem [shape: f32[64,128], index: 4, kind: input, shape index: {}]   ;;  %s1086_s5 = inlined_call_operand.hbm [shape: bf16[64,128], index: 5, kind: output, shape index: {0}]   ;;  %s1087_s6 = inlined_call_operand.vmem [shape: f32[64,128], index: 6, kind: output, shape index: {1}]  }
   0x1   :  { %v46_v0 = vld [vmem:[%s1083_s2 + $0x10] sm:$0xff]  ;;  %v44_v1 = vld [vmem:[%s1083_s2] sm:$0xff]  ;;  %757 = vset.pattern.permute.xlu1 %v818_v2  ;;  %756 = vset.pattern.permute.xlu0 %v818_v2  ;;  %v47_v3 = vld [vmem:[%s1083_s2 + $0x18] sm:$0xff] }
   0x2   :  { %72 = vperm.xlu1 %757, %v46_v0   ;;  %62 = vperm.xlu0 %756, %v44_v1   ;;  %v45_v4 = vld [vmem:[%s1083_s2 + $0x8] sm:$0xff] }
   0x6   :  { %77 = vperm.xlu1 %757, %v47_v3   ;;  %67 = vperm.xlu0 %756, %v45_v4  }
   0x7   :  { %12 = vsyncpa [#allocation4], 0  ;;  %v49_v5 = vld [vmem:[%s1083_s2 + $0x28] sm:$0xff]  ;;  %v48_v6 = vld [vmem:[%s1083_s2 + $0x20] sm:$0xff]  ;;  %vm148_vm0 = vcmask 523264  }
   0x8   :  { %v51_v7 = vld [vmem:[%s1083_s2 + $0x38] sm:$0xff]  ;;  %v50_v8 = vld [vmem:[%s1083_s2 + $0x30] sm:$0xff]  ;;  %v758_v9 = vld [vmem:[%s1081_s0] sm:$0xff]  }
   0x9   :  { %668 = vmatprep.mubr.msk.bf16.mxu0 %vm148_vm0, %v758_v9  ;;  %v253_v10 = vld [vmem:[%s1084_s3] sm:$0xff]  ;;  %v254_v11 = vld [vmem:[%s1084_s3 + $0x8] sm:$0xff]  ;;  %v255_v12 = vld [vmem:[%s1084_s3 + $0x10] sm:$0xff] }
   0xa   :  { %87 = vperm.xlu1 %757, %v49_v5   ;;  %82 = vperm.xlu0 %756, %v48_v6   ;;  %v720_v13 = vpack.c.bf16 %v254_v11, %v253_v10  ;;  %v256_v14 = vld [vmem:[%s1084_s3 + $0x18] sm:$0xff]  ;;  %v257_v16 = vld [vmem:[%s1084_s3 + $0x20] sm:$0xff]  ;;  %v258_v17 = vld [vmem:[%s1084_s3 + $0x28] sm:$0xff] }
   0xb   :  { %v724_v15 = vpack.c.bf16 %v256_v14, %v255_v12  ;;  %v728_v18 = vpack.c.bf16 %v258_v17, %v257_v16  ;;  %v259_v19 = vld [vmem:[%s1084_s3 + $0x30] sm:$0xff]  ;;  %v260_v20 = vld [vmem:[%s1084_s3 + $0x38] sm:$0xff]  ;;  %v261_v22 = vld [vmem:[%s1084_s3 + $0x40] sm:$0xff] }
   0xc   :  { %721 = vmatprep.subr.bf16.mxu1 %v720_v13  ;;  %v732_v21 = vpack.c.bf16 %v260_v20, %v259_v19  ;;  %v262_v23 = vld [vmem:[%s1084_s3 + $0x48] sm:$0xff]  ;;  %v263_v25 = vld [vmem:[%s1084_s3 + $0x50] sm:$0xff]  ;;  %v264_v26 = vld [vmem:[%s1084_s3 + $0x58] sm:$0xff] }
   0xd   :  { %723 = vmatpush3.bf16.msra.mxu1 %v720_v13  ;;  %v736_v24 = vpack.c.bf16 %v262_v23, %v261_v22  ;;  %v740_v27 = vpack.c.bf16 %v264_v26, %v263_v25  ;;  %v265_v28 = vld [vmem:[%s1084_s3 + $0x60] sm:$0xff]  ;;  %v266_v29 = vld [vmem:[%s1084_s3 + $0x68] sm:$0xff]  ;;  %v623_v39 = vld [vmem:[%s1082_s1 + $0x10] sm:$0xff]  }
   0xe   :  { %97 = vperm.xlu1 %757, %v51_v7   ;;  %92 = vperm.xlu0 %756, %v50_v8   ;;  %v744_v30 = vpack.c.bf16 %v266_v29, %v265_v28  ;;  %v622_v31 = vld [vmem:[%s1082_s1 + $0x8] sm:$0xff]   ;;  %v587_v32 = vld [vmem:[%s1082_s1] sm:$0xff]   ;;  %v597_v42 = vunpack.c.h.bf16 %v623_v39  ;;  %v596_v43 = vunpack.c.l.bf16 %v623_v39  ;;  %v624_v48 = vld [vmem:[%s1082_s1 + $0x18] sm:$0xff]  }
   0xf   :  { %725 = vmatprep.subr.bf16.mxu1 %v724_v15  ;;  %v592_v35 = vunpack.c.l.bf16 %v622_v31  ;;  %v588_v36 = vunpack.c.l.bf16 %v587_v32  ;;  %v593_v37 = vunpack.c.h.bf16 %v622_v31  ;;  %v589_v38 = vunpack.c.h.bf16 %v587_v32  ;;  %v759_v63 = vld [vmem:[%s1081_s0 + $0x8] sm:$0xff]   ;;  %v760_v0 = vld [vmem:[%s1081_s0 + $0x10] sm:$0xff]   ;;  %v761_v1 = vld [vmem:[%s1081_s0 + $0x18] sm:$0xff]   ;;  %s819_s0 = smov [#allocation3]  }
  0x10   :  { %v601_v52 = vunpack.c.h.bf16 %v624_v48  ;;  %v600_v56 = vunpack.c.l.bf16 %v624_v48  ;;  %v267_v2 = vld [vmem:[%s1084_s3 + $0x70] sm:$0xff]  ;;  %v268_v3 = vld [vmem:[%s1084_s3 + $0x78] sm:$0xff]  ;;  %s547_s3 = sshll.u32 %s819_s0, 4  ;;  %s548_s3 = int_to_ptr.vmem [resolvable:$true] %s547_s3 }
  0x11   :  { %727 = vmatpush3.bf16.msra.mxu1 %v724_v15  ;;  %v748_v4 = vpack.c.bf16 %v268_v3, %v267_v2  ;;  %s794_s10 = scalar_lea.vmem %s548_s3, 512  ;;  %p799_p1 = scmp.lt.s32.totalorder %s548_s3, %s548_s3 }
  0x12   :  { %729 = vmatprep.subr.bf16.mxu1 %v728_v18  ;;  %p795_p0 = scmp.ne.s32.totalorder %s548_s3, %s794_s10  ;;  %p800_p2 = scmp.lt.s32.totalorder %s794_s10, %s794_s10 }
  0x14   :  { %p801_p3 = por %p800_p2, %p799_p1 }
  0x15   :  { %731 = vmatpush3.bf16.msra.mxu1 %v728_v18 }
  0x16   :  { %733 = vmatprep.subr.bf16.mxu1 %v732_v21  ;;  %p802_p4 = pnand %p801_p3, %p795_p0 }
  0x19   :  { %735 = vmatpush3.bf16.msra.mxu1 %v732_v21 }
  0x1a   :  { %737 = vmatprep.subr.bf16.mxu1 %v736_v24 }
  0x1d   :  { %739 = vmatpush3.bf16.msra.mxu1 %v736_v24 }
  0x1e   :  { %741 = vmatprep.subr.bf16.mxu1 %v740_v27 }
  0x21   :  { %743 = vmatpush3.bf16.msra.mxu1 %v740_v27 }
  0x22   :  { %745 = vmatprep.subr.bf16.mxu1 %v744_v30 }
  0x25   :  { %747 = vmatpush3.bf16.msra.mxu1 %v744_v30 }
  0x26   :  { %749 = vmatprep.subr.bf16.mxu1 %v748_v4 }
  0x29   :  { %751 = vmatpush3.bf16.msra.mxu1 %v748_v4 }
  0x81   :  { %v73_v33 = vpop.permute.xlu1 %72  ;;  %v63_v34 = vpop.permute.xlu0 %62 }
  0x82   :  { %v102_v44 = vmul.f32 %v592_v35, %v73_v33  ;;  %v100_v45 = vmul.f32 %v588_v36, %v63_v34 }
  0x85   :  { %v78_v40 = vpop.permute.xlu1 %77  ;;  %v68_v41 = vpop.permute.xlu0 %67 }
  0x86   :  { %v103_v46 = vmul.f32 %v593_v37, %v78_v40  ;;  %v101_v47 = vmul.f32 %v589_v38, %v68_v41 }
  0x88   :  { %v108_v49 = vpack.c.bf16 %v101_v47, %v100_v45  ;;  %v109_v53 = vpack.c.bf16 %v103_v46, %v102_v44 }
  0x89   :  { %v88_v50 = vpop.permute.xlu1 %87  ;;  %v83_v51 = vpop.permute.xlu0 %82 }
  0x8a   :  { %v105_v54 = vmul.f32 %v597_v42, %v88_v50  ;;  %v104_v55 = vmul.f32 %v596_v43, %v83_v51  ;;  %660 = vmatprep.subr.bf16.mxu0 %v108_v49 }
  0x8b   :  { %661 = vmatpush3.bf16.msra.mxu0 %v108_v49 }
  0x8c   :  { %662 = vmatprep.subr.bf16.mxu0 %v109_v53  ;;  %v110_v59 = vpack.c.bf16 %v105_v54, %v104_v55 }
  0x8d   :  { %v98_v57 = vpop.permute.xlu1 %97  ;;  %v93_v58 = vpop.permute.xlu0 %92 }
  0x8e   :  { %v107_v60 = vmul.f32 %v601_v52, %v98_v57  ;;  %v106_v61 = vmul.f32 %v600_v56, %v93_v58 }
  0x8f   :  { %663 = vmatpush3.bf16.msra.mxu0 %v109_v53 }
  0x90   :  { %664 = vmatprep.subr.bf16.mxu0 %v110_v59  ;;  %v111_v62 = vpack.c.bf16 %v107_v60, %v106_v61 }
  0x93   :  { %665 = vmatpush3.bf16.msra.mxu0 %v110_v59 }
  0x94   :  { %666 = vmatprep.subr.bf16.mxu0 %v111_v62 }
  0x97   :  { %667 = vmatpush3.bf16.msra.mxu0 %v111_v62 }
  0x9a   :  { %669 = vmatmul.mubr.msk.bf16.vlgmr.msra.gmra.mrb[0].mxu0 %vm148_vm0, %v759_v63 }
  0x9b   :  { %672 = vmatprep.mubr.msk.bf16.mxu0 %vm148_vm0, %v760_v0 }
  0xa2   :  { %673 = vmatmul.mubr.msk.bf16.gmra.mrb[4].mxu0 %vm148_vm0, %v761_v1 }
 0x16d   :  { %v670_v5 = vpop.f32.mrb[0].mxu0 }
 0x16e   :  { %v195_v6 = vpop.f32.mrb[1].mxu0 }
 0x16f   :  { %v671_v7 = vpop.f32.mrb[2].mxu0  ;;  %708 = vmatprep.mubr.f32.mxu1 %v195_v6 }
 0x170   :  { %v198_v8 = vpop.f32.mrb[3].mxu0 }
 0x171   :  { %709 = vmatmul.mubr.f32.vlgmr.msra.gmra.mrb[0].mxu1 %v198_v8 }
 0x172   :  { %711 = vmatprep.mubr.f32.mxu1 %v670_v5 }
 0x175   :  { %v674_v9 = vpop.f32.mrb[4].mxu0  ;;  %712 = vmatmul.mubr.f32.gmra.mrb[2].mxu1 %v671_v7 }
 0x176   :  { %v211_v10 = vpop.f32.mrb[5].mxu0 }
 0x177   :  { %v675_v11 = vpop.f32.mrb[6].mxu0  ;;  %714 = vmatprep.mubr.f32.mxu1 %v211_v10 }
 0x178   :  { %v214_v12 = vpop.f32.mrb[7].mxu0 }
 0x179   :  { %715 = vmatmul.mubr.f32.gmra.mrb[4].mxu1 %v214_v12 }
 0x17a   :  { %717 = vmatprep.mubr.f32.mxu1 %v674_v9 }
 0x17d   :  { %718 = vmatmul.mubr.f32.gmra.mrb[6].mxu1 %v675_v11 }
 0x244   :  { %v957_v13 = vpop.f32.mrb[0].mxu1 }
 0x245   :  { %v959_v14 = vpop.f32.mrb[1].mxu1  ;;  %v415_v15 = vmul.f32 %v957_v13, %v957_v13 }
 0x246   :  { %v605_v16 = vpack.c.bf16 %v957_v13, %v959_v14  ;;  %v414_v17 = vmul.f32 %v959_v14, %v959_v14 }
 0x247   :  { %424 = vadd.xlane.f32.xlu1 %v415_v15 }
 0x248   :  { %606 = vst [vmem:[#allocation3] sm:$0xff] %v605_v16   ;;  %422 = vadd.xlane.f32.xlu0 %v414_v17  ;;  %v967_v18 = vpop.f32.mrb[2].mxu1 }
 0x249   :  { %v969_v19 = vpop.f32.mrb[3].mxu1  ;;  %v417_v20 = vmul.f32 %v967_v18, %v967_v18 }
 0x24a   :  { %v610_v21 = vpack.c.bf16 %v967_v18, %v969_v19  ;;  %v416_v25 = vmul.f32 %v969_v19, %v969_v19 }
 0x24c   :  { %625 = vst [vmem:[#allocation3 + $0x8] sm:$0xff] %v610_v21   ;;  %428 = vadd.xlane.f32.xlu0 %v417_v20  ;;  %v975_v22 = vpop.f32.mrb[4].mxu1 }
 0x24d   :  { %v977_v23 = vpop.f32.mrb[5].mxu1  ;;  %v419_v30 = vmul.f32 %v975_v22, %v975_v22 }
 0x24e   :  { %v615_v24 = vpack.c.bf16 %v975_v22, %v977_v23  ;;  %v418_v26 = vmul.f32 %v977_v23, %v977_v23 }
 0x250   :  { %626 = vst [vmem:[#allocation3 + $0x10] sm:$0xff] %v615_v24   ;;  %426 = vadd.xlane.f32.xlu0 %v416_v25  ;;  %430 = vadd.xlane.f32.xlu1 %v418_v26  ;;  %v985_v27 = vpop.f32.mrb[6].mxu1 }
 0x251   :  { %v987_v28 = vpop.f32.mrb[7].mxu1  ;;  %v421_v32 = vmul.f32 %v985_v27, %v985_v27 }
 0x252   :  { %v620_v29 = vpack.c.bf16 %v985_v27, %v987_v28  ;;  %v420_v31 = vmul.f32 %v987_v28, %v987_v28 }
 0x254   :  { %627 = vst [vmem:[#allocation3 + $0x18] sm:$0xff] %v620_v29   ;;  %432 = vadd.xlane.f32.xlu0 %v419_v30  ;;  %434 = vadd.xlane.f32.xlu1 %v420_v31 }
 0x258   :  { %436 = vadd.xlane.f32.xlu0 %v421_v32 }
 0x259   :  { %805 = shalt.err (!%p802_p4)
}
 0x25a   :  { %s806_s13 = scalar_lea.hbm %s1086_s5, 512 }
 0x25b   :  { %p807_p5 = scmp.ne.s32.totalorder %s1086_s5, %s806_s13  ;;  %p810_p6 = scmp.lt.u32.totalorder %s806_s13, %s1086_s5 }
 0x25d   :  { %p812_p7 = pnand %p810_p6, %p807_p5 }
 0x25f   :  { %815 = shalt.err (!%p812_p7)
}
 0x260   :  { %s820_s18 = smov 64   ;;  %s821_s19 = smov 4   ;;  %v495_v17 = vld [vmem:[%s1085_s4 + $0x8] sm:$0xff]  ;;  %v494_v26 = vld [vmem:[%s1085_s4] sm:$0xff] }
 0x261   :  { %553 = dma.vmem_to_hbm [thread:$0]  %s548_s3, 512, %s1086_s5, [#allocation4], %s820_s18, %s820_s18, %s821_s19  }
 0x2d4   :  { %v425_v33 = vpop.xlane.xlu1 %424 }
 0x2d5   :  { %762 = vrsqrt.f32 %v425_v33  ;;  %v423_v34 = vpop.xlane.xlu0 %422  ;;  %vm447_vm1 = vcmp.eq.f32.partialorder %v425_v33, inf  ;;  %vm449_vm2 = vcmp.eq.f32.partialorder %v425_v33, 0.0  ;;  %v450_v41 = vand.u32 2147483648, %v425_v33 }
 0x2d6   :  { %764 = vrsqrt.f32 %v423_v34  ;;  %vm440_vm3 = vcmp.eq.f32.partialorder %v423_v34, inf  ;;  %v443_v46 = vand.u32 2147483648, %v423_v34  ;;  %vm442_vm4 = vcmp.eq.f32.partialorder %v423_v34, 0.0 }
 0x2d9   :  { %v429_v35 = vpop.xlane.xlu0 %428 }
 0x2da   :  { %766 = vrsqrt.f32 %v429_v35  ;;  %vm461_vm5 = vcmp.eq.f32.partialorder %v429_v35, inf  ;;  %v464_v55 = vand.u32 2147483648, %v429_v35  ;;  %vm463_vm6 = vcmp.eq.f32.partialorder %v429_v35, 0.0 }
 0x2dd   :  { %v427_v36 = vpop.xlane.xlu0 %426  ;;  %v431_v37 = vpop.xlane.xlu1 %430 }
 0x2de   :  { %768 = vrsqrt.f32 %v427_v36  ;;  %vm454_vm7 = vcmp.eq.f32.partialorder %v427_v36, inf  ;;  %vm456_vm8 = vcmp.eq.f32.partialorder %v427_v36, 0.0  ;;  %v457_v62 = vand.u32 2147483648, %v427_v36 }
 0x2df   :  { %v763_v38 = vpop.eup %762  ;;  %770 = vrsqrt.f32 %v431_v37  ;;  %vm468_vm9 = vcmp.eq.f32.partialorder %v431_v37, inf  ;;  %v471_v1 = vand.u32 2147483648, %v431_v37  ;;  %vm470_vm10 = vcmp.eq.f32.partialorder %v431_v37, 0.0 }
 0x2e0   :  { %v765_v39 = vpop.eup %764  ;;  %v446_v40 = vmul.f32 %v763_v38, %v425_v33 }
 0x2e1   :  { %v439_v42 = vmul.f32 %v765_v39, %v423_v34  ;;  %v433_v43 = vpop.xlane.xlu0 %432  ;;  %v1009_v44 = vpop.xlane.xlu1 %434 }
 0x2e2   :  { %v448_v45 = vsel %vm447_vm1, %v425_v33, %v446_v40  ;;  %772 = vrsqrt.f32 %v433_v43  ;;  %vm475_vm11 = vcmp.eq.f32.partialorder %v433_v43, inf  ;;  %vm477_vm12 = vcmp.eq.f32.partialorder %v433_v43, 0.0 }
 0x2e3   :  { %v451_v47 = vsel %vm449_vm2, %v450_v41, %v448_v45  ;;  %v441_v48 = vsel %vm440_vm3, %v423_v34, %v439_v42  ;;  %774 = vrsqrt.f32 %v1009_v44  ;;  %v478_v10 = vand.u32 2147483648, %v433_v43 }
 0x2e4   :  { %v767_v49 = vpop.eup %766  ;;  %v503_v50 = vmax.f32 %v451_v47, 1e-12  ;;  %v444_v51 = vsel %vm442_vm4, %v443_v46, %v441_v48  ;;  %vm482_vm13 = vcmp.eq.f32.partialorder %v1009_v44, inf  ;;  %v485_v15 = vand.u32 2147483648, %v1009_v44 }
 0x2e5   :  { %v502_v52 = vmax.f32 %v444_v51, 1e-12  ;;  %v460_v53 = vmul.f32 %v767_v49, %v429_v35  ;;  %v1012_v54 = vpop.xlane.xlu0 %436  ;;  %vm484_vm14 = vcmp.eq.f32.partialorder %v1009_v44, 0.0  ;;  %v499_v51 = vld [vmem:[%s1085_s4 + $0x28] sm:$0xff] }
 0x2e6   :  { %776 = vrcp.f32 %v503_v50  ;;  %vm489_vm15 = vcmp.eq.f32.partialorder %v1012_v54, inf  ;;  %vm491_vm0 = vcmp.eq.f32.partialorder %v1012_v54, 0.0 }
 0x2e7   :  { %778 = vrcp.f32 %v502_v52  ;;  %v462_v56 = vsel %vm461_vm5, %v429_v35, %v460_v53  ;;  %v500_v53 = vld [vmem:[%s1085_s4 + $0x30] sm:$0xff] }
 0x2e8   :  { %v769_v57 = vpop.eup %768  ;;  %v465_v58 = vsel %vm463_vm6, %v464_v55, %v462_v56  ;;  %780 = vrsqrt.f32 %v1012_v54 }
 0x2e9   :  { %v771_v59 = vpop.eup %770  ;;  %v505_v60 = vmax.f32 %v465_v58, 1e-12  ;;  %v453_v61 = vmul.f32 %v769_v57, %v427_v36 }
 0x2ea   :  { %v467_v63 = vmul.f32 %v771_v59, %v431_v37 }
 0x2eb   :  { %782 = vrcp.f32 %v505_v60  ;;  %v455_v0 = vsel %vm454_vm7, %v427_v36, %v453_v61 }
 0x2ec   :  { %v773_v2 = vpop.eup %772  ;;  %v458_v3 = vsel %vm456_vm8, %v457_v62, %v455_v0  ;;  %v469_v4 = vsel %vm468_vm9, %v431_v37, %v467_v63 }
 0x2ed   :  { %v775_v5 = vpop.eup %774  ;;  %v504_v6 = vmax.f32 %v458_v3, 1e-12  ;;  %v472_v7 = vsel %vm470_vm10, %v471_v1, %v469_v4  ;;  %v474_v8 = vmul.f32 %v773_v2, %v433_v43 }
 0x2ee   :  { %v506_v9 = vmax.f32 %v472_v7, 1e-12  ;;  %v481_v11 = vmul.f32 %v775_v5, %v1009_v44 }
 0x2ef   :  { %784 = vrcp.f32 %v504_v6  ;;  %v476_v12 = vsel %vm475_vm11, %v433_v43, %v474_v8 }
 0x2f0   :  { %v777_v16 = vpop.eup %776  ;;  %786 = vrcp.f32 %v506_v9  ;;  %v479_v20 = vsel %vm477_vm12, %v478_v10, %v476_v12  ;;  %v483_v21 = vsel %vm482_vm13, %v1009_v44, %v481_v11  ;;  %v496_v44 = vld [vmem:[%s1085_s4 + $0x10] sm:$0xff] }
 0x2f1   :  { %v779_v24 = vpop.eup %778  ;;  %v513_v25 = vmul.f32 %v777_v16, %v957_v13  ;;  %v507_v29 = vmax.f32 %v479_v20, 1e-12  ;;  %v486_v30 = vsel %vm484_vm14, %v485_v15, %v483_v21  ;;  %v492_v13 = vand.u32 2147483648, %v1012_v54 }
 0x2f2   :  { %v781_v31 = vpop.eup %780  ;;  %v511_v32 = vmul.f32 %v779_v24, %v959_v14  ;;  %v508_v33 = vmax.f32 %v486_v30, 1e-12  ;;  %v497_v14 = vld [vmem:[%s1085_s4 + $0x18] sm:$0xff] }
 0x2f3   :  { %v527_v34 = vadd.f32 %v513_v25, %v495_v17  ;;  %788 = vrcp.f32 %v507_v29  ;;  %v488_v35 = vmul.f32 %v781_v31, %v1012_v54 }
 0x2f4   :  { %v526_v36 = vadd.f32 %v511_v32, %v494_v26  ;;  %790 = vrcp.f32 %v508_v33 }
 0x2f5   :  { %v783_v37 = vpop.eup %782  ;;  %535 = vst [vmem:[%s1087_s6 + $0x8] sm:$0xff] %v527_v34  ;;  %v490_v38 = vsel %vm489_vm15, %v1012_v54, %v488_v35 }
 0x2f6   :  { %534 = vst [vmem:[%s1087_s6] sm:$0xff] %v526_v36  ;;  %v517_v39 = vmul.f32 %v783_v37, %v967_v18  ;;  %v493_v40 = vsel %vm491_vm0, %v492_v13, %v490_v38  ;;  %v498_v18 = vld [vmem:[%s1085_s4 + $0x20] sm:$0xff] }
 0x2f7   :  { %v509_v41 = vmax.f32 %v493_v40, 1e-12 }
 0x2f8   :  { %v529_v42 = vadd.f32 %v517_v39, %v497_v14 }
 0x2f9   :  { %v785_v43 = vpop.eup %784  ;;  %792 = vrcp.f32 %v509_v41 }
 0x2fa   :  { %v787_v45 = vpop.eup %786  ;;  %537 = vst [vmem:[%s1087_s6 + $0x18] sm:$0xff] %v529_v42  ;;  %v515_v46 = vmul.f32 %v785_v43, %v969_v19 }
 0x2fb   :  { %v519_v47 = vmul.f32 %v787_v45, %v977_v23 }
 0x2fc   :  { %v528_v48 = vadd.f32 %v515_v46, %v496_v44 }
 0x2fd   :  { %v789_v49 = vpop.eup %788  ;;  %v530_v50 = vadd.f32 %v519_v47, %v498_v18 }
 0x2fe   :  { %v791_v52 = vpop.eup %790  ;;  %536 = vst [vmem:[%s1087_s6 + $0x10] sm:$0xff] %v528_v48  ;;  %v521_v19 = vmul.f32 %v789_v49, %v975_v22  ;;  %v501_v22 = vld [vmem:[%s1085_s4 + $0x38] sm:$0xff] }
 0x2ff   :  { %538 = vst [vmem:[%s1087_s6 + $0x20] sm:$0xff] %v530_v50  ;;  %v523_v23 = vmul.f32 %v791_v52, %v987_v28 }
 0x300   :  { %v531_v54 = vadd.f32 %v521_v19, %v499_v51 }
 0x301   :  { %v532_v55 = vadd.f32 %v523_v23, %v500_v53 }
 0x302   :  { %539 = vst [vmem:[%s1087_s6 + $0x28] sm:$0xff] %v531_v54 }
 0x303   :  { %v793_v56 = vpop.eup %792  ;;  %540 = vst [vmem:[%s1087_s6 + $0x30] sm:$0xff] %v532_v55 }
 0x304   :  { %v525_v57 = vmul.f32 %v793_v56, %v985_v27 }
 0x306   :  { %v533_v58 = vadd.f32 %v525_v57, %v501_v22 }
 0x308   :  { %541 = vst [vmem:[%s1087_s6 + $0x38] sm:$0xff] %v533_v58 }
 0x309   :  { %816 = dma.done.wait [#allocation4], 512  }
 0x30a   :  { %817 = vsyncadd [#allocation4], 4294966784 }
 0x30b   :  { %561 = vsyncpa [#allocation4], 1 }

// kernel: rain_forward.7
= control target key start
LH: loop header
LB: loop body
LE: loop exit
PB: predicated region body
PF: predicated region fallthrough
CT: control target
= control target key end

     0   :  { %v277_v16 = vmov 0.0   ;;  %vm278_vm0 = vmmov 0   ;;  %s439_s1 = inlined_call_operand.vmem [shape: f32[64,128], index: 1, kind: input, shape index: {}]   ;;  %s440_s2 = inlined_call_operand.vmem [shape: f32[1,128], index: 2, kind: input, shape index: {}]   ;;  %s441_s0 = inlined_call_operand.vmem [shape: f32[4,128], index: 0, kind: input, shape index: {}]   ;;  %s442_s4 = inlined_call_operand.vmem [shape: f32[64,1], index: 4, kind: output, shape index: {1}]   ;;  %s443_s3 = inlined_call_operand.vmem [shape: f32[4,64], index: 3, kind: output, shape index: {0}]  }
   0x1   :  { %v307_v0 = vld [vmem:[%s439_s1 + $0x10] sm:$0xff]  ;;  %v312_v1 = vld [vmem:[%s439_s1] sm:$0xff]  ;;  %v317_v2 = vld [vmem:[%s439_s1 + $0x18] sm:$0xff]  ;;  %231 = vmatprep.subr.bf16.mxu0 %v277_v16  ;;  %239 = vmatprep.mubr.msk.bf16.mxu0 %vm278_vm0, %v277_v16 }
   0x2   :  { %v67_v3 = vmul.f32 %v307_v0, %v307_v0  ;;  %v65_v4 = vmul.f32 %v312_v1, %v312_v1  ;;  %v326_v5 = vld [vmem:[%s439_s1 + $0x8] sm:$0xff]  ;;  %v68_v6 = vmul.f32 %v317_v2, %v317_v2  ;;  %v340_v9 = vld [vmem:[%s439_s1 + $0x20] sm:$0xff]  ;;  %v349_v12 = vld [vmem:[%s439_s1 + $0x38] sm:$0xff] }
   0x3   :  { %v66_v7 = vmul.f32 %v326_v5, %v326_v5  ;;  %v335_v8 = vld [vmem:[%s439_s1 + $0x28] sm:$0xff]  ;;  %v69_v11 = vmul.f32 %v340_v9, %v340_v9  ;;  %v354_v13 = vld [vmem:[%s439_s1 + $0x30] sm:$0xff]  ;;  %v72_v14 = vmul.f32 %v349_v12, %v349_v12  ;;  %v225_v17 = vld [vmem:[%s440_s2] ss:$0 sm:$0xff] }
   0x4   :  { %77 = vadd.xlane.f32.xlu1 %v67_v3  ;;  %73 = vadd.xlane.f32.xlu0 %v65_v4  ;;  %v70_v10 = vmul.f32 %v335_v8, %v335_v8  ;;  %v71_v15 = vmul.f32 %v354_v13, %v354_v13  ;;  %v33_v18 = vmul.f32 %v225_v17, %v326_v5 }
   0x5   :  { %v32_v19 = vmul.f32 %v225_v17, %v312_v1  ;;  %v35_v20 = vmul.f32 %v225_v17, %v317_v2  ;;  %v34_v21 = vmul.f32 %v225_v17, %v307_v0  ;;  %v37_v22 = vmul.f32 %v225_v17, %v335_v8 }
   0x6   :  { %v36_v23 = vmul.f32 %v225_v17, %v340_v9  ;;  %v39_v24 = vmul.f32 %v225_v17, %v349_v12  ;;  %v38_v25 = vmul.f32 %v225_v17, %v354_v13 }
   0x8   :  { %79 = vadd.xlane.f32.xlu1 %v68_v6  ;;  %75 = vadd.xlane.f32.xlu0 %v66_v7 }
   0xc   :  { %83 = vadd.xlane.f32.xlu1 %v70_v10  ;;  %81 = vadd.xlane.f32.xlu0 %v69_v11 }
  0x10   :  { %87 = vadd.xlane.f32.xlu1 %v72_v14  ;;  %85 = vadd.xlane.f32.xlu0 %v71_v15 }
  0x14   :  { %42 = vadd.xlane.f32.xlu1 %v33_v18  ;;  %40 = vadd.xlane.f32.xlu0 %v32_v19 }
  0x18   :  { %46 = vadd.xlane.f32.xlu1 %v35_v20  ;;  %44 = vadd.xlane.f32.xlu0 %v34_v21 }
  0x1c   :  { %50 = vadd.xlane.f32.xlu1 %v37_v22  ;;  %48 = vadd.xlane.f32.xlu0 %v36_v23 }
  0x20   :  { %54 = vadd.xlane.f32.xlu1 %v39_v24  ;;  %52 = vadd.xlane.f32.xlu0 %v38_v25 }
  0x91   :  { %v78_v26 = vpop.xlane.xlu1 %77  ;;  %v74_v27 = vpop.xlane.xlu0 %73 }
  0x92   :  { %245 = vrsqrt.f32 %v78_v26  ;;  %vm91_vm1 = vcmp.eq.f32.partialorder %v74_v27, inf  ;;  %v94_v37 = vand.u32 2147483648, %v74_v27  ;;  %vm93_vm2 = vcmp.eq.f32.partialorder %v74_v27, 0.0 }
  0x93   :  { %247 = vrsqrt.f32 %v74_v27  ;;  %vm105_vm3 = vcmp.eq.f32.partialorder %v78_v26, inf  ;;  %vm107_vm4 = vcmp.eq.f32.partialorder %v78_v26, 0.0  ;;  %v108_v53 = vand.u32 2147483648, %v78_v26 }
  0x95   :  { %v80_v28 = vpop.xlane.xlu1 %79  ;;  %v76_v29 = vpop.xlane.xlu0 %75 }
  0x96   :  { %249 = vrsqrt.f32 %v80_v28  ;;  %vm112_vm5 = vcmp.eq.f32.partialorder %v80_v28, inf  ;;  %v115_v47 = vand.u32 2147483648, %v80_v28  ;;  %vm98_vm6 = vcmp.eq.f32.partialorder %v76_v29, inf }
  0x97   :  { %251 = vrsqrt.f32 %v76_v29  ;;  %v101_v48 = vand.u32 2147483648, %v76_v29  ;;  %vm114_vm7 = vcmp.eq.f32.partialorder %v80_v28, 0.0  ;;  %vm100_vm8 = vcmp.eq.f32.partialorder %v76_v29, 0.0 }
  0x99   :  { %v84_v30 = vpop.xlane.xlu1 %83  ;;  %v82_v31 = vpop.xlane.xlu0 %81 }
  0x9a   :  { %253 = vrsqrt.f32 %v84_v30  ;;  %vm126_vm9 = vcmp.eq.f32.partialorder %v84_v30, inf  ;;  %vm119_vm10 = vcmp.eq.f32.partialorder %v82_v31, inf  ;;  %v129_v61 = vand.u32 2147483648, %v84_v30 }
  0x9b   :  { %255 = vrsqrt.f32 %v82_v31  ;;  %vm128_vm11 = vcmp.eq.f32.partialorder %v84_v30, 0.0  ;;  %v122_v63 = vand.u32 2147483648, %v82_v31  ;;  %vm121_vm12 = vcmp.eq.f32.partialorder %v82_v31, 0.0 }
  0x9c   :  { %v246_v32 = vpop.eup %245 }
  0x9d   :  { %v248_v33 = vpop.eup %247  ;;  %v373_v34 = vpop.xlane.xlu1 %87  ;;  %v104_v39 = vmul.f32 %v246_v32, %v78_v26 }
  0x9e   :  { %v90_v35 = vmul.f32 %v248_v33, %v74_v27  ;;  %v375_v36 = vpop.xlane.xlu0 %85  ;;  %257 = vrsqrt.f32 %v373_v34  ;;  %vm140_vm13 = vcmp.eq.f32.partialorder %v373_v34, inf  ;;  %v143_v20 = vand.u32 2147483648, %v373_v34 }
  0x9f   :  { %259 = vrsqrt.f32 %v375_v36  ;;  %v106_v50 = vsel %vm105_vm3, %v78_v26, %v104_v39  ;;  %vm133_vm14 = vcmp.eq.f32.partialorder %v375_v36, inf  ;;  %vm142_vm15 = vcmp.eq.f32.partialorder %v373_v34, 0.0 }
  0xa0   :  { %v250_v38 = vpop.eup %249  ;;  %v92_v40 = vsel %vm91_vm1, %v74_v27, %v90_v35  ;;  %v109_v59 = vsel %vm107_vm4, %v108_v53, %v106_v50  ;;  %v136_v22 = vand.u32 2147483648, %v375_v36  ;;  %vm135_vm0 = vcmp.eq.f32.partialorder %v375_v36, 0.0 }
  0xa1   :  { %v252_v41 = vpop.eup %251  ;;  %v95_v42 = vsel %vm93_vm2, %v94_v37, %v92_v40  ;;  %v111_v43 = vmul.f32 %v250_v38, %v80_v28  ;;  %v147_v4 = vmax.f32 %v109_v59, 1e-12  ;;  %vm56_vm1 = vcmask 7168  }
  0xa2   :  { %v145_v44 = vmax.f32 %v95_v42, 1e-12  ;;  %v97_v45 = vmul.f32 %v252_v41, %v76_v29  ;;  %vm215_vm2 = vcmask 519168  }
  0xa3   :  { %v113_v46 = vsel %vm112_vm5, %v80_v28, %v111_v43  ;;  %v173_v43 = vld [vmem:[%s441_s0] sm:$0xf] }
  0xa4   :  { %v254_v49 = vpop.eup %253  ;;  %v99_v51 = vsel %vm98_vm6, %v76_v29, %v97_v45  ;;  %v116_v54 = vsel %vm114_vm7, %v115_v47, %v113_v46  ;;  %261 = vrcp.f32 %v145_v44  ;;  %v174_v44 = vpack.c.bf16 %v173_v43, %v173_v43 }
  0xa5   :  { %v256_v52 = vpop.eup %255  ;;  %v102_v55 = vsel %vm100_vm8, %v101_v48, %v99_v51  ;;  %v125_v56 = vmul.f32 %v254_v49, %v84_v30  ;;  %v148_v60 = vmax.f32 %v116_v54, 1e-12 }
  0xa6   :  { %v146_v57 = vmax.f32 %v102_v55, 1e-12  ;;  %v118_v58 = vmul.f32 %v256_v52, %v82_v31 }
  0xa7   :  { %v127_v62 = vsel %vm126_vm9, %v84_v30, %v125_v56 }
  0xa8   :  { %263 = vrcp.f32 %v146_v57  ;;  %v258_v3 = vpop.eup %257  ;;  %v120_v6 = vsel %vm119_vm10, %v82_v31, %v118_v58  ;;  %v130_v10 = vsel %vm128_vm11, %v129_v61, %v127_v62 }
  0xa9   :  { %v260_v7 = vpop.eup %259  ;;  %265 = vrcp.f32 %v148_v60  ;;  %v123_v11 = vsel %vm121_vm12, %v122_v63, %v120_v6  ;;  %v139_v14 = vmul.f32 %v258_v3, %v373_v34  ;;  %v150_v17 = vmax.f32 %v130_v10, 1e-12 }
  0xaa   :  { %267 = vrcp.f32 %v147_v4  ;;  %v132_v15 = vmul.f32 %v260_v7, %v375_v36  ;;  %v149_v19 = vmax.f32 %v123_v11, 1e-12 }
  0xab   :  { %v141_v21 = vsel %vm140_vm13, %v373_v34, %v139_v14  ;;  %269 = vrcp.f32 %v150_v17 }
  0xac   :  { %v134_v24 = vsel %vm133_vm14, %v375_v36, %v132_v15  ;;  %271 = vrcp.f32 %v149_v19  ;;  %v144_v27 = vsel %vm142_vm15, %v143_v20, %v141_v21 }
  0xad   :  { %v137_v28 = vsel %vm135_vm0, %v136_v22, %v134_v24  ;;  %v152_v31 = vmax.f32 %v144_v27, 1e-12 }
  0xae   :  { %v262_v18 = vpop.eup %261  ;;  %v151_v33 = vmax.f32 %v137_v28, 1e-12 }
  0xaf   :  { %v154_v25 = vmul.f32 %v262_v18, %v312_v1  ;;  %273 = vrcp.f32 %v152_v31 }
  0xb0   :  { %275 = vrcp.f32 %v151_v33 }
  0xb2   :  { %v264_v23 = vpop.eup %263 }
  0xb3   :  { %v156_v26 = vmul.f32 %v264_v23, %v326_v5  ;;  %v266_v30 = vpop.eup %265 }
  0xb4   :  { %v268_v32 = vpop.eup %267  ;;  %v160_v34 = vmul.f32 %v266_v30, %v317_v2 }
  0xb5   :  { %v169_v29 = vpack.c.bf16 %v156_v26, %v154_v25  ;;  %v158_v35 = vmul.f32 %v268_v32, %v307_v0  ;;  %v270_v1 = vpop.eup %269 }
  0xb6   :  { %v272_v5 = vpop.eup %271  ;;  %v164_v38 = vmul.f32 %v270_v1, %v335_v8  ;;  %v43_v8 = vpop.xlane.xlu1 %42 }
  0xb7   :  { %232 = vmatpush3.bf16.xpose.msra.mxu0 %v169_v29  ;;  %v170_v36 = vpack.c.bf16 %v160_v34, %v158_v35  ;;  %v162_v37 = vmul.f32 %v272_v5, %v340_v9  ;;  %v41_v9 = vpop.xlane.xlu0 %40  ;;  %58 = vst.msk [vmem:[%s442_s4 + $0x8] sm:$0xff] %vm56_vm1, %v43_v8 }
  0xb8   :  { %233 = vmatprep.subr.bf16.mxu0 %v277_v16  ;;  %57 = vst.msk [vmem:[%s442_s4] sm:$0xff] %vm56_vm1, %v41_v9 }
  0xb9   :  { %v274_v39 = vpop.eup %273  ;;  %v171_v40 = vpack.c.bf16 %v164_v38, %v162_v37 }
  0xba   :  { %v276_v41 = vpop.eup %275  ;;  %v168_v0 = vmul.f32 %v274_v39, %v349_v12  ;;  %v47_v12 = vpop.xlane.xlu1 %46 }
  0xbb   :  { %v166_v2 = vmul.f32 %v276_v41, %v354_v13  ;;  %v45_v13 = vpop.xlane.xlu0 %44  ;;  %60 = vst.msk [vmem:[%s442_s4 + $0x18] sm:$0xff] %vm56_vm1, %v47_v12 }
  0xbc   :  { %59 = vst.msk [vmem:[%s442_s4 + $0x10] sm:$0xff] %vm56_vm1, %v45_v13 }
  0xbd   :  { %v172_v42 = vpack.c.bf16 %v168_v0, %v166_v2 }
  0xbf   :  { %234 = vmatpush3.bf16.xpose.msra.mxu0 %v170_v36  ;;  %v49_v45 = vpop.xlane.xlu0 %48 }
  0xc0   :  { %235 = vmatprep.subr.bf16.mxu0 %v277_v16  ;;  %61 = vst.msk [vmem:[%s442_s4 + $0x20] sm:$0xff] %vm56_vm1, %v49_v45 }
  0xc3   :  { %v53_v47 = vpop.xlane.xlu0 %52 }
  0xc4   :  { %63 = vst.msk [vmem:[%s442_s4 + $0x30] sm:$0xff] %vm56_vm1, %v53_v47 }
  0xc7   :  { %236 = vmatpush3.bf16.xpose.msra.mxu0 %v171_v40 }
  0xc8   :  { %237 = vmatprep.subr.bf16.mxu0 %v277_v16  ;;  %v51_v16 = vpop.xlane.xlu1 %50 }
  0xc9   :  { %62 = vst.msk [vmem:[%s442_s4 + $0x28] sm:$0xff] %vm56_vm1, %v51_v16 }
  0xcc   :  { %v55_v46 = vpop.xlane.xlu1 %54 }
  0xcd   :  { %64 = vst.msk [vmem:[%s442_s4 + $0x38] sm:$0xff] %vm56_vm1, %v55_v46 }
  0xcf   :  { %238 = vmatpush3.bf16.xpose.msra.mxu0 %v172_v42 }
  0xd6   :  { %240 = vmatmul.mubr.bf16.vlgmr.msra.gmra.mrb[0].mxu0 %v174_v44 }
 0x1a9   :  { %v209_v48 = vpop.f32.mrb[0].mxu0 }
 0x1aa   :  { %216 = vst.msk [vmem:[%s443_s3] sm:$0xf] %vm215_vm2, %v209_v48  ;;  %v241_v49 = vpop.f32.mrb[1].mxu0 }
 0x1ab   :  { %v212_v50 = vpop.f32.mrb[2].mxu0 }
 0x1ac   :  { %v242_v51 = vpop.f32.mrb[3].mxu0 }

// kernel: rain_forward.6
= control target key start
LH: loop header
LB: loop body
LE: loop exit
PB: predicated region body
PF: predicated region fallthrough
CT: control target
= control target key end

     0   :  { %v1711_v0 = vmov 0.0   ;;  %vm1712_vm0 = vmmov 0   ;;  %vm513_vm1 = vcmask 56320   ;;  %v1713_v62 = vmov 0   ;;  %s2189_s0 = inlined_call_operand.vmem [shape: f32[4,8,128], index: 0, kind: input, shape index: {}]   ;;  %s2190_s6 = inlined_call_operand.<no memory space> [shape: f32[1,1], index: 6, kind: input, shape index: {}]   ;;  %s2191_s5 = inlined_call_operand.vmem [shape: f32[1,128], index: 5, kind: input, shape index: {}]   ;;  %s2192_s12 = inlined_call_operand.vmem [shape: bf16[128,128], index: 12, kind: input, shape index: {}]   ;;  %s2193_s3 = inlined_call_operand.vmem [shape: f32[4,1,1], index: 3, kind: input, shape index: {}]   ;;  %s2194_s7 = inlined_call_operand.vmem [shape: f32[1,128], index: 7, kind: input, shape index: {}]   ;;  %s2195_s4 = inlined_call_operand.vmem [shape: f32[8,128], index: 4, kind: input, shape index: {}]   ;;  %s2196_s8 = inlined_call_operand.vmem [shape: f32[1,128], index: 8, kind: input, shape index: {}]   ;;  %s2197_s13 = inlined_call_operand.vmem [shape: f32[1,128], index: 13, kind: input, shape index: {}]   ;;  %s2198_s9 = inlined_call_operand.vmem [shape: f32[1,128], index: 9, kind: input, shape index: {}]   ;;  %s2199_s11 = inlined_call_operand.vmem [shape: bf16[128,128], index: 11, kind: input, shape index: {}]   ;;  %s2200_s1 = inlined_call_operand.vmem [shape: f32[4,8,128], index: 1, kind: input, shape index: {}]   ;;  %s2201_s10 = inlined_call_operand.vmem [shape: bf16[128,128], index: 10, kind: input, shape index: {}]   ;;  %s2202_s2 = inlined_call_operand.vmem [shape: f32[4,8,1], index: 2, kind: input, shape index: {}]   ;;  %s2203_s14 = inlined_call_operand.vmem [shape: f32[4,128], index: 14, kind: output, shape index: {}]  }
   0x1   :  { %1466 = vmatprep.subr.bf16.mxu0 %v1711_v0  ;;  %1496 = vmatprep.subr.bf16.mxu1 %v1711_v0  ;;  %v1794_v1 = vld [vmem:[%s2189_s0 + $0x1] sm:$0x7f]  ;;  %v1808_v5 = vld [vmem:[%s2189_s0 + $0x9] sm:$0x7f]  ;;  %v1834_v12 = vld [vmem:[%s2189_s0 + $0x18] sm:$0x7f]  ;;  %v19_v55 = vstv %s2190_s6 }
   0x2   :  { %v1799_v2 = vld [vmem:[%s2189_s0] sm:$0x7f]  ;;  %v176_v4 = vpack.c.bf16 %v1794_v1, %v1794_v1  ;;  %v1813_v6 = vld [vmem:[%s2189_s0 + $0x8] sm:$0x7f]  ;;  %1468 = vmatprep.mubr.msk.bf16.mxu0 %vm1712_vm0, %v1711_v0  ;;  %1498 = vmatprep.mubr.msk.bf16.mxu1 %vm1712_vm0, %v1711_v0  ;;  %v177_v13 = vpack.c.bf16 %v1808_v5, %v1808_v5  ;;  %v348_v15 = vpack.c.bf16 %v1834_v12, %v1834_v12  ;;  %v1846_v16 = vld [vmem:[%s2189_s0 + $0x11] sm:$0x7f] }
   0x3   :  { %v76_v3 = vsub.f32 %v1794_v1, %v1799_v2  ;;  %v77_v7 = vsub.f32 %v1808_v5, %v1813_v6  ;;  %v346_v8 = vpack.c.bf16 %v1813_v6, %v1813_v6  ;;  %v50_v9 = vld [vmem:[%s2189_s0] sm:$0xff]  ;;  %v51_v10 = vld [vmem:[%s2189_s0 + $0x8] sm:$0xff]  ;;  %v178_v17 = vpack.c.bf16 %v1846_v16, %v1846_v16  ;;  %v53_v18 = vld [vmem:[%s2189_s0 + $0x18] sm:$0xff]  ;;  %20 = vst [vmem:[#allocation2] sm:$0x1] %v19_v55 }
   0x4   :  { %1467 = vmatpush3.bf16.xpose.msra.mxu0 %v176_v4  ;;  %v172_v11 = vpack.c.bf16 %v50_v9, %v50_v9  ;;  %v173_v14 = vpack.c.bf16 %v51_v10, %v51_v10  ;;  %v175_v19 = vpack.c.bf16 %v53_v18, %v53_v18  ;;  %v52_v20 = vld [vmem:[%s2189_s0 + $0x10] sm:$0xff]  ;;  %v1865_v21 = vld [vmem:[%s2189_s0 + $0x19] sm:$0x7f]  ;;  %v345_v24 = vpack.c.bf16 %v1799_v2, %v1799_v2 }
   0x5   :  { %1497 = vmatpush3.bf16.xpose.msra.mxu1 %v346_v8  ;;  %1472 = vmatprep.subr.bf16.mxu0 %v1711_v0  ;;  %v174_v22 = vpack.c.bf16 %v52_v20, %v52_v20  ;;  %v179_v23 = vpack.c.bf16 %v1865_v21, %v1865_v21  ;;  %v1882_v25 = vld [vmem:[%s2189_s0 + $0x10] sm:$0x7f]  ;;  %v79_v18 = vsub.f32 %v1865_v21, %v1834_v12  ;;  %vm90_vm2 = vcmask 1046528  }
   0x6   :  { %1508 = vmatprep.subr.bf16.mxu1 %v1711_v0  ;;  %v347_v26 = vpack.c.bf16 %v1882_v25, %v1882_v25  ;;  %1581 = vset.pattern.permute.xlu0 %v1713_v62  ;;  %vm624_vm3 = vcmask 1041409   ;;  %vm625_vm4 = vcmask 1042434   ;;  %vm627_vm5 = vcmask 1043459  }
   0x7   :  { %1582 = vset.pattern.permute.xlu1 %v1713_v62  ;;  %vm1360_vm6 = vcmask 1043456  }
   0xb   :  { %1469 = vmatmul.mubr.bf16.vlgmr.msra.gmra.mrb[0].mxu0 %v172_v11 }
   0xc   :  { %1499 = vmatmul.mubr.bf16.vlgmr.msra.gmra.mrb[0].mxu1 %v173_v14  ;;  %1473 = vmatpush3.bf16.xpose.msra.mxu0 %v177_v13 }
   0xd   :  { %1474 = vmatprep.mubr.msk.bf16.mxu0 %vm1712_vm0, %v1711_v0  ;;  %1478 = vmatprep.subr.bf16.mxu0 %v1711_v0 }
   0xe   :  { %1509 = vmatpush3.bf16.xpose.msra.mxu1 %v348_v15  ;;  %1510 = vmatprep.mubr.msk.bf16.mxu1 %vm1712_vm0, %v1711_v0 }
   0xf   :  { %1534 = vmatprep.subr.bf16.mxu1 %v1711_v0 }
  0x13   :  { %1475 = vmatmul.mubr.bf16.vlgmr.msra.gmra.mrb[4].mxu0 %v173_v14  ;;  %v1380_v14 = vld [vmem:[%s2191_s5] ss:$0 sm:$0xff] }
  0x14   :  { %1479 = vmatpush3.bf16.xpose.msra.mxu0 %v178_v17  ;;  %1480 = vmatprep.mubr.msk.bf16.mxu0 %vm1712_vm0, %v1711_v0  ;;  %v87_v17 = vmul.f32 %v1380_v14, %v77_v7  ;;  %v86_v20 = vmul.f32 %v1380_v14, %v76_v3  ;;  %v89_v5 = vmul.f32 %v1380_v14, %v79_v18 }
  0x15   :  { %1484 = vmatprep.subr.bf16.mxu0 %v1711_v0  ;;  %1511 = vmatmul.mubr.bf16.vlgmr.msra.gmra.mrb[4].mxu1 %v175_v19 }
  0x16   :  { %1550 = vmatprep.mubr.msk.bf16.mxu1 %vm1712_vm0, %v1711_v0  ;;  %v91_v1 = vsel %vm90_vm2, %v86_v20, 0.0  ;;  %v100_v3 = vsel %vm90_vm2, %v89_v5, 0.0 }
  0x1b   :  { %1481 = vmatmul.mubr.bf16.vlgmr.msra.gmra.mrb[8].mxu0 %v174_v22 }
  0x1c   :  { %1485 = vmatpush3.bf16.xpose.msra.mxu0 %v179_v23  ;;  %1486 = vmatprep.mubr.msk.bf16.mxu0 %vm1712_vm0, %v1711_v0 }
  0x1d   :  { %1490 = vmatprep.subr.bf16.mxu0 %v1711_v0 }
  0x23   :  { %1487 = vmatmul.mubr.bf16.vlgmr.msra.gmra.mrb[12].mxu0 %v175_v19 }
  0x24   :  { %1491 = vmatpush3.bf16.xpose.msra.mxu0 %v345_v24  ;;  %1492 = vmatprep.mubr.msk.bf16.mxu0 %vm1712_vm0, %v1711_v0  ;;  %v78_v24 = vsub.f32 %v1846_v16, %v1882_v25  ;;  %v1381_v16 = vld [vmem:[#allocation2] ss:$0 sm:$0xff] }
  0x25   :  { %1502 = vmatprep.subr.bf16.mxu0 %v1711_v0 }
  0x26   :  { %v88_v2 = vmul.f32 %v1380_v14, %v78_v24 }
  0x28   :  { %v97_v21 = vsel %vm90_vm2, %v88_v2, 0.0 }
  0x2b   :  { %1493 = vmatmul.mubr.bf16.vlgmr.msra.gmra.mrb[16].mxu0 %v172_v11 }
  0x2c   :  { %1503 = vmatpush3.bf16.xpose.msra.mxu0 %v347_v26  ;;  %1504 = vmatprep.mubr.msk.bf16.mxu0 %vm1712_vm0, %v1711_v0  ;;  %v94_v26 = vsel %vm90_vm2, %v87_v17, 0.0 }
  0x33   :  { %1505 = vmatmul.mubr.bf16.vlgmr.msra.gmra.mrb[20].mxu0 %v174_v22 }
  0xde   :  { %v214_v27 = vpop.f32.mrb[0].mxu0 }
  0xdf   :  { %v1888_v28 = vmul.f32 0.1, %v214_v27  ;;  %v423_v29 = vpop.f32.mrb[0].mxu1  ;;  %v1470_v30 = vpop.f32.mrb[1].mxu0 }
  0xe0   :  { %v1890_v31 = vmul.f32 0.1, %v423_v29  ;;  %v217_v32 = vpop.f32.mrb[2].mxu0  ;;  %v1500_v33 = vpop.f32.mrb[1].mxu1 }
  0xe1   :  { %v1471_v34 = vpop.f32.mrb[3].mxu0  ;;  %v514_v35 = vsel %vm513_vm1, %v1888_v28, -inf  ;;  %v426_v36 = vpop.f32.mrb[2].mxu1 }
  0xe2   :  { %v561_v37 = vsel %vm513_vm1, %v1890_v31, -inf  ;;  %515 = vmax.xlane.f32.xlu0 %v514_v35  ;;  %v1501_v38 = vpop.f32.mrb[3].mxu1 }
  0xe3   :  { %562 = vmax.xlane.f32.xlu1 %v561_v37 }
  0xe6   :  { %v254_v39 = vpop.f32.mrb[4].mxu0 }
  0xe7   :  { %v1896_v40 = vmul.f32 0.1, %v254_v39  ;;  %v1476_v41 = vpop.f32.mrb[5].mxu0 }
  0xe8   :  { %v257_v42 = vpop.f32.mrb[6].mxu0  ;;  %v503_v43 = vpop.f32.mrb[4].mxu1 }
  0xe9   :  { %v1477_v44 = vpop.f32.mrb[7].mxu0  ;;  %v517_v45 = vsel %vm513_vm1, %v1896_v40, -inf  ;;  %v1512_v46 = vpop.f32.mrb[5].mxu1  ;;  %v1913_v9 = vmul.f32 0.1, %v503_v43 }
  0xea   :  { %518 = vmax.xlane.f32.xlu0 %v517_v45  ;;  %v506_v47 = vpop.f32.mrb[6].mxu1 }
  0xeb   :  { %v1513_v48 = vpop.f32.mrb[7].mxu1  ;;  %v567_v15 = vsel %vm513_vm1, %v1913_v9, -inf }
  0xee   :  { %v294_v49 = vpop.f32.mrb[8].mxu0 }
  0xef   :  { %v1900_v50 = vmul.f32 0.1, %v294_v49  ;;  %v1482_v51 = vpop.f32.mrb[9].mxu0 }
  0xf0   :  { %v297_v52 = vpop.f32.mrb[10].mxu0 }
  0xf1   :  { %v1483_v53 = vpop.f32.mrb[11].mxu0  ;;  %v520_v54 = vsel %vm513_vm1, %v1900_v50, -inf }
  0xf2   :  { %521 = vmax.xlane.f32.xlu0 %v520_v54 }
  0xf6   :  { %v334_v56 = vpop.f32.mrb[12].mxu0 }
  0xf7   :  { %v1907_v57 = vmul.f32 0.1, %v334_v56  ;;  %v1488_v58 = vpop.f32.mrb[13].mxu0 }
  0xf8   :  { %v337_v59 = vpop.f32.mrb[14].mxu0 }
  0xf9   :  { %v1489_v60 = vpop.f32.mrb[15].mxu0  ;;  %v523_v61 = vsel %vm513_vm1, %v1907_v57, -inf }
  0xfa   :  { %524 = vmax.xlane.f32.xlu1 %v523_v61 }
  0xfe   :  { %v383_v63 = vpop.f32.mrb[16].mxu0 }
  0xff   :  { %v1911_v4 = vmul.f32 0.1, %v383_v63  ;;  %v1494_v8 = vpop.f32.mrb[17].mxu0 }
 0x100   :  { %v386_v10 = vpop.f32.mrb[18].mxu0 }
 0x101   :  { %v1495_v11 = vpop.f32.mrb[19].mxu0  ;;  %v558_v13 = vsel %vm513_vm1, %v1911_v4, -inf }
 0x102   :  { %559 = vmax.xlane.f32.xlu1 %v558_v13 }
 0x106   :  { %568 = vmax.xlane.f32.xlu1 %v567_v15  ;;  %v463_v19 = vpop.f32.mrb[20].mxu0 }
 0x107   :  { %v1930_v22 = vmul.f32 0.1, %v463_v19  ;;  %v1506_v23 = vpop.f32.mrb[21].mxu0 }
 0x108   :  { %v466_v6 = vpop.f32.mrb[22].mxu0 }
 0x109   :  { %v1507_v7 = vpop.f32.mrb[23].mxu0  ;;  %v564_v12 = vsel %vm513_vm1, %v1930_v22, -inf }
 0x10a   :  { %565 = vmax.xlane.f32.xlu0 %v564_v12  ;;  %95 = vadd.xlane.f32.xlu1 %v94_v26 }
 0x10e   :  { %92 = vadd.xlane.f32.xlu0 %v91_v1  ;;  %101 = vadd.xlane.f32.xlu1 %v100_v3  ;;  %v606_v3 = vlaneseq }
 0x112   :  { %98 = vadd.xlane.f32.xlu0 %v97_v21 }
 0x128   :  { %109 = vperm.xlu0 %1581, %v1381_v16  }
 0x16f   :  { %v516_v25 = vpop.xlane.xlu0 %515 }
 0x170   :  { %v563_v27 = vpop.xlane.xlu1 %562  ;;  %v526_v29 = vsub.f32 %v1888_v28, %v516_v25 }
 0x171   :  { %v571_v30 = vsub.f32 %v1890_v31, %v563_v27 }
 0x172   :  { %v530_v32 = vmul.f32 1.442695, %v526_v29  ;;  %v607_v29 = vand.u32 127, %v606_v3 }
 0x173   :  { %v576_v33 = vmul.f32 1.442695, %v571_v30  ;;  %v1980_v30 = vshrl.u32 %v606_v3, 7 }
 0x174   :  { %1607 = vpow2.f32 %v530_v32 }
 0x175   :  { %1609 = vpow2.f32 %v576_v33  ;;  %v1983_v33 = vsub.s32 %v607_v29, %v1980_v30 }
 0x177   :  { %v519_v34 = vpop.xlane.xlu0 %518 }
 0x178   :  { %v527_v35 = vsub.f32 %v1896_v40, %v519_v34 }
 0x17a   :  { %v532_v36 = vmul.f32 1.442695, %v527_v35 }
 0x17c   :  { %1611 = vpow2.f32 %v532_v36 }
 0x17e   :  { %v1943_v37 = vpop.eup %1607 }
 0x17f   :  { %v522_v38 = vpop.xlane.xlu0 %521  ;;  %v538_v39 = vsel %vm513_vm1, %v1943_v37, 0.0  ;;  %v1947_v41 = vpop.eup %1609 }
 0x180   :  { %v528_v28 = vsub.f32 %v1900_v50, %v522_v38  ;;  %539 = vadd.xlane.f32.xlu1 %v538_v39  ;;  %v585_v42 = vsel %vm513_vm1, %v1947_v41, 0.0 }
 0x182   :  { %v534_v31 = vmul.f32 1.442695, %v528_v28 }
 0x184   :  { %1613 = vpow2.f32 %v534_v31  ;;  %586 = vadd.xlane.f32.xlu1 %v585_v42 }
 0x186   :  { %v1952_v40 = vpop.eup %1611 }
 0x187   :  { %v525_v43 = vpop.xlane.xlu1 %524  ;;  %v541_v44 = vsel %vm513_vm1, %v1952_v40, 0.0 }
 0x188   :  { %v529_v45 = vsub.f32 %v1907_v57, %v525_v43  ;;  %542 = vadd.xlane.f32.xlu1 %v541_v44 }
 0x18a   :  { %v536_v46 = vmul.f32 1.442695, %v529_v45 }
 0x18c   :  { %1615 = vpow2.f32 %v536_v46 }
 0x18e   :  { %v1957_v47 = vpop.eup %1613 }
 0x18f   :  { %v560_v48 = vpop.xlane.xlu1 %559  ;;  %v544_v49 = vsel %vm513_vm1, %v1957_v47, 0.0 }
 0x190   :  { %v570_v50 = vsub.f32 %v1911_v4, %v560_v48  ;;  %545 = vadd.xlane.f32.xlu1 %v544_v49 }
 0x192   :  { %v574_v51 = vmul.f32 1.442695, %v570_v50 }
 0x193   :  { %v569_v52 = vpop.xlane.xlu1 %568 }
 0x194   :  { %1617 = vpow2.f32 %v574_v51  ;;  %v573_v54 = vsub.f32 %v1913_v9, %v569_v52 }
 0x196   :  { %v1962_v53 = vpop.eup %1615  ;;  %v580_v58 = vmul.f32 1.442695, %v573_v54 }
 0x197   :  { %v566_v55 = vpop.xlane.xlu0 %565  ;;  %v547_v56 = vsel %vm513_vm1, %v1962_v53, 0.0  ;;  %v96_v11 = vpop.xlane.xlu1 %95 }
 0x198   :  { %v572_v57 = vsub.f32 %v1930_v22, %v566_v55  ;;  %548 = vadd.xlane.f32.xlu1 %v547_v56  ;;  %v141_v14 = vsub.f32 0.0, %v96_v11 }
 0x19a   :  { %v578_v59 = vmul.f32 1.442695, %v572_v57 }
 0x19b   :  { %v93_v9 = vpop.xlane.xlu0 %92  ;;  %v102_v6 = vpop.xlane.xlu1 %101 }
 0x19c   :  { %1619 = vpow2.f32 %v578_v59  ;;  %v140_v25 = vsub.f32 0.0, %v93_v9  ;;  %v143_v46 = vsub.f32 0.0, %v102_v6 }
 0x19d   :  { %1621 = vpow2.f32 %v580_v58 }
 0x19e   :  { %v1968_v60 = vpop.eup %1617 }
 0x19f   :  { %v582_v61 = vsel %vm513_vm1, %v1968_v60, 0.0  ;;  %v99_v10 = vpop.xlane.xlu0 %98 }
 0x1a0   :  { %583 = vadd.xlane.f32.xlu1 %v582_v61  ;;  %v142_v28 = vsub.f32 0.0, %v99_v10 }
 0x1a6   :  { %v1972_v62 = vpop.eup %1619 }
 0x1a7   :  { %v588_v63 = vsel %vm513_vm1, %v1972_v62, 0.0  ;;  %v1976_v4 = vpop.eup %1621  ;;  %v110_v13 = vpop.permute.xlu0 %109 }
 0x1a8   :  { %589 = vadd.xlane.f32.xlu1 %v588_v63  ;;  %v591_v8 = vsel %vm513_vm1, %v1976_v4, 0.0  ;;  %v112_v15 = vadd.f32 %v110_v13, %v93_v9  ;;  %v145_v17 = vadd.f32 %v141_v14, %v110_v13  ;;  %v113_v19 = vadd.f32 %v110_v13, %v96_v11 }
 0x1a9   :  { %v114_v24 = vadd.f32 %v110_v13, %v99_v10  ;;  %v115_v2 = vadd.f32 %v110_v13, %v102_v6  ;;  %v144_v34 = vadd.f32 %v140_v25, %v110_v13  ;;  %v146_v51 = vadd.f32 %v142_v28, %v110_v13 }
 0x1aa   :  { %v1382_v18 = vmul.f32 -1.442695, %v112_v15  ;;  %v1387_v20 = vmul.f32 -1.442695, %v145_v17  ;;  %v1383_v22 = vmul.f32 -1.442695, %v113_v19  ;;  %v147_v58 = vadd.f32 %v143_v46, %v110_v13 }
 0x1ab   :  { %v1384_v7 = vmul.f32 -1.442695, %v114_v24  ;;  %v1385_v27 = vmul.f32 -1.442695, %v115_v2  ;;  %v1386_v42 = vmul.f32 -1.442695, %v144_v34 }
 0x1ac   :  { %592 = vadd.xlane.f32.xlu1 %v591_v8  ;;  %1623 = vpow2.f32 %v1382_v18  ;;  %v1388_v61 = vmul.f32 -1.442695, %v146_v51  ;;  %v1389_v11 = vmul.f32 -1.442695, %v147_v58  ;;  %v1583_v46 = vld [vmem:[%s2192_s12] sm:$0xff]   ;;  %v1588_v51 = vld [vmem:[%s2192_s12 + $0x28] sm:$0xff]  }
 0x1ad   :  { %1625 = vpow2.f32 %v1387_v20  ;;  %1514 = vmatprep.subr.bf16.mxu0 %v1583_v46 }
 0x1ae   :  { %1627 = vpow2.f32 %v1383_v22  ;;  %1515 = vmatpush3.bf16.msra.mxu0 %v1583_v46 }
 0x1b6   :  { %v1624_v23 = vpop.eup %1623 }
 0x1b7   :  { %v1626_v26 = vpop.eup %1625  ;;  %v128_v5 = vadd.f32 1.0, %v1624_v23 }
 0x1b8   :  { %v161_v12 = vadd.f32 1.0, %v1626_v26  ;;  %v1628_v1 = vpop.eup %1627 }
 0x1b9   :  { %1629 = vrcp.f32 %v128_v5  ;;  %v129_v21 = vadd.f32 1.0, %v1628_v1 }
 0x1ba   :  { %1631 = vpow2.f32 %v1384_v7 }
 0x1bb   :  { %1633 = vrcp.f32 %v161_v12 }
 0x1c3   :  { %v1630_v35 = vpop.eup %1629 }
 0x1c4   :  { %v1632_v36 = vpop.eup %1631  ;;  %v611_v31 = vrot.slane %v1630_v35, %v1983_v33 }
 0x1c5   :  { %v1634_v39 = vpop.eup %1633  ;;  %v130_v44 = vadd.f32 1.0, %v1632_v36 }
 0x1c6   :  { %v686_v50 = vrot.slane %v1634_v39, %v1983_v33 }
 0x20d   :  { %v540_v16 = vpop.xlane.xlu1 %539 }
 0x20e   :  { %1635 = vrcp.f32 %v540_v16 }
 0x20f   :  { %1637 = vrcp.f32 %v129_v21 }
 0x211   :  { %v587_v32 = vpop.xlane.xlu1 %586 }
 0x212   :  { %1639 = vrcp.f32 %v587_v32 }
 0x213   :  { %1641 = vpow2.f32 %v1385_v27 }
 0x215   :  { %v543_v38 = vpop.xlane.xlu1 %542 }
 0x216   :  { %1643 = vrcp.f32 %v543_v38 }
 0x217   :  { %1645 = vpow2.f32 %v1386_v42 }
 0x218   :  { %v1636_v43 = vpop.eup %1635  ;;  %1647 = vrcp.f32 %v130_v44 }
 0x219   :  { %v551_v45 = vmul.f32 %v1636_v43, %v1943_v37  ;;  %v1638_v48 = vpop.eup %1637 }
 0x21a   :  { %v615_v37 = vrot.slane %v1638_v48, %v1983_v33 }
 0x21b   :  { %v659_v49 = vmul.f32 %v611_v31, %v551_v45 }
 0x21c   :  { %v1640_v52 = vpop.eup %1639 }
 0x21d   :  { %v1642_v54 = vpop.eup %1641  ;;  %v546_v55 = vpop.xlane.xlu1 %545  ;;  %v663_v56 = vsel %vm513_vm1, %v659_v49, 0.0  ;;  %v597_v57 = vmul.f32 %v1640_v52, %v1947_v41  ;;  %v1584_v49 = vld [vmem:[%s2192_s12 + $0x8] sm:$0xff]   ;;  %v1589_v52 = vld [vmem:[%s2192_s12 + $0x30] sm:$0xff]  }
 0x21e   :  { %1649 = vrcp.f32 %v546_v55  ;;  %664 = vadd.xlane.f32.xlu1 %v663_v56  ;;  %v131_v8 = vadd.f32 1.0, %v1642_v54  ;;  %1516 = vmatprep.subr.bf16.mxu0 %v1584_v49  ;;  %v1590_v54 = vld [vmem:[%s2192_s12 + $0x38] sm:$0xff]   ;;  %v71_v56 = vld [vmem:[%s2193_s3 + $0x1] sm:$0x1] }
 0x21f   :  { %v724_v59 = vmul.f32 %v686_v50, %v597_v57  ;;  %1651 = vpow2.f32 %v1388_v61  ;;  %1517 = vmatpush3.bf16.msra.mxu0 %v1584_v49  ;;  %v1587_v50 = vld [vmem:[%s2192_s12 + $0x20] sm:$0xff]  }
 0x220   :  { %v1644_v63 = vpop.eup %1643  ;;  %1653 = vrcp.f32 %v131_v8 }
 0x221   :  { %v730_v9 = vsel %vm513_vm1, %v724_v59, 0.0  ;;  %v553_v10 = vmul.f32 %v1644_v63, %v1952_v40  ;;  %v1646_v15 = vpop.eup %1645 }
 0x222   :  { %731 = vadd.xlane.f32.xlu0 %v730_v9  ;;  %v1648_v13 = vpop.eup %1647  ;;  %v160_v19 = vadd.f32 1.0, %v1646_v15 }
 0x223   :  { %v660_v14 = vmul.f32 %v615_v37, %v553_v10  ;;  %v619_v22 = vrot.slane %v1648_v13, %v1983_v33 }
 0x225   :  { %v549_v41 = vpop.xlane.xlu1 %548  ;;  %v666_v17 = vsel %vm513_vm1, %v660_v14, 0.0 }
 0x226   :  { %1655 = vrcp.f32 %v549_v41  ;;  %667 = vadd.xlane.f32.xlu1 %v666_v17  ;;  %v1390_v41 = vld [vmem:[%s2194_s7] ss:$0 sm:$0xff] }
 0x227   :  { %1657 = vpow2.f32 %v1389_v11 }
 0x228   :  { %v1650_v18 = vpop.eup %1649  ;;  %1659 = vrcp.f32 %v160_v19 }
 0x229   :  { %v555_v20 = vmul.f32 %v1650_v18, %v1957_v47  ;;  %v1652_v23 = vpop.eup %1651  ;;  %v775_v18 = vld [vmem:[%s2195_s4] sm:$0xff] }
 0x22a   :  { %v1654_v5 = vpop.eup %1653  ;;  %v162_v7 = vadd.f32 1.0, %v1652_v23 }
 0x22b   :  { %v661_v40 = vmul.f32 %v619_v22, %v555_v20  ;;  %v623_v2 = vrot.slane %v1654_v5, %v1983_v33  ;;  %v70_v20 = vld [vmem:[%s2193_s3] sm:$0x1] }
 0x22d   :  { %v584_v24 = vpop.xlane.xlu1 %583  ;;  %v669_v26 = vsel %vm513_vm1, %v661_v40, 0.0 }
 0x22e   :  { %1661 = vrcp.f32 %v584_v24  ;;  %670 = vadd.xlane.f32.xlu1 %v669_v26 }
 0x22f   :  { %1663 = vrcp.f32 %v162_v7  ;;  %v72_v7 = vld [vmem:[%s2193_s3 + $0x2] sm:$0x1] }
 0x230   :  { %v1656_v6 = vpop.eup %1655 }
 0x231   :  { %v1658_v12 = vpop.eup %1657  ;;  %v557_v1 = vmul.f32 %v1656_v6, %v1962_v53 }
 0x232   :  { %v163_v47 = vadd.f32 1.0, %v1658_v12  ;;  %v1660_v25 = vpop.eup %1659 }
 0x233   :  { %v662_v3 = vmul.f32 %v623_v2, %v557_v1  ;;  %v682_v34 = vrot.slane %v1660_v25, %v1983_v33 }
 0x235   :  { %v590_v21 = vpop.xlane.xlu1 %589  ;;  %v672_v16 = vsel %vm513_vm1, %v662_v3, 0.0 }
 0x236   :  { %1665 = vrcp.f32 %v590_v21  ;;  %673 = vadd.xlane.f32.xlu1 %v672_v16  ;;  %v73_v16 = vld [vmem:[%s2193_s3 + $0x3] sm:$0x1] }
 0x237   :  { %1667 = vrcp.f32 %v163_v47 }
 0x238   :  { %v1662_v27 = vpop.eup %1661 }
 0x239   :  { %v593_v29 = vpop.xlane.xlu1 %592  ;;  %v595_v32 = vmul.f32 %v1662_v27, %v1968_v60  ;;  %v1664_v36 = vpop.eup %1663 }
 0x23a   :  { %1669 = vrcp.f32 %v593_v29  ;;  %v690_v28 = vrot.slane %v1664_v36, %v1983_v33 }
 0x23b   :  { %v723_v53 = vmul.f32 %v682_v34, %v595_v32  ;;  %1671 = vrcp.f32 %v71_v56 }
 0x23c   :  { %1673 = vrcp.f32 %v70_v20 }
 0x23d   :  { %v727_v35 = vsel %vm513_vm1, %v723_v53, 0.0 }
 0x23e   :  { %728 = vadd.xlane.f32.xlu1 %v727_v35 }
 0x240   :  { %v1666_v38 = vpop.eup %1665 }
 0x241   :  { %v599_v39 = vmul.f32 %v1666_v38, %v1972_v62  ;;  %v1668_v31 = vpop.eup %1667 }
 0x242   :  { %v694_v45 = vrot.slane %v1668_v31, %v1983_v33  ;;  %v1586_v33 = vld [vmem:[%s2192_s12 + $0x18] sm:$0xff]  }
 0x243   :  { %v725_v42 = vmul.f32 %v690_v28, %v599_v39 }
 0x244   :  { %v1670_v43 = vpop.eup %1669 }
 0x245   :  { %v733_v44 = vsel %vm513_vm1, %v725_v42, 0.0  ;;  %v601_v60 = vmul.f32 %v1670_v43, %v1976_v4  ;;  %v1585_v4 = vld [vmem:[%s2192_s12 + $0x10] sm:$0xff]   ;;  %v1672_v10 = vpop.eup %1671 }
 0x246   :  { %734 = vadd.xlane.f32.xlu1 %v733_v44  ;;  %1518 = vmatprep.subr.bf16.mxu0 %v1585_v4  ;;  %v1674_v27 = vpop.eup %1673 }
 0x247   :  { %v726_v48 = vmul.f32 %v694_v45, %v601_v60  ;;  %1519 = vmatpush3.bf16.msra.mxu0 %v1585_v4 }
 0x248   :  { %1520 = vmatprep.subr.bf16.mxu0 %v1586_v33 }
 0x249   :  { %v736_v62 = vsel %vm513_vm1, %v726_v48, 0.0 }
 0x24a   :  { %737 = vadd.xlane.f32.xlu1 %v736_v62 }
 0x24b   :  { %1521 = vmatpush3.bf16.msra.mxu0 %v1586_v33 }
 0x24c   :  { %1522 = vmatprep.subr.bf16.mxu0 %v1587_v50 }
 0x24f   :  { %1523 = vmatpush3.bf16.msra.mxu0 %v1587_v50 }
 0x250   :  { %1524 = vmatprep.subr.bf16.mxu0 %v1588_v51 }
 0x253   :  { %1525 = vmatpush3.bf16.msra.mxu0 %v1588_v51 }
 0x254   :  { %1526 = vmatprep.subr.bf16.mxu0 %v1589_v52 }
 0x257   :  { %1527 = vmatpush3.bf16.msra.mxu0 %v1589_v52 }
 0x258   :  { %1528 = vmatprep.subr.bf16.mxu0 %v1590_v54 }
 0x25b   :  { %1529 = vmatpush3.bf16.msra.mxu0 %v1590_v54 }
 0x2ab   :  { %v665_v55 = vpop.xlane.xlu1 %664 }
 0x2af   :  { %v732_v57 = vpop.xlane.xlu0 %731 }
 0x2b3   :  { %v668_v58 = vpop.xlane.xlu1 %667 }
 0x2b4   :  { %v740_v59 = vadd.f32 %v732_v57, %v668_v58 }
 0x2b6   :  { %v749_v37 = vrot.slane %v740_v59, 4  ;;  %v784_v13 = vmul.f32 %v1390_v41, %v740_v59 }
 0x2b8   :  { %v750_v61 = vadd.f32 %v749_v37, %v740_v59  ;;  %v788_v40 = vadd.f32 %v784_v13, %v775_v18  ;;  %v803_v59 = vsub.s32 0, %v1980_v30 }
 0x2ba   :  { %v751_v63 = vrot.slane %v750_v61, 2  ;;  %1675 = vtanh.f32 %v788_v40 }
 0x2bb   :  { %v671_v15 = vpop.xlane.xlu1 %670 }
 0x2bc   :  { %v752_v8 = vadd.f32 %v751_v63, %v750_v61 }
 0x2be   :  { %v753_v9 = vrot.slane %v752_v8, 1 }
 0x2c0   :  { %v754_v11 = vadd.f32 %v753_v9, %v752_v8 }
 0x2c2   :  { %v770_v14 = vmul.f32 %v1672_v10, %v754_v11  ;;  %v795_v10 = vld [vmem:[%s2196_s8] sm:$0x1] }
 0x2c3   :  { %v674_v17 = vpop.xlane.xlu1 %673 }
 0x2c4   :  { %807 = vperm.xlu0 %1581, %v770_v14   ;;  %v1676_v39 = vpop.eup %1675 }
 0x2cb   :  { %v729_v19 = vpop.xlane.xlu1 %728 }
 0x2cc   :  { %v739_v22 = vadd.f32 %v729_v19, %v665_v55 }
 0x2ce   :  { %v743_v23 = vrot.slane %v739_v22, 4  ;;  %v783_v24 = vmul.f32 %v1390_v41, %v739_v22 }
 0x2d0   :  { %v744_v26 = vadd.f32 %v743_v23, %v739_v22  ;;  %v787_v5 = vadd.f32 %v783_v24, %v775_v18 }
 0x2d2   :  { %v745_v6 = vrot.slane %v744_v26, 2  ;;  %1677 = vtanh.f32 %v787_v5 }
 0x2d3   :  { %v735_v12 = vpop.xlane.xlu1 %734  ;;  %1679 = vrcp.f32 %v72_v7 }
 0x2d4   :  { %v746_v1 = vadd.f32 %v745_v6, %v744_v26  ;;  %v741_v2 = vadd.f32 %v735_v12, %v671_v15  ;;  %1681 = vrcp.f32 %v73_v16 }
 0x2d6   :  { %v755_v3 = vrot.slane %v741_v2, 4  ;;  %v785_v47 = vmul.f32 %v1390_v41, %v741_v2  ;;  %v747_v21 = vrot.slane %v746_v1, 1 }
 0x2d7   :  { %v738_v25 = vpop.xlane.xlu1 %737 }
 0x2d8   :  { %v756_v29 = vadd.f32 %v755_v3, %v741_v2  ;;  %v742_v32 = vadd.f32 %v738_v25, %v674_v17  ;;  %v748_v34 = vadd.f32 %v747_v21, %v746_v1  ;;  %v789_v53 = vadd.f32 %v785_v47, %v775_v18 }
 0x2da   :  { %v757_v35 = vrot.slane %v756_v29, 2  ;;  %v761_v36 = vrot.slane %v742_v32, 4  ;;  %v786_v38 = vmul.f32 %v1390_v41, %v742_v32  ;;  %v768_v28 = vmul.f32 %v1674_v27, %v748_v34  ;;  %v1399_v41 = vld [vmem:[%s2197_s13] ss:$0 sm:$0xff] }
 0x2db   :  { %1683 = vtanh.f32 %v789_v53 }
 0x2dc   :  { %v1678_v31 = vpop.eup %1677  ;;  %v758_v42 = vadd.f32 %v757_v35, %v756_v29  ;;  %v762_v43 = vadd.f32 %v761_v36, %v742_v32  ;;  %v790_v44 = vadd.f32 %v786_v38, %v775_v18  ;;  %798 = vperm.xlu1 %1582, %v768_v28  }
 0x2dd   :  { %v836_v60 = vpack.c.bf16 %v1676_v39, %v1678_v31  ;;  %v1680_v48 = vpop.eup %1679  ;;  %v1404_v39 = vld [vmem:[%s2198_s9] ss:$0 sm:$0xff] }
 0x2de   :  { %v763_v45 = vrot.slane %v762_v43, 2  ;;  %1685 = vtanh.f32 %v790_v44  ;;  %v759_v46 = vrot.slane %v758_v42, 1  ;;  %v1682_v50 = vpop.eup %1681 }
 0x2df   :  { %1530 = vmatprep.mubr.bf16.mxu0 %v836_v60 }
 0x2e0   :  { %v764_v62 = vadd.f32 %v763_v45, %v762_v43  ;;  %v760_v49 = vadd.f32 %v759_v46, %v758_v42 }
 0x2e2   :  { %v772_v4 = vmul.f32 %v1680_v48, %v760_v49  ;;  %v765_v33 = vrot.slane %v764_v62, 1  ;;  %v1591_v48 = vld [vmem:[%s2199_s11] sm:$0xff]   ;;  %v1593_v49 = vld [vmem:[%s2199_s11 + $0x10] sm:$0xff]  }
 0x2e3   :  { %1535 = vmatpush3.bf16.msra.mxu1 %v1591_v48 }
 0x2e4   :  { %816 = vperm.xlu1 %1582, %v772_v4   ;;  %v766_v51 = vadd.f32 %v765_v33, %v764_v62  ;;  %v1592_v62 = vld [vmem:[%s2199_s11 + $0x8] sm:$0xff]   ;;  %1536 = vmatprep.subr.bf16.mxu1 %v1711_v0  ;;  %v1594_v4 = vld [vmem:[%s2199_s11 + $0x18] sm:$0xff]  }
 0x2e5   :  { %v1684_v54 = vpop.eup %1683  ;;  %v2078_v33 = vld [vmem:[%s2200_s1 + $0x8] sm:$0xff] }
 0x2e6   :  { %v774_v52 = vmul.f32 %v1682_v50, %v766_v51  ;;  %v2083_v50 = vld [vmem:[%s2200_s1 + $0x10] sm:$0xff]  ;;  %v2088_v51 = vld [vmem:[%s2200_s1] sm:$0xff] }
 0x2e7   :  { %1537 = vmatpush3.bf16.msra.mxu1 %v1592_v62 }
 0x2e8   :  { %v1686_v55 = vpop.eup %1685  ;;  %825 = vperm.xlu1 %1582, %v774_v52   ;;  %1538 = vmatprep.subr.bf16.mxu1 %v1711_v0  ;;  %v1106_v52 = vpack.c.bf16 %v2078_v33, %v2078_v33 }
 0x2e9   :  { %v837_v56 = vpack.c.bf16 %v1686_v55, %v1684_v54  ;;  %v2095_v54 = vld [vmem:[%s2200_s1 + $0x18] sm:$0xff]  ;;  %v1107_v55 = vpack.c.bf16 %v2083_v50, %v2083_v50 }
 0x2eb   :  { %1531 = vmatmul.mubr.bf16.vlgmr.msra.gmra.mrb[24].mxu0 %v837_v56  ;;  %1539 = vmatpush3.bf16.msra.mxu1 %v1593_v49  ;;  %v1105_v56 = vpack.c.bf16 %v2088_v51, %v2088_v51 }
 0x2ec   :  { %1540 = vmatprep.subr.bf16.mxu1 %v1711_v0 }
 0x2ef   :  { %1541 = vmatpush3.bf16.msra.mxu1 %v1594_v4 }
 0x2f0   :  { %1542 = vmatprep.subr.bf16.mxu1 %v1711_v0 }
 0x343   :  { %v808_v61 = vpop.permute.xlu0 %807 }
 0x344   :  { %v813_v11 = vrot.slane %v808_v61, %v803_v59  ;;  %v1129_v61 = vunpack.c.l.b16 %v1105_v56 }
 0x346   :  { %v833_v13 = vmul.f32 %v813_v11, %v795_v10 }
 0x348   :  { %v973_v1 = vrot.slane %v833_v13, %v803_v59 }
 0x35b   :  { %v799_v57 = vpop.permute.xlu1 %798 }
 0x35c   :  { %v804_v8 = vrot.slane %v799_v57, %v803_v59  ;;  %v1130_v57 = vunpack.c.l.b16 %v1106_v52 }
 0x35e   :  { %v832_v15 = vmul.f32 %v804_v8, %v795_v10  ;;  %v1596_v8 = vld [vmem:[%s2199_s11 + $0x28] sm:$0xff]  }
 0x360   :  { %v969_v40 = vrot.slane %v832_v15, %v803_v59 }
 0x363   :  { %v817_v58 = vpop.permute.xlu1 %816 }
 0x364   :  { %v822_v63 = vrot.slane %v817_v58, %v803_v59  ;;  %v1595_v58 = vld [vmem:[%s2199_s11 + $0x20] sm:$0xff]  }
 0x365   :  { %1543 = vmatpush3.bf16.msra.mxu1 %v1595_v58 }
 0x366   :  { %v834_v14 = vmul.f32 %v822_v63, %v795_v10  ;;  %v1133_v63 = vrot.slane %v1130_v57, 7  ;;  %1544 = vmatprep.subr.bf16.mxu1 %v1711_v0 }
 0x367   :  { %v826_v37 = vpop.permute.xlu1 %825 }
 0x368   :  { %v831_v9 = vrot.slane %v826_v37, %v803_v59  ;;  %v977_v19 = vrot.slane %v834_v14, %v803_v59  ;;  %v1131_v37 = vunpack.c.l.b16 %v1107_v55  ;;  %v1134_v11 = vsel %vm624_vm3, %v1133_v63, %v1129_v61  ;;  %v1597_v14 = vld [vmem:[%s2199_s11 + $0x30] sm:$0xff]  }
 0x369   :  { %1545 = vmatpush3.bf16.msra.mxu1 %v1596_v8 }
 0x36a   :  { %v835_v17 = vmul.f32 %v831_v9, %v795_v10  ;;  %v1135_v10 = vrot.slane %v1131_v37, 6  ;;  %1546 = vmatprep.subr.bf16.mxu1 %v1711_v0 }
 0x36c   :  { %v981_v5 = vrot.slane %v835_v17, %v803_v59  ;;  %v1108_v59 = vpack.c.bf16 %v2095_v54, %v2095_v54  ;;  %v1598_v17 = vld [vmem:[%s2199_s11 + $0x38] sm:$0xff]  }
 0x36d   :  { %1547 = vmatpush3.bf16.msra.mxu1 %v1597_v14 }
 0x36e   :  { %v1132_v9 = vunpack.c.l.b16 %v1108_v59  ;;  %1548 = vmatprep.subr.bf16.mxu1 %v1711_v0 }
 0x370   :  { %v1137_v15 = vrot.slane %v1132_v9, 5 }
 0x371   :  { %1549 = vmatpush3.bf16.msra.mxu1 %v1598_v17 }
 0x372   :  { %1554 = vmatprep.subr.bf16.mxu1 %v1711_v0 }
 0x3be   :  { %v1532_v18 = vpop.f32.mrb[24].mxu0 }
 0x3bf   :  { %v960_v30 = vadd.f32 %v1532_v18, %v1399_v41  ;;  %v936_v20 = vpop.f32.mrb[25].mxu0 }
 0x3c0   :  { %v958_v22 = vadd.f32 %v1399_v41, %v936_v20  ;;  %v1533_v23 = vpop.f32.mrb[26].mxu0 }
 0x3c1   :  { %v988_v24 = vadd.f32 %v977_v19, %v960_v30  ;;  %v961_v26 = vadd.f32 %v1533_v23, %v1399_v41  ;;  %v939_v6 = vpop.f32.mrb[27].mxu0  ;;  %v1599_v30 = vld [vmem:[%s2201_s10] sm:$0xff]  }
 0x3c2   :  { %v986_v7 = vadd.f32 %v969_v40, %v958_v22  ;;  %v959_v12 = vadd.f32 %v1399_v41, %v939_v6  ;;  %v1136_v41 = vsel %vm625_vm4, %v1135_v10, %v1134_v11  ;;  %v66_v19 = vld [vmem:[%s2202_s2] sm:$0xff]  ;;  %v67_v22 = vld [vmem:[%s2202_s2 + $0x8] sm:$0xff] }
 0x3c3   :  { %v1402_v2 = vmul.f32 -1.442695, %v988_v24  ;;  %v989_v3 = vadd.f32 %v981_v5, %v961_v26  ;;  %v1138_v13 = vsel %vm627_vm5, %v1137_v15, %v1136_v41  ;;  %v68_v26 = vld [vmem:[%s2202_s2 + $0x10] sm:$0xff]  ;;  %v1600_v6 = vld [vmem:[%s2201_s10 + $0x8] sm:$0xff]  }
 0x3c4   :  { %v1400_v47 = vmul.f32 -1.442695, %v986_v7  ;;  %v987_v21 = vadd.f32 %v973_v1, %v959_v12  ;;  %v1139_v18 = vpack.c.b16 %v1138_v13, %v1138_v13  ;;  %v69_v7 = vld [vmem:[%s2202_s2 + $0x18] sm:$0xff] }
 0x3c5   :  { %1687 = vpow2.f32 %v1402_v2  ;;  %v1403_v16 = vmul.f32 -1.442695, %v989_v3  ;;  %v1601_v2 = vld [vmem:[%s2201_s10 + $0x10] sm:$0xff]  }
 0x3c6   :  { %1689 = vpow2.f32 %v1400_v47  ;;  %v1401_v25 = vmul.f32 -1.442695, %v987_v21  ;;  %1551 = vmatmul.mubr.bf16.vlgmr.msra.gmra.mrb[8].mxu1 %v1139_v18  ;;  %v1602_v47 = vld [vmem:[%s2201_s10 + $0x18] sm:$0xff]   ;;  %v1603_v21 = vld [vmem:[%s2201_s10 + $0x20] sm:$0xff]  }
 0x3c7   :  { %1691 = vpow2.f32 %v1403_v16  ;;  %1555 = vmatpush3.bf16.msra.mxu1 %v1599_v30  ;;  %1570 = vmatprep.mubr.msk.bf16.mxu1 %vm1712_vm0, %v1711_v0  ;;  %v1604_v16 = vld [vmem:[%s2201_s10 + $0x28] sm:$0xff]  }
 0x3c8   :  { %1693 = vpow2.f32 %v1401_v25  ;;  %1556 = vmatprep.subr.bf16.mxu1 %v1711_v0  ;;  %v1605_v25 = vld [vmem:[%s2201_s10 + $0x30] sm:$0xff]  }
 0x3cb   :  { %1557 = vmatpush3.bf16.msra.mxu1 %v1600_v6 }
 0x3cc   :  { %1558 = vmatprep.subr.bf16.mxu1 %v1711_v0 }
 0x3cf   :  { %v1688_v27 = vpop.eup %1687  ;;  %1559 = vmatpush3.bf16.msra.mxu1 %v1601_v2 }
 0x3d0   :  { %v1690_v29 = vpop.eup %1689  ;;  %v1004_v32 = vadd.f32 1.0, %v1688_v27  ;;  %1560 = vmatprep.subr.bf16.mxu1 %v1711_v0  ;;  %v1606_v27 = vld [vmem:[%s2201_s10 + $0x38] sm:$0xff]  }
 0x3d1   :  { %v1692_v34 = vpop.eup %1691  ;;  %v1002_v53 = vadd.f32 1.0, %v1690_v29 }
 0x3d2   :  { %v1694_v35 = vpop.eup %1693  ;;  %v1005_v38 = vadd.f32 1.0, %v1692_v34 }
 0x3d3   :  { %1695 = vrcp.f32 %v1002_v53  ;;  %v1003_v36 = vadd.f32 1.0, %v1694_v35  ;;  %1561 = vmatpush3.bf16.msra.mxu1 %v1602_v47  ;;  %v1343_v47 = vrot.slane %v2083_v50, 6 }
 0x3d4   :  { %1697 = vrcp.f32 %v1004_v32  ;;  %1562 = vmatprep.subr.bf16.mxu1 %v1711_v0 }
 0x3d5   :  { %1699 = vrcp.f32 %v1003_v36 }
 0x3d6   :  { %1701 = vrcp.f32 %v1005_v38 }
 0x3d7   :  { %1563 = vmatpush3.bf16.msra.mxu1 %v1603_v21 }
 0x3d8   :  { %1564 = vmatprep.subr.bf16.mxu1 %v1711_v0 }
 0x3db   :  { %1565 = vmatpush3.bf16.msra.mxu1 %v1604_v16  ;;  %v1345_v16 = vrot.slane %v2095_v54, 5 }
 0x3dc   :  { %1566 = vmatprep.subr.bf16.mxu1 %v1711_v0 }
 0x3dd   :  { %v1696_v28 = vpop.eup %1695 }
 0x3de   :  { %v1698_v31 = vpop.eup %1697  ;;  %v1021_v42 = vmul.f32 %v1696_v28, %v1404_v39 }
 0x3df   :  { %v1700_v43 = vpop.eup %1699  ;;  %v1023_v60 = vmul.f32 %v1698_v31, %v1404_v39  ;;  %1567 = vmatpush3.bf16.msra.mxu1 %v1605_v25 }
 0x3e0   :  { %1025 = vadd.xlane.f32.xlu1 %v1021_v42  ;;  %v1022_v44 = vmul.f32 %v1700_v43, %v1404_v39  ;;  %v1702_v45 = vpop.eup %1701  ;;  %1568 = vmatprep.subr.bf16.mxu1 %v1711_v0 }
 0x3e1   :  { %v1024_v46 = vmul.f32 %v1702_v45, %v1404_v39 }
 0x3e2   :  { %1027 = vadd.xlane.f32.xlu0 %v1022_v44 }
 0x3e3   :  { %1569 = vmatpush3.bf16.msra.mxu1 %v1606_v27 }
 0x3e4   :  { %1029 = vadd.xlane.f32.xlu1 %v1023_v60 }
 0x3e8   :  { %1031 = vadd.xlane.f32.xlu1 %v1024_v46 }
 0x46d   :  { %v1026_v20 = vpop.xlane.xlu1 %1025 }
 0x46e   :  { %v1033_v40 = vmul.f32 %v1026_v20, %v66_v19 }
 0x46f   :  { %v1028_v23 = vpop.xlane.xlu0 %1027 }
 0x470   :  { %v1034_v24 = vmul.f32 %v1028_v23, %v67_v22  ;;  %1039 = vperm.xlu0 %1581, %v1033_v40  }
 0x471   :  { %v1030_v5 = vpop.xlane.xlu1 %1029 }
 0x472   :  { %1044 = vperm.xlu1 %1582, %v1034_v24   ;;  %v1035_v12 = vmul.f32 %v1030_v5, %v68_v26 }
 0x475   :  { %v1032_v1 = vpop.xlane.xlu1 %1031 }
 0x476   :  { %v1036_v3 = vmul.f32 %v1032_v1, %v69_v7  ;;  %1049 = vperm.xlu1 %1582, %v1035_v12  }
 0x478   :  { %1054 = vperm.xlu0 %1581, %v1036_v3   ;;  %v1341_v3 = vrot.slane %v2078_v33, 7 }
 0x47a   :  { %v1342_v21 = vsel %vm624_vm3, %v1341_v3, %v2088_v51 }
 0x47b   :  { %v1344_v25 = vsel %vm625_vm4, %v1343_v47, %v1342_v21 }
 0x4ef   :  { %v1040_v29 = vpop.permute.xlu0 %1039 }
 0x4f0   :  { %v1057_v32 = vmul.f32 %v1040_v29, %v2088_v51  ;;  %v1346_v29 = vsel %vm627_vm5, %v1345_v16, %v1344_v25 }
 0x4f1   :  { %v1045_v34 = vpop.permute.xlu1 %1044 }
 0x4f2   :  { %v1061_v53 = vrot.slane %v1057_v32, 4  ;;  %v1058_v35 = vmul.f32 %v1045_v34, %v2078_v33 }
 0x4f4   :  { %v1062_v36 = vadd.f32 %v1061_v53, %v1057_v32  ;;  %v1067_v38 = vrot.slane %v1058_v35, 4 }
 0x4f5   :  { %v1050_v39 = vpop.permute.xlu1 %1049 }
 0x4f6   :  { %v1063_v28 = vrot.slane %v1062_v36, 2  ;;  %v1068_v31 = vadd.f32 %v1067_v38, %v1058_v35  ;;  %v1059_v42 = vmul.f32 %v1050_v39, %v2083_v50 }
 0x4f7   :  { %v1055_v0 = vpop.permute.xlu0 %1054 }
 0x4f8   :  { %v1064_v43 = vadd.f32 %v1063_v28, %v1062_v36  ;;  %v1069_v44 = vrot.slane %v1068_v31, 2  ;;  %v1073_v60 = vrot.slane %v1059_v42, 4  ;;  %v1060_v45 = vmul.f32 %v1055_v0, %v2095_v54 }
 0x4fa   :  { %v1065_v46 = vrot.slane %v1064_v43, 1  ;;  %v1070_v48 = vadd.f32 %v1069_v44, %v1068_v31  ;;  %v1074_v62 = vadd.f32 %v1073_v60, %v1059_v42  ;;  %v1079_v49 = vrot.slane %v1060_v45, 4 }
 0x4fc   :  { %v1071_v4 = vrot.slane %v1070_v48, 1  ;;  %v1075_v52 = vrot.slane %v1074_v62, 2  ;;  %v1080_v55 = vadd.f32 %v1079_v49, %v1060_v45  ;;  %v1066_v56 = vadd.f32 %v1065_v46, %v1064_v43 }
 0x4fe   :  { %v1072_v57 = vadd.f32 %v1071_v4, %v1070_v48  ;;  %v1076_v58 = vadd.f32 %v1075_v52, %v1074_v62  ;;  %v1081_v59 = vrot.slane %v1080_v55, 2  ;;  %v1085_v8 = vpack.c.bf16 %v1066_v56, %v1066_v56 }
 0x500   :  { %v1086_v37 = vpack.c.bf16 %v1072_v57, %v1072_v57  ;;  %v1353_v61 = vsel %vm624_vm3, %v1072_v57, %v1066_v56  ;;  %v1077_v63 = vrot.slane %v1076_v58, 1  ;;  %v1082_v9 = vadd.f32 %v1081_v59, %v1080_v55 }
 0x501   :  { %v1233_v17 = vunpack.c.l.b16 %v1085_v8 }
 0x502   :  { %v1078_v10 = vadd.f32 %v1077_v63, %v1076_v58  ;;  %v1234_v11 = vunpack.c.l.b16 %v1086_v37  ;;  %v1083_v14 = vrot.slane %v1082_v9, 1 }
 0x504   :  { %v1087_v15 = vpack.c.bf16 %v1078_v10, %v1078_v10  ;;  %v1354_v41 = vsel %vm625_vm4, %v1078_v10, %v1353_v61  ;;  %v1084_v13 = vadd.f32 %v1083_v14, %v1082_v9  ;;  %v1237_v19 = vsel %vm624_vm3, %v1234_v11, %v1233_v17 }
 0x506   :  { %v1235_v18 = vunpack.c.l.b16 %v1087_v15  ;;  %v1088_v30 = vpack.c.bf16 %v1084_v13, %v1084_v13  ;;  %v1355_v20 = vsel %vm627_vm5, %v1084_v13, %v1354_v41 }
 0x508   :  { %v1238_v22 = vsel %vm625_vm4, %v1235_v18, %v1237_v19  ;;  %v1236_v40 = vunpack.c.l.b16 %v1088_v30 }
 0x50a   :  { %v1239_v23 = vsel %vm627_vm5, %v1236_v40, %v1238_v22 }
 0x50b   :  { %v1240_v24 = vpack.c.b16 %v1239_v23, %v1239_v23 }
 0x50d   :  { %1571 = vmatmul.mubr.bf16.vlgmr.msra.gmra.mrb[8].mxu1 %v1240_v24 }
 0x5e0   :  { %v1324_v26 = vpop.f32.mrb[8].mxu1 }
 0x5e1   :  { %v1421_v5 = vmul.f32 -1.442695, %v1324_v26  ;;  %v1572_v6 = vpop.f32.mrb[9].mxu1 }
 0x5e2   :  { %v1327_v7 = vpop.f32.mrb[10].mxu1 }
 0x5e3   :  { %1703 = vpow2.f32 %v1421_v5  ;;  %v1573_v12 = vpop.f32.mrb[11].mxu1 }
 0x5ed   :  { %v1704_v1 = vpop.eup %1703 }
 0x5ee   :  { %v1333_v2 = vadd.f32 1.0, %v1704_v1 }
 0x5f0   :  { %1705 = vrcp.f32 %v1333_v2 }
 0x5fa   :  { %v1706_v27 = vpop.eup %1705 }
 0x5fb   :  { %v1336_v32 = vsub.f32 1.0, %v1706_v27  ;;  %v1357_v34 = vmul.f32 %v1706_v27, %v1355_v20 }
 0x5fd   :  { %v1348_v53 = vmul.f32 %v1346_v29, %v1336_v32 }
 0x5ff   :  { %v1358_v35 = vadd.f32 %v1357_v34, %v1348_v53 }
 0x601   :  { %v1359_v36 = vmul.f32 %v1358_v35, %v1358_v35  ;;  %v1371_v42 = vmul.f32 10.0, %v1358_v35 }
 0x603   :  { %v1361_v38 = vsel %vm1360_vm6, %v1359_v36, 0.0 }
 0x604   :  { %1362 = vadd.xlane.f32.xlu1 %v1361_v38 }
 0x691   :  { %v1363_v33 = vpop.xlane.xlu1 %1362 }
 0x692   :  { %1707 = vrsqrt.f32 %v1363_v33  ;;  %vm1366_vm7 = vcmp.eq.f32.partialorder %v1363_v33, inf  ;;  %v1369_v51 = vand.u32 2147483648, %v1363_v33  ;;  %vm1368_vm8 = vcmp.eq.f32.partialorder %v1363_v33, 0.0 }
 0x69c   :  { %v1708_v50 = vpop.eup %1707 }
 0x69d   :  { %v1365_v39 = vmul.f32 %v1708_v50, %v1363_v33 }
 0x69f   :  { %v1367_v54 = vsel %vm1366_vm7, %v1363_v33, %v1365_v39 }
 0x6a0   :  { %v1370_v28 = vsel %vm1368_vm8, %v1369_v51, %v1367_v54 }
 0x6a1   :  { %v1372_v31 = vmax.f32 %v1370_v28, 1e-12 }
 0x6a3   :  { %1709 = vrcp.f32 %v1372_v31 }
 0x6ad   :  { %v1710_v0 = vpop.eup %1709 }
 0x6ae   :  { %v1374_v43 = vmul.f32 %v1710_v0, %v1371_v42 }
 0x6b0   :  { %1375 = vst [vmem:[%s2203_s14] sm:$0xf] %v1374_v43 }

</bundles_post_ra>
